<compile_context>
chip_gen: v7x
topology: tpu7x:2x2x1
jax: 0.10.0
libtpu: 0.0.40
codegen_flags: <defaults>
</compile_context>

<pallas_src>
import functools

import jax
import jax.numpy as jnp
from jax import lax
from jax.experimental import pallas as pl
from jax.experimental.pallas import tpu as pltpu


def _round_up(x, m):
    return (x + m - 1) // m * m


def _fused_conv_kernel(xph_ref, w1_ref, w2_ref, o_ref, g_ref, *, K, B, R, S):
    """conv1(+b1-0.5)->relu -> conv2(+b2-1.0)->relu, fully fused in VMEM.

    xph_ref: (4, 4, Cin, L1)  4x4 phase split of the padded input, flattened
             per phase with lane pitch R:
             xph[rh, rw, c, i*R + j] = x_pad[c, 4*i + rh, 4*j + rw]
    w1_ref : (C1, K*K*Cin + 1) conv1 weights (tap-major, cin fastest) with
             (b1 - 0.5) folded in as the last column.
    w2_ref : (C2, K*K*C1 + 1)  ditto for conv2 with (b2 - 1.0).
    o_ref  : (C2, S)  conv2 output flattened with pitch R
             (valid value at column ho*R + wo, ho < A, wo < B).
    g_ref  : (4, C1, L2) scratch = conv2's input: 2x2 phase split of the
             zero-padded conv1 activations, flattened with pitch R:
             g[2*ph+pw, c, i*R + j] = pad(relu(conv1-.5))[c, 2*i+ph, 2*j+pw]
    """
    xph = xph_ref[...]
    w1 = w1_ref[...]
    w2 = w2_ref[...]
    C1 = g_ref.shape[1]

    ones_row = jnp.ones((1, S), jnp.float32)
    col = lax.broadcasted_iota(jnp.int32, (C1, S), 1)
    lane_valid = (col % R) < B          # mask off the junk pitch columns

    # conv2's input starts as all zeros (this *is* its zero padding).
    g_ref[...] = jnp.zeros_like(g_ref)

    # ---------------- layer 1: one matmul per output parity ----------------
    for ph in range(2):
        for pw in range(2):
            rows = []
            for kh in range(K):
                th = 2 * ph + kh                      # padded-input row tap
                for kw in range(K):
                    tw = 2 * pw + kw
                    off = (th // 4) * R + (tw // 4)   # contiguous lane slice
                    rows.append(xph[th % 4, tw % 4, :, off:off + S])
            rows.append(ones_row)                     # bias term
            m1 = jnp.concatenate(rows, axis=0)        # (K*K*Cin + 1, S)
            acc = jnp.dot(w1, m1, preferred_element_type=jnp.float32)
            y = jnp.maximum(acc, 0.0)                 # relu(conv1 + b1 - .5)
            y = jnp.where(lane_valid, y, 0.0)         # zero the junk lanes
            # parity block lands at grid offset (+1, +1) inside the padding
            g_ref[2 * ph + pw, :, R + 1:R + 1 + S] = y

    # ---------------- layer 2: one matmul over all 25 taps -----------------
    g = g_ref[...]
    rows = []
    for kh in range(K):
        for kw in range(K):
            off = (kh // 2) * R + (kw // 2)
            rows.append(g[(kh % 2) * 2 + (kw % 2), :, off:off + S])
    rows.append(ones_row)
    m2 = jnp.concatenate(rows, axis=0)                # (K*K*C1 + 1, S)
    acc2 = jnp.dot(w2, m2, preferred_element_type=jnp.float32)
    o_ref[...] = jnp.maximum(acc2, 0.0).astype(o_ref.dtype)   # relu(conv2+b2-1)


def model_forward(x_nchw, params):
    """Equivalent of Model.forward: (1, 3, H, W) -> (32, H//4, W//4)."""
    x = x_nchw[0]                                    # (Cin, H, W), stays CHW
    Cin, H, W = x.shape
    assert H % 4 == 0 and W % 4 == 0, "stride-2 x stride-2 phase split"
    K = 5
    C1, C2 = params["w1"].shape[0], params["w2"].shape[0]
    A, B = H // 4, W // 4                            # final output grid
    hq, wq = (H + 4) // 4, (W + 4) // 4              # layer-1 phase grid
    R = _round_up(B + 2, 8)                          # common lane pitch
    S = A * R                                        # flattened spatial width
    L1 = (hq + 1) * R                                # layer-1 buffer (+ slack)
    L2 = S + 3 * R                                   # layer-2 buffer (+ slack)

    # -- glue (tiny, plain JAX): pad + 4x4 phase split + flatten with pitch R
    x_pad = jnp.pad(x, ((0, 0), (2, 2), (2, 2)))     # (Cin, H+4, W+4)
    xph = x_pad.reshape(Cin, hq, 4, wq, 4).transpose(2, 4, 0, 1, 3)
    xph = jnp.pad(xph, ((0, 0),) * 4 + ((0, R - wq),))         # pad to pitch R
    xph = xph.reshape(4, 4, Cin, hq * R)
    xph = jnp.pad(xph, ((0, 0),) * 3 + ((0, L1 - hq * R),))    # tap slack

    # -- weights as (Cout, K*K*Cin + 1) with (bias - sub) folded in
    w1m = params["w1"].transpose(0, 2, 3, 1).reshape(C1, K * K * Cin)
    w1aug = jnp.concatenate([w1m, (params["b1"] - 0.5)[:, None]], axis=1)
    w2m = params["w2"].transpose(0, 2, 3, 1).reshape(C2, K * K * C1)
    w2aug = jnp.concatenate([w2m, (params["b2"] - 1.0)[:, None]], axis=1)

    kernel = functools.partial(_fused_conv_kernel, K=K, B=B, R=R, S=S)
    out_flat = pl.pallas_call(
        kernel,
        out_shape=jax.ShapeDtypeStruct((C2, S), jnp.float32),
        grid=(1,),
        in_specs=[
            pl.BlockSpec(xph.shape, lambda i: (0, 0, 0, 0)),
            pl.BlockSpec(w1aug.shape, lambda i: (0, 0)),
            pl.BlockSpec(w2aug.shape, lambda i: (0, 0)),
        ],
        out_specs=pl.BlockSpec((C2, S), lambda i: (0, 0)),
        scratch_shapes=[pltpu.VMEM((4, C1, L2), jnp.float32)],
        compiler_params=pltpu.CompilerParams(
            dimension_semantics=("arbitrary",)),
        # TODO(synk): for large images, tile A over a "parallel" grid axis so
        # v7x's second TensorCore is used and per-step VMEM stays bounded.
    )(xph, w1aug, w2aug)

    # un-flatten pitch-R lanes back to (C2, A, B) == torch.squeeze(v6, 0)
    return out_flat.reshape(C2, A, R)[:, :, :B]


def reference_forward(x_nchw, params):
    def conv(x, w):
        return lax.conv_general_dilated(
            x, w, window_strides=(2, 2), padding=((2, 2), (2, 2)),
            dimension_numbers=("NCHW", "OIHW", "NCHW"),
            precision=lax.Precision.HIGHEST)

    v = jax.nn.relu(conv(x_nchw, params["w1"])
                    + params["b1"].reshape(1, -1, 1, 1) - 0.5)
    v = jax.nn.relu(conv(v, params["w2"])
                    + params["b2"].reshape(1, -1, 1, 1) - 1.0)
    return v[0]


if __name__ == "__main__":
    key = jax.random.PRNGKey(0)
    k1, k2, k3, k4, k5 = jax.random.split(key, 5)

    # matches the module spec: x1 = torch.randn(1, 3, 56, 56)
    x = jax.random.normal(k1, (1, 3, 56, 56), jnp.float32)
    params = {
        "w1": jax.random.normal(k2, (20, 3, 5, 5), jnp.float32) * 0.1,
        "b1": jax.random.normal(k3, (20,), jnp.float32) * 0.1,
        "w2": jax.random.normal(k4, (32, 20, 5, 5), jnp.float32) * 0.05,
        "b2": jax.random.normal(k5, (32,), jnp.float32) * 0.1,
    }

    out = jax.block_until_ready(jax.jit(model_forward)(x, params))
    ref = jax.block_until_ready(reference_forward(x, params))

    assert out.shape == (32, 14, 14), out.shape
    err = float(jnp.max(jnp.abs(out - ref)))
    assert err < 1e-3, err
    print("KERNEL_OK")
</pallas_src>

<mosaic_0001>
module attributes {stable_mosaic.version = 11 : i64} {
  func.func @_fused_conv_kernel(%arg0: i32, %arg1: memref<4x4x3x256xf32, #tpu.memory_space<vmem>>, %arg2: memref<20x76xf32, #tpu.memory_space<vmem>>, %arg3: memref<32x501xf32, #tpu.memory_space<vmem>>, %arg4: memref<32x224xf32, #tpu.memory_space<vmem>>, %arg5: memref<4x20x272xf32, #tpu.memory_space<vmem>>) attributes {dimension_semantics = [#tpu.dimension_semantics<arbitrary>], iteration_bounds = array<i64: 1>, scalar_prefetch = 0 : i64, scratch_operands = 1 : i64, tpu.core_type = #tpu.core_type<tc>, window_params = [{pipeline_mode = #tpu.pipeline_mode<synchronous>, transform_indices = @transform_0, window_bounds = array<i64: 4, 4, 3, 256>}, {pipeline_mode = #tpu.pipeline_mode<synchronous>, transform_indices = @transform_1, window_bounds = array<i64: 20, 76>}, {pipeline_mode = #tpu.pipeline_mode<synchronous>, transform_indices = @transform_2, window_bounds = array<i64: 32, 501>}, {pipeline_mode = #tpu.pipeline_mode<synchronous>, transform_indices = @transform_3, window_bounds = array<i64: 32, 224>}]} {
    %c0 = arith.constant 0 : index
    %c0_0 = arith.constant 0 : index
    %c0_1 = arith.constant 0 : index
    %c0_2 = arith.constant 0 : index
    %0 = vector.load %arg1[%c0, %c0_0, %c0_1, %c0_2] : memref<4x4x3x256xf32, #tpu.memory_space<vmem>>, vector<4x4x3x256xf32>
    %c0_3 = arith.constant 0 : index
    %c0_4 = arith.constant 0 : index
    %1 = vector.load %arg2[%c0_3, %c0_4] : memref<20x76xf32, #tpu.memory_space<vmem>>, vector<20x76xf32>
    %c0_5 = arith.constant 0 : index
    %c0_6 = arith.constant 0 : index
    %2 = vector.load %arg3[%c0_5, %c0_6] : memref<32x501xf32, #tpu.memory_space<vmem>>, vector<32x501xf32>
    %cst = arith.constant 1.000000e+00 : f32
    %3 = vector.broadcast %cst : f32 to vector<1x224xf32>
    %4 = tpu.iota {dimensions = array<i32: 1>} : vector<20x224xi32>
    %c16_i32 = arith.constant 16 : i32
    %c0_i32 = arith.constant 0 : i32
    %5 = arith.cmpi eq, %c16_i32, %c0_i32 : i32
    %c1_i32 = arith.constant 1 : i32
    %6 = arith.select %5, %c1_i32, %c16_i32 : i32
    %7 = vector.broadcast %6 : i32 to vector<20x224xi32>
    %8 = arith.remsi %4, %7 : vector<20x224xi32>
    %c0_i32_7 = arith.constant 0 : i32
    %9 = vector.broadcast %c0_i32_7 : i32 to vector<20x224xi32>
    %10 = arith.cmpi ne, %8, %9 : vector<20x224xi32>
    %c0_i32_8 = arith.constant 0 : i32
    %11 = vector.broadcast %c0_i32_8 : i32 to vector<20x224xi32>
    %12 = arith.cmpi slt, %8, %11 : vector<20x224xi32>
    %c0_i32_9 = arith.constant 0 : i32
    %13 = arith.cmpi slt, %6, %c0_i32_9 : i32
    %14 = vector.broadcast %13 : i1 to vector<20x224xi1>
    %15 = vector.broadcast %14 : vector<20x224xi1> to vector<20x224xi1>
    %16 = arith.xori %12, %15 : vector<20x224xi1>
    %17 = arith.andi %16, %10 : vector<20x224xi1>
    %18 = vector.broadcast %6 : i32 to vector<20x224xi32>
    %19 = arith.addi %8, %18 : vector<20x224xi32>
    %20 = arith.select %17, %19, %8 : vector<20x224xi1>, vector<20x224xi32>
    %c14_i32 = arith.constant 14 : i32
    %21 = vector.broadcast %c14_i32 : i32 to vector<20x224xi32>
    %22 = arith.cmpi slt, %20, %21 : vector<20x224xi32>
    %cst_10 = arith.constant 0.000000e+00 : f32
    %23 = vector.broadcast %cst_10 : f32 to vector<4x20x272xf32>
    %c0_11 = arith.constant 0 : index
    %c0_12 = arith.constant 0 : index
    %c0_13 = arith.constant 0 : index
    %24 = vector.load %arg5[%c0_11, %c0_12, %c0_13] : memref<4x20x272xf32, #tpu.memory_space<vmem>>, vector<4x20x272xf32>
    tpu.vector_store %arg5[%c0_11, %c0_12, %c0_13], %23 {strides = array<i32>} : memref<4x20x272xf32, #tpu.memory_space<vmem>>, vector<4x20x272xf32>,
    %25 = vector.extract_strided_slice %0 {offsets = [0, 0, 0, 0], sizes = [1, 1, 3, 224], strides = [1, 1, 1, 1]} : vector<4x4x3x256xf32> to vector<1x1x3x224xf32>
    %26 = vector.shape_cast %25 : vector<1x1x3x224xf32> to vector<3x224xf32>
    %27 = vector.extract_strided_slice %0 {offsets = [0, 1, 0, 0], sizes = [1, 1, 3, 224], strides = [1, 1, 1, 1]} : vector<4x4x3x256xf32> to vector<1x1x3x224xf32>
    %28 = vector.shape_cast %27 : vector<1x1x3x224xf32> to vector<3x224xf32>
    %29 = vector.extract_strided_slice %0 {offsets = [0, 2, 0, 0], sizes = [1, 1, 3, 224], strides = [1, 1, 1, 1]} : vector<4x4x3x256xf32> to vector<1x1x3x224xf32>
    %30 = vector.shape_cast %29 : vector<1x1x3x224xf32> to vector<3x224xf32>
    %31 = vector.extract_strided_slice %0 {offsets = [0, 3, 0, 0], sizes = [1, 1, 3, 224], strides = [1, 1, 1, 1]} : vector<4x4x3x256xf32> to vector<1x1x3x224xf32>
    %32 = vector.shape_cast %31 : vector<1x1x3x224xf32> to vector<3x224xf32>
    %33 = vector.extract_strided_slice %0 {offsets = [0, 0, 0, 1], sizes = [1, 1, 3, 224], strides = [1, 1, 1, 1]} : vector<4x4x3x256xf32> to vector<1x1x3x224xf32>
    %34 = vector.shape_cast %33 : vector<1x1x3x224xf32> to vector<3x224xf32>
    %35 = vector.extract_strided_slice %0 {offsets = [1, 0, 0, 0], sizes = [1, 1, 3, 224], strides = [1, 1, 1, 1]} : vector<4x4x3x256xf32> to vector<1x1x3x224xf32>
    %36 = vector.shape_cast %35 : vector<1x1x3x224xf32> to vector<3x224xf32>
    %37 = vector.extract_strided_slice %0 {offsets = [1, 1, 0, 0], sizes = [1, 1, 3, 224], strides = [1, 1, 1, 1]} : vector<4x4x3x256xf32> to vector<1x1x3x224xf32>
    %38 = vector.shape_cast %37 : vector<1x1x3x224xf32> to vector<3x224xf32>
    %39 = vector.extract_strided_slice %0 {offsets = [1, 2, 0, 0], sizes = [1, 1, 3, 224], strides = [1, 1, 1, 1]} : vector<4x4x3x256xf32> to vector<1x1x3x224xf32>
    %40 = vector.shape_cast %39 : vector<1x1x3x224xf32> to vector<3x224xf32>
    %41 = vector.extract_strided_slice %0 {offsets = [1, 3, 0, 0], sizes = [1, 1, 3, 224], strides = [1, 1, 1, 1]} : vector<4x4x3x256xf32> to vector<1x1x3x224xf32>
    %42 = vector.shape_cast %41 : vector<1x1x3x224xf32> to vector<3x224xf32>
    %43 = vector.extract_strided_slice %0 {offsets = [1, 0, 0, 1], sizes = [1, 1, 3, 224], strides = [1, 1, 1, 1]} : vector<4x4x3x256xf32> to vector<1x1x3x224xf32>
    %44 = vector.shape_cast %43 : vector<1x1x3x224xf32> to vector<3x224xf32>
    %45 = vector.extract_strided_slice %0 {offsets = [2, 0, 0, 0], sizes = [1, 1, 3, 224], strides = [1, 1, 1, 1]} : vector<4x4x3x256xf32> to vector<1x1x3x224xf32>
    %46 = vector.shape_cast %45 : vector<1x1x3x224xf32> to vector<3x224xf32>
    %47 = vector.extract_strided_slice %0 {offsets = [2, 1, 0, 0], sizes = [1, 1, 3, 224], strides = [1, 1, 1, 1]} : vector<4x4x3x256xf32> to vector<1x1x3x224xf32>
    %48 = vector.shape_cast %47 : vector<1x1x3x224xf32> to vector<3x224xf32>
    %49 = vector.extract_strided_slice %0 {offsets = [2, 2, 0, 0], sizes = [1, 1, 3, 224], strides = [1, 1, 1, 1]} : vector<4x4x3x256xf32> to vector<1x1x3x224xf32>
    %50 = vector.shape_cast %49 : vector<1x1x3x224xf32> to vector<3x224xf32>
    %51 = vector.extract_strided_slice %0 {offsets = [2, 3, 0, 0], sizes = [1, 1, 3, 224], strides = [1, 1, 1, 1]} : vector<4x4x3x256xf32> to vector<1x1x3x224xf32>
    %52 = vector.shape_cast %51 : vector<1x1x3x224xf32> to vector<3x224xf32>
    %53 = vector.extract_strided_slice %0 {offsets = [2, 0, 0, 1], sizes = [1, 1, 3, 224], strides = [1, 1, 1, 1]} : vector<4x4x3x256xf32> to vector<1x1x3x224xf32>
    %54 = vector.shape_cast %53 : vector<1x1x3x224xf32> to vector<3x224xf32>
    %55 = vector.extract_strided_slice %0 {offsets = [3, 0, 0, 0], sizes = [1, 1, 3, 224], strides = [1, 1, 1, 1]} : vector<4x4x3x256xf32> to vector<1x1x3x224xf32>
    %56 = vector.shape_cast %55 : vector<1x1x3x224xf32> to vector<3x224xf32>
    %57 = vector.extract_strided_slice %0 {offsets = [3, 1, 0, 0], sizes = [1, 1, 3, 224], strides = [1, 1, 1, 1]} : vector<4x4x3x256xf32> to vector<1x1x3x224xf32>
    %58 = vector.shape_cast %57 : vector<1x1x3x224xf32> to vector<3x224xf32>
    %59 = vector.extract_strided_slice %0 {offsets = [3, 2, 0, 0], sizes = [1, 1, 3, 224], strides = [1, 1, 1, 1]} : vector<4x4x3x256xf32> to vector<1x1x3x224xf32>
    %60 = vector.shape_cast %59 : vector<1x1x3x224xf32> to vector<3x224xf32>
    %61 = vector.extract_strided_slice %0 {offsets = [3, 3, 0, 0], sizes = [1, 1, 3, 224], strides = [1, 1, 1, 1]} : vector<4x4x3x256xf32> to vector<1x1x3x224xf32>
    %62 = vector.shape_cast %61 : vector<1x1x3x224xf32> to vector<3x224xf32>
    %63 = vector.extract_strided_slice %0 {offsets = [3, 0, 0, 1], sizes = [1, 1, 3, 224], strides = [1, 1, 1, 1]} : vector<4x4x3x256xf32> to vector<1x1x3x224xf32>
    %64 = vector.shape_cast %63 : vector<1x1x3x224xf32> to vector<3x224xf32>
    %65 = vector.extract_strided_slice %0 {offsets = [0, 0, 0, 16], sizes = [1, 1, 3, 224], strides = [1, 1, 1, 1]} : vector<4x4x3x256xf32> to vector<1x1x3x224xf32>
    %66 = vector.shape_cast %65 : vector<1x1x3x224xf32> to vector<3x224xf32>
    %67 = vector.extract_strided_slice %0 {offsets = [0, 1, 0, 16], sizes = [1, 1, 3, 224], strides = [1, 1, 1, 1]} : vector<4x4x3x256xf32> to vector<1x1x3x224xf32>
    %68 = vector.shape_cast %67 : vector<1x1x3x224xf32> to vector<3x224xf32>
    %69 = vector.extract_strided_slice %0 {offsets = [0, 2, 0, 16], sizes = [1, 1, 3, 224], strides = [1, 1, 1, 1]} : vector<4x4x3x256xf32> to vector<1x1x3x224xf32>
    %70 = vector.shape_cast %69 : vector<1x1x3x224xf32> to vector<3x224xf32>
    %71 = vector.extract_strided_slice %0 {offsets = [0, 3, 0, 16], sizes = [1, 1, 3, 224], strides = [1, 1, 1, 1]} : vector<4x4x3x256xf32> to vector<1x1x3x224xf32>
    %72 = vector.shape_cast %71 : vector<1x1x3x224xf32> to vector<3x224xf32>
    %73 = vector.extract_strided_slice %0 {offsets = [0, 0, 0, 17], sizes = [1, 1, 3, 224], strides = [1, 1, 1, 1]} : vector<4x4x3x256xf32> to vector<1x1x3x224xf32>
    %74 = vector.shape_cast %73 : vector<1x1x3x224xf32> to vector<3x224xf32>
    %75 = tpu.concatenate %26, %28, %30, %32, %34, %36, %38, %40, %42, %44, %46, %48, %50, %52, %54, %56 in 0 : vector<3x224xf32>, vector<3x224xf32>, vector<3x224xf32>, vector<3x224xf32>, vector<3x224xf32>, vector<3x224xf32>, vector<3x224xf32>, vector<3x224xf32>, vector<3x224xf32>, vector<3x224xf32>, vector<3x224xf32>, vector<3x224xf32>, vector<3x224xf32>, vector<3x224xf32>, vector<3x224xf32>, vector<3x224xf32> -> vector<48x224xf32>
    %76 = tpu.concatenate %58, %60, %62, %64, %66, %68, %70, %72, %74, %3 in 0 : vector<3x224xf32>, vector<3x224xf32>, vector<3x224xf32>, vector<3x224xf32>, vector<3x224xf32>, vector<3x224xf32>, vector<3x224xf32>, vector<3x224xf32>, vector<3x224xf32>, vector<1x224xf32> -> vector<28x224xf32>
    %77 = tpu.concatenate %75, %76 in 0 : vector<48x224xf32>, vector<28x224xf32> -> vector<76x224xf32>
    %cst_14 = arith.constant dense<0.000000e+00> : vector<20x224xf32>
    %78 = tpu.matmul %1, %77, %cst_14 {dimension_numbers = #tpu.dot_dimension_numbers<[1], [0], [0], [1], [0, 0, 1, 1], [], []>} : vector<20x76xf32>, vector<76x224xf32>, vector<20x224xf32> -> vector<20x224xf32>
    %cst_15 = arith.constant 0.000000e+00 : f32
    %79 = vector.broadcast %cst_15 : f32 to vector<20x224xf32>
    %80 = arith.maximumf %78, %79 : vector<20x224xf32>
    %cst_16 = arith.constant 0.000000e+00 : f32
    %81 = vector.broadcast %cst_16 : f32 to vector<20x224xf32>
    %82 = arith.select %22, %80, %81 : vector<20x224xi1>, vector<20x224xf32>
    %c0_17 = arith.constant 0 : index
    %c0_18 = arith.constant 0 : index
    %c17 = arith.constant 17 : index
    %83 = vector.load %arg5[%c0_17, %c0_18, %c17] : memref<4x20x272xf32, #tpu.memory_space<vmem>>, vector<1x20x224xf32>
    %84 = vector.shape_cast %83 : vector<1x20x224xf32> to vector<20x224xf32>
    %85 = vector.shape_cast %82 : vector<20x224xf32> to vector<1x20x224xf32>
    tpu.vector_store %arg5[%c0_17, %c0_18, %c17], %85 {strides = array<i32>} : memref<4x20x272xf32, #tpu.memory_space<vmem>>, vector<1x20x224xf32>,
    %86 = vector.extract_strided_slice %0 {offsets = [0, 2, 0, 0], sizes = [1, 1, 3, 224], strides = [1, 1, 1, 1]} : vector<4x4x3x256xf32> to vector<1x1x3x224xf32>
    %87 = vector.shape_cast %86 : vector<1x1x3x224xf32> to vector<3x224xf32>
    %88 = vector.extract_strided_slice %0 {offsets = [0, 3, 0, 0], sizes = [1, 1, 3, 224], strides = [1, 1, 1, 1]} : vector<4x4x3x256xf32> to vector<1x1x3x224xf32>
    %89 = vector.shape_cast %88 : vector<1x1x3x224xf32> to vector<3x224xf32>
    %90 = vector.extract_strided_slice %0 {offsets = [0, 0, 0, 1], sizes = [1, 1, 3, 224], strides = [1, 1, 1, 1]} : vector<4x4x3x256xf32> to vector<1x1x3x224xf32>
    %91 = vector.shape_cast %90 : vector<1x1x3x224xf32> to vector<3x224xf32>
    %92 = vector.extract_strided_slice %0 {offsets = [0, 1, 0, 1], sizes = [1, 1, 3, 224], strides = [1, 1, 1, 1]} : vector<4x4x3x256xf32> to vector<1x1x3x224xf32>
    %93 = vector.shape_cast %92 : vector<1x1x3x224xf32> to vector<3x224xf32>
    %94 = vector.extract_strided_slice %0 {offsets = [0, 2, 0, 1], sizes = [1, 1, 3, 224], strides = [1, 1, 1, 1]} : vector<4x4x3x256xf32> to vector<1x1x3x224xf32>
    %95 = vector.shape_cast %94 : vector<1x1x3x224xf32> to vector<3x224xf32>
    %96 = vector.extract_strided_slice %0 {offsets = [1, 2, 0, 0], sizes = [1, 1, 3, 224], strides = [1, 1, 1, 1]} : vector<4x4x3x256xf32> to vector<1x1x3x224xf32>
    %97 = vector.shape_cast %96 : vector<1x1x3x224xf32> to vector<3x224xf32>
    %98 = vector.extract_strided_slice %0 {offsets = [1, 3, 0, 0], sizes = [1, 1, 3, 224], strides = [1, 1, 1, 1]} : vector<4x4x3x256xf32> to vector<1x1x3x224xf32>
    %99 = vector.shape_cast %98 : vector<1x1x3x224xf32> to vector<3x224xf32>
    %100 = vector.extract_strided_slice %0 {offsets = [1, 0, 0, 1], sizes = [1, 1, 3, 224], strides = [1, 1, 1, 1]} : vector<4x4x3x256xf32> to vector<1x1x3x224xf32>
    %101 = vector.shape_cast %100 : vector<1x1x3x224xf32> to vector<3x224xf32>
    %102 = vector.extract_strided_slice %0 {offsets = [1, 1, 0, 1], sizes = [1, 1, 3, 224], strides = [1, 1, 1, 1]} : vector<4x4x3x256xf32> to vector<1x1x3x224xf32>
    %103 = vector.shape_cast %102 : vector<1x1x3x224xf32> to vector<3x224xf32>
    %104 = vector.extract_strided_slice %0 {offsets = [1, 2, 0, 1], sizes = [1, 1, 3, 224], strides = [1, 1, 1, 1]} : vector<4x4x3x256xf32> to vector<1x1x3x224xf32>
    %105 = vector.shape_cast %104 : vector<1x1x3x224xf32> to vector<3x224xf32>
    %106 = vector.extract_strided_slice %0 {offsets = [2, 2, 0, 0], sizes = [1, 1, 3, 224], strides = [1, 1, 1, 1]} : vector<4x4x3x256xf32> to vector<1x1x3x224xf32>
    %107 = vector.shape_cast %106 : vector<1x1x3x224xf32> to vector<3x224xf32>
    %108 = vector.extract_strided_slice %0 {offsets = [2, 3, 0, 0], sizes = [1, 1, 3, 224], strides = [1, 1, 1, 1]} : vector<4x4x3x256xf32> to vector<1x1x3x224xf32>
    %109 = vector.shape_cast %108 : vector<1x1x3x224xf32> to vector<3x224xf32>
    %110 = vector.extract_strided_slice %0 {offsets = [2, 0, 0, 1], sizes = [1, 1, 3, 224], strides = [1, 1, 1, 1]} : vector<4x4x3x256xf32> to vector<1x1x3x224xf32>
    %111 = vector.shape_cast %110 : vector<1x1x3x224xf32> to vector<3x224xf32>
    %112 = vector.extract_strided_slice %0 {offsets = [2, 1, 0, 1], sizes = [1, 1, 3, 224], strides = [1, 1, 1, 1]} : vector<4x4x3x256xf32> to vector<1x1x3x224xf32>
    %113 = vector.shape_cast %112 : vector<1x1x3x224xf32> to vector<3x224xf32>
    %114 = vector.extract_strided_slice %0 {offsets = [2, 2, 0, 1], sizes = [1, 1, 3, 224], strides = [1, 1, 1, 1]} : vector<4x4x3x256xf32> to vector<1x1x3x224xf32>
    %115 = vector.shape_cast %114 : vector<1x1x3x224xf32> to vector<3x224xf32>
    %116 = vector.extract_strided_slice %0 {offsets = [3, 2, 0, 0], sizes = [1, 1, 3, 224], strides = [1, 1, 1, 1]} : vector<4x4x3x256xf32> to vector<1x1x3x224xf32>
    %117 = vector.shape_cast %116 : vector<1x1x3x224xf32> to vector<3x224xf32>
    %118 = vector.extract_strided_slice %0 {offsets = [3, 3, 0, 0], sizes = [1, 1, 3, 224], strides = [1, 1, 1, 1]} : vector<4x4x3x256xf32> to vector<1x1x3x224xf32>
    %119 = vector.shape_cast %118 : vector<1x1x3x224xf32> to vector<3x224xf32>
    %120 = vector.extract_strided_slice %0 {offsets = [3, 0, 0, 1], sizes = [1, 1, 3, 224], strides = [1, 1, 1, 1]} : vector<4x4x3x256xf32> to vector<1x1x3x224xf32>
    %121 = vector.shape_cast %120 : vector<1x1x3x224xf32> to vector<3x224xf32>
    %122 = vector.extract_strided_slice %0 {offsets = [3, 1, 0, 1], sizes = [1, 1, 3, 224], strides = [1, 1, 1, 1]} : vector<4x4x3x256xf32> to vector<1x1x3x224xf32>
    %123 = vector.shape_cast %122 : vector<1x1x3x224xf32> to vector<3x224xf32>
    %124 = vector.extract_strided_slice %0 {offsets = [3, 2, 0, 1], sizes = [1, 1, 3, 224], strides = [1, 1, 1, 1]} : vector<4x4x3x256xf32> to vector<1x1x3x224xf32>
    %125 = vector.shape_cast %124 : vector<1x1x3x224xf32> to vector<3x224xf32>
    %126 = vector.extract_strided_slice %0 {offsets = [0, 2, 0, 16], sizes = [1, 1, 3, 224], strides = [1, 1, 1, 1]} : vector<4x4x3x256xf32> to vector<1x1x3x224xf32>
    %127 = vector.shape_cast %126 : vector<1x1x3x224xf32> to vector<3x224xf32>
    %128 = vector.extract_strided_slice %0 {offsets = [0, 3, 0, 16], sizes = [1, 1, 3, 224], strides = [1, 1, 1, 1]} : vector<4x4x3x256xf32> to vector<1x1x3x224xf32>
    %129 = vector.shape_cast %128 : vector<1x1x3x224xf32> to vector<3x224xf32>
    %130 = vector.extract_strided_slice %0 {offsets = [0, 0, 0, 17], sizes = [1, 1, 3, 224], strides = [1, 1, 1, 1]} : vector<4x4x3x256xf32> to vector<1x1x3x224xf32>
    %131 = vector.shape_cast %130 : vector<1x1x3x224xf32> to vector<3x224xf32>
    %132 = vector.extract_strided_slice %0 {offsets = [0, 1, 0, 17], sizes = [1, 1, 3, 224], strides = [1, 1, 1, 1]} : vector<4x4x3x256xf32> to vector<1x1x3x224xf32>
    %133 = vector.shape_cast %132 : vector<1x1x3x224xf32> to vector<3x224xf32>
    %134 = vector.extract_strided_slice %0 {offsets = [0, 2, 0, 17], sizes = [1, 1, 3, 224], strides = [1, 1, 1, 1]} : vector<4x4x3x256xf32> to vector<1x1x3x224xf32>
    %135 = vector.shape_cast %134 : vector<1x1x3x224xf32> to vector<3x224xf32>
    %136 = tpu.concatenate %87, %89, %91, %93, %95, %97, %99, %101, %103, %105, %107, %109, %111, %113, %115, %117 in 0 : vector<3x224xf32>, vector<3x224xf32>, vector<3x224xf32>, vector<3x224xf32>, vector<3x224xf32>, vector<3x224xf32>, vector<3x224xf32>, vector<3x224xf32>, vector<3x224xf32>, vector<3x224xf32>, vector<3x224xf32>, vector<3x224xf32>, vector<3x224xf32>, vector<3x224xf32>, vector<3x224xf32>, vector<3x224xf32> -> vector<48x224xf32>
    %137 = tpu.concatenate %119, %121, %123, %125, %127, %129, %131, %133, %135, %3 in 0 : vector<3x224xf32>, vector<3x224xf32>, vector<3x224xf32>, vector<3x224xf32>, vector<3x224xf32>, vector<3x224xf32>, vector<3x224xf32>, vector<3x224xf32>, vector<3x224xf32>, vector<1x224xf32> -> vector<28x224xf32>
    %138 = tpu.concatenate %136, %137 in 0 : vector<48x224xf32>, vector<28x224xf32> -> vector<76x224xf32>
    %cst_19 = arith.constant dense<0.000000e+00> : vector<20x224xf32>
    %139 = tpu.matmul %1, %138, %cst_19 {dimension_numbers = #tpu.dot_dimension_numbers<[1], [0], [0], [1], [0, 0, 1, 1], [], []>} : vector<20x76xf32>, vector<76x224xf32>, vector<20x224xf32> -> vector<20x224xf32>
    %cst_20 = arith.constant 0.000000e+00 : f32
    %140 = vector.broadcast %cst_20 : f32 to vector<20x224xf32>
    %141 = arith.maximumf %139, %140 : vector<20x224xf32>
    %cst_21 = arith.constant 0.000000e+00 : f32
    %142 = vector.broadcast %cst_21 : f32 to vector<20x224xf32>
    %143 = arith.select %22, %141, %142 : vector<20x224xi1>, vector<20x224xf32>
    %c1 = arith.constant 1 : index
    %c0_22 = arith.constant 0 : index
    %c17_23 = arith.constant 17 : index
    %144 = vector.load %arg5[%c1, %c0_22, %c17_23] : memref<4x20x272xf32, #tpu.memory_space<vmem>>, vector<1x20x224xf32>
    %145 = vector.shape_cast %144 : vector<1x20x224xf32> to vector<20x224xf32>
    %146 = vector.shape_cast %143 : vector<20x224xf32> to vector<1x20x224xf32>
    tpu.vector_store %arg5[%c1, %c0_22, %c17_23], %146 {strides = array<i32>} : memref<4x20x272xf32, #tpu.memory_space<vmem>>, vector<1x20x224xf32>,
    %147 = vector.extract_strided_slice %0 {offsets = [2, 0, 0, 0], sizes = [1, 1, 3, 224], strides = [1, 1, 1, 1]} : vector<4x4x3x256xf32> to vector<1x1x3x224xf32>
    %148 = vector.shape_cast %147 : vector<1x1x3x224xf32> to vector<3x224xf32>
    %149 = vector.extract_strided_slice %0 {offsets = [2, 1, 0, 0], sizes = [1, 1, 3, 224], strides = [1, 1, 1, 1]} : vector<4x4x3x256xf32> to vector<1x1x3x224xf32>
    %150 = vector.shape_cast %149 : vector<1x1x3x224xf32> to vector<3x224xf32>
    %151 = vector.extract_strided_slice %0 {offsets = [2, 2, 0, 0], sizes = [1, 1, 3, 224], strides = [1, 1, 1, 1]} : vector<4x4x3x256xf32> to vector<1x1x3x224xf32>
    %152 = vector.shape_cast %151 : vector<1x1x3x224xf32> to vector<3x224xf32>
    %153 = vector.extract_strided_slice %0 {offsets = [2, 3, 0, 0], sizes = [1, 1, 3, 224], strides = [1, 1, 1, 1]} : vector<4x4x3x256xf32> to vector<1x1x3x224xf32>
    %154 = vector.shape_cast %153 : vector<1x1x3x224xf32> to vector<3x224xf32>
    %155 = vector.extract_strided_slice %0 {offsets = [2, 0, 0, 1], sizes = [1, 1, 3, 224], strides = [1, 1, 1, 1]} : vector<4x4x3x256xf32> to vector<1x1x3x224xf32>
    %156 = vector.shape_cast %155 : vector<1x1x3x224xf32> to vector<3x224xf32>
    %157 = vector.extract_strided_slice %0 {offsets = [3, 0, 0, 0], sizes = [1, 1, 3, 224], strides = [1, 1, 1, 1]} : vector<4x4x3x256xf32> to vector<1x1x3x224xf32>
    %158 = vector.shape_cast %157 : vector<1x1x3x224xf32> to vector<3x224xf32>
    %159 = vector.extract_strided_slice %0 {offsets = [3, 1, 0, 0], sizes = [1, 1, 3, 224], strides = [1, 1, 1, 1]} : vector<4x4x3x256xf32> to vector<1x1x3x224xf32>
    %160 = vector.shape_cast %159 : vector<1x1x3x224xf32> to vector<3x224xf32>
    %161 = vector.extract_strided_slice %0 {offsets = [3, 2, 0, 0], sizes = [1, 1, 3, 224], strides = [1, 1, 1, 1]} : vector<4x4x3x256xf32> to vector<1x1x3x224xf32>
    %162 = vector.shape_cast %161 : vector<1x1x3x224xf32> to vector<3x224xf32>
    %163 = vector.extract_strided_slice %0 {offsets = [3, 3, 0, 0], sizes = [1, 1, 3, 224], strides = [1, 1, 1, 1]} : vector<4x4x3x256xf32> to vector<1x1x3x224xf32>
    %164 = vector.shape_cast %163 : vector<1x1x3x224xf32> to vector<3x224xf32>
    %165 = vector.extract_strided_slice %0 {offsets = [3, 0, 0, 1], sizes = [1, 1, 3, 224], strides = [1, 1, 1, 1]} : vector<4x4x3x256xf32> to vector<1x1x3x224xf32>
    %166 = vector.shape_cast %165 : vector<1x1x3x224xf32> to vector<3x224xf32>
    %167 = vector.extract_strided_slice %0 {offsets = [0, 0, 0, 16], sizes = [1, 1, 3, 224], strides = [1, 1, 1, 1]} : vector<4x4x3x256xf32> to vector<1x1x3x224xf32>
    %168 = vector.shape_cast %167 : vector<1x1x3x224xf32> to vector<3x224xf32>
    %169 = vector.extract_strided_slice %0 {offsets = [0, 1, 0, 16], sizes = [1, 1, 3, 224], strides = [1, 1, 1, 1]} : vector<4x4x3x256xf32> to vector<1x1x3x224xf32>
    %170 = vector.shape_cast %169 : vector<1x1x3x224xf32> to vector<3x224xf32>
    %171 = vector.extract_strided_slice %0 {offsets = [0, 2, 0, 16], sizes = [1, 1, 3, 224], strides = [1, 1, 1, 1]} : vector<4x4x3x256xf32> to vector<1x1x3x224xf32>
    %172 = vector.shape_cast %171 : vector<1x1x3x224xf32> to vector<3x224xf32>
    %173 = vector.extract_strided_slice %0 {offsets = [0, 3, 0, 16], sizes = [1, 1, 3, 224], strides = [1, 1, 1, 1]} : vector<4x4x3x256xf32> to vector<1x1x3x224xf32>
    %174 = vector.shape_cast %173 : vector<1x1x3x224xf32> to vector<3x224xf32>
    %175 = vector.extract_strided_slice %0 {offsets = [0, 0, 0, 17], sizes = [1, 1, 3, 224], strides = [1, 1, 1, 1]} : vector<4x4x3x256xf32> to vector<1x1x3x224xf32>
    %176 = vector.shape_cast %175 : vector<1x1x3x224xf32> to vector<3x224xf32>
    %177 = vector.extract_strided_slice %0 {offsets = [1, 0, 0, 16], sizes = [1, 1, 3, 224], strides = [1, 1, 1, 1]} : vector<4x4x3x256xf32> to vector<1x1x3x224xf32>
    %178 = vector.shape_cast %177 : vector<1x1x3x224xf32> to vector<3x224xf32>
    %179 = vector.extract_strided_slice %0 {offsets = [1, 1, 0, 16], sizes = [1, 1, 3, 224], strides = [1, 1, 1, 1]} : vector<4x4x3x256xf32> to vector<1x1x3x224xf32>
    %180 = vector.shape_cast %179 : vector<1x1x3x224xf32> to vector<3x224xf32>
    %181 = vector.extract_strided_slice %0 {offsets = [1, 2, 0, 16], sizes = [1, 1, 3, 224], strides = [1, 1, 1, 1]} : vector<4x4x3x256xf32> to vector<1x1x3x224xf32>
    %182 = vector.shape_cast %181 : vector<1x1x3x224xf32> to vector<3x224xf32>
    %183 = vector.extract_strided_slice %0 {offsets = [1, 3, 0, 16], sizes = [1, 1, 3, 224], strides = [1, 1, 1, 1]} : vector<4x4x3x256xf32> to vector<1x1x3x224xf32>
    %184 = vector.shape_cast %183 : vector<1x1x3x224xf32> to vector<3x224xf32>
    %185 = vector.extract_strided_slice %0 {offsets = [1, 0, 0, 17], sizes = [1, 1, 3, 224], strides = [1, 1, 1, 1]} : vector<4x4x3x256xf32> to vector<1x1x3x224xf32>
    %186 = vector.shape_cast %185 : vector<1x1x3x224xf32> to vector<3x224xf32>
    %187 = vector.extract_strided_slice %0 {offsets = [2, 0, 0, 16], sizes = [1, 1, 3, 224], strides = [1, 1, 1, 1]} : vector<4x4x3x256xf32> to vector<1x1x3x224xf32>
    %188 = vector.shape_cast %187 : vector<1x1x3x224xf32> to vector<3x224xf32>
    %189 = vector.extract_strided_slice %0 {offsets = [2, 1, 0, 16], sizes = [1, 1, 3, 224], strides = [1, 1, 1, 1]} : vector<4x4x3x256xf32> to vector<1x1x3x224xf32>
    %190 = vector.shape_cast %189 : vector<1x1x3x224xf32> to vector<3x224xf32>
    %191 = vector.extract_strided_slice %0 {offsets = [2, 2, 0, 16], sizes = [1, 1, 3, 224], strides = [1, 1, 1, 1]} : vector<4x4x3x256xf32> to vector<1x1x3x224xf32>
    %192 = vector.shape_cast %191 : vector<1x1x3x224xf32> to vector<3x224xf32>
    %193 = vector.extract_strided_slice %0 {offsets = [2, 3, 0, 16], sizes = [1, 1, 3, 224], strides = [1, 1, 1, 1]} : vector<4x4x3x256xf32> to vector<1x1x3x224xf32>
    %194 = vector.shape_cast %193 : vector<1x1x3x224xf32> to vector<3x224xf32>
    %195 = vector.extract_strided_slice %0 {offsets = [2, 0, 0, 17], sizes = [1, 1, 3, 224], strides = [1, 1, 1, 1]} : vector<4x4x3x256xf32> to vector<1x1x3x224xf32>
    %196 = vector.shape_cast %195 : vector<1x1x3x224xf32> to vector<3x224xf32>
    %197 = tpu.concatenate %148, %150, %152, %154, %156, %158, %160, %162, %164, %166, %168, %170, %172, %174, %176, %178 in 0 : vector<3x224xf32>, vector<3x224xf32>, vector<3x224xf32>, vector<3x224xf32>, vector<3x224xf32>, vector<3x224xf32>, vector<3x224xf32>, vector<3x224xf32>, vector<3x224xf32>, vector<3x224xf32>, vector<3x224xf32>, vector<3x224xf32>, vector<3x224xf32>, vector<3x224xf32>, vector<3x224xf32>, vector<3x224xf32> -> vector<48x224xf32>
    %198 = tpu.concatenate %180, %182, %184, %186, %188, %190, %192, %194, %196, %3 in 0 : vector<3x224xf32>, vector<3x224xf32>, vector<3x224xf32>, vector<3x224xf32>, vector<3x224xf32>, vector<3x224xf32>, vector<3x224xf32>, vector<3x224xf32>, vector<3x224xf32>, vector<1x224xf32> -> vector<28x224xf32>
    %199 = tpu.concatenate %197, %198 in 0 : vector<48x224xf32>, vector<28x224xf32> -> vector<76x224xf32>
    %cst_24 = arith.constant dense<0.000000e+00> : vector<20x224xf32>
    %200 = tpu.matmul %1, %199, %cst_24 {dimension_numbers = #tpu.dot_dimension_numbers<[1], [0], [0], [1], [0, 0, 1, 1], [], []>} : vector<20x76xf32>, vector<76x224xf32>, vector<20x224xf32> -> vector<20x224xf32>
    %cst_25 = arith.constant 0.000000e+00 : f32
    %201 = vector.broadcast %cst_25 : f32 to vector<20x224xf32>
    %202 = arith.maximumf %200, %201 : vector<20x224xf32>
    %cst_26 = arith.constant 0.000000e+00 : f32
    %203 = vector.broadcast %cst_26 : f32 to vector<20x224xf32>
    %204 = arith.select %22, %202, %203 : vector<20x224xi1>, vector<20x224xf32>
    %c2 = arith.constant 2 : index
    %c0_27 = arith.constant 0 : index
    %c17_28 = arith.constant 17 : index
    %205 = vector.load %arg5[%c2, %c0_27, %c17_28] : memref<4x20x272xf32, #tpu.memory_space<vmem>>, vector<1x20x224xf32>
    %206 = vector.shape_cast %205 : vector<1x20x224xf32> to vector<20x224xf32>
    %207 = vector.shape_cast %204 : vector<20x224xf32> to vector<1x20x224xf32>
    tpu.vector_store %arg5[%c2, %c0_27, %c17_28], %207 {strides = array<i32>} : memref<4x20x272xf32, #tpu.memory_space<vmem>>, vector<1x20x224xf32>,
    %208 = vector.extract_strided_slice %0 {offsets = [2, 2, 0, 0], sizes = [1, 1, 3, 224], strides = [1, 1, 1, 1]} : vector<4x4x3x256xf32> to vector<1x1x3x224xf32>
    %209 = vector.shape_cast %208 : vector<1x1x3x224xf32> to vector<3x224xf32>
    %210 = vector.extract_strided_slice %0 {offsets = [2, 3, 0, 0], sizes = [1, 1, 3, 224], strides = [1, 1, 1, 1]} : vector<4x4x3x256xf32> to vector<1x1x3x224xf32>
    %211 = vector.shape_cast %210 : vector<1x1x3x224xf32> to vector<3x224xf32>
    %212 = vector.extract_strided_slice %0 {offsets = [2, 0, 0, 1], sizes = [1, 1, 3, 224], strides = [1, 1, 1, 1]} : vector<4x4x3x256xf32> to vector<1x1x3x224xf32>
    %213 = vector.shape_cast %212 : vector<1x1x3x224xf32> to vector<3x224xf32>
    %214 = vector.extract_strided_slice %0 {offsets = [2, 1, 0, 1], sizes = [1, 1, 3, 224], strides = [1, 1, 1, 1]} : vector<4x4x3x256xf32> to vector<1x1x3x224xf32>
    %215 = vector.shape_cast %214 : vector<1x1x3x224xf32> to vector<3x224xf32>
    %216 = vector.extract_strided_slice %0 {offsets = [2, 2, 0, 1], sizes = [1, 1, 3, 224], strides = [1, 1, 1, 1]} : vector<4x4x3x256xf32> to vector<1x1x3x224xf32>
    %217 = vector.shape_cast %216 : vector<1x1x3x224xf32> to vector<3x224xf32>
    %218 = vector.extract_strided_slice %0 {offsets = [3, 2, 0, 0], sizes = [1, 1, 3, 224], strides = [1, 1, 1, 1]} : vector<4x4x3x256xf32> to vector<1x1x3x224xf32>
    %219 = vector.shape_cast %218 : vector<1x1x3x224xf32> to vector<3x224xf32>
    %220 = vector.extract_strided_slice %0 {offsets = [3, 3, 0, 0], sizes = [1, 1, 3, 224], strides = [1, 1, 1, 1]} : vector<4x4x3x256xf32> to vector<1x1x3x224xf32>
    %221 = vector.shape_cast %220 : vector<1x1x3x224xf32> to vector<3x224xf32>
    %222 = vector.extract_strided_slice %0 {offsets = [3, 0, 0, 1], sizes = [1, 1, 3, 224], strides = [1, 1, 1, 1]} : vector<4x4x3x256xf32> to vector<1x1x3x224xf32>
    %223 = vector.shape_cast %222 : vector<1x1x3x224xf32> to vector<3x224xf32>
    %224 = vector.extract_strided_slice %0 {offsets = [3, 1, 0, 1], sizes = [1, 1, 3, 224], strides = [1, 1, 1, 1]} : vector<4x4x3x256xf32> to vector<1x1x3x224xf32>
    %225 = vector.shape_cast %224 : vector<1x1x3x224xf32> to vector<3x224xf32>
    %226 = vector.extract_strided_slice %0 {offsets = [3, 2, 0, 1], sizes = [1, 1, 3, 224], strides = [1, 1, 1, 1]} : vector<4x4x3x256xf32> to vector<1x1x3x224xf32>
    %227 = vector.shape_cast %226 : vector<1x1x3x224xf32> to vector<3x224xf32>
    %228 = vector.extract_strided_slice %0 {offsets = [0, 2, 0, 16], sizes = [1, 1, 3, 224], strides = [1, 1, 1, 1]} : vector<4x4x3x256xf32> to vector<1x1x3x224xf32>
    %229 = vector.shape_cast %228 : vector<1x1x3x224xf32> to vector<3x224xf32>
    %230 = vector.extract_strided_slice %0 {offsets = [0, 3, 0, 16], sizes = [1, 1, 3, 224], strides = [1, 1, 1, 1]} : vector<4x4x3x256xf32> to vector<1x1x3x224xf32>
    %231 = vector.shape_cast %230 : vector<1x1x3x224xf32> to vector<3x224xf32>
    %232 = vector.extract_strided_slice %0 {offsets = [0, 0, 0, 17], sizes = [1, 1, 3, 224], strides = [1, 1, 1, 1]} : vector<4x4x3x256xf32> to vector<1x1x3x224xf32>
    %233 = vector.shape_cast %232 : vector<1x1x3x224xf32> to vector<3x224xf32>
    %234 = vector.extract_strided_slice %0 {offsets = [0, 1, 0, 17], sizes = [1, 1, 3, 224], strides = [1, 1, 1, 1]} : vector<4x4x3x256xf32> to vector<1x1x3x224xf32>
    %235 = vector.shape_cast %234 : vector<1x1x3x224xf32> to vector<3x224xf32>
    %236 = vector.extract_strided_slice %0 {offsets = [0, 2, 0, 17], sizes = [1, 1, 3, 224], strides = [1, 1, 1, 1]} : vector<4x4x3x256xf32> to vector<1x1x3x224xf32>
    %237 = vector.shape_cast %236 : vector<1x1x3x224xf32> to vector<3x224xf32>
    %238 = vector.extract_strided_slice %0 {offsets = [1, 2, 0, 16], sizes = [1, 1, 3, 224], strides = [1, 1, 1, 1]} : vector<4x4x3x256xf32> to vector<1x1x3x224xf32>
    %239 = vector.shape_cast %238 : vector<1x1x3x224xf32> to vector<3x224xf32>
    %240 = vector.extract_strided_slice %0 {offsets = [1, 3, 0, 16], sizes = [1, 1, 3, 224], strides = [1, 1, 1, 1]} : vector<4x4x3x256xf32> to vector<1x1x3x224xf32>
    %241 = vector.shape_cast %240 : vector<1x1x3x224xf32> to vector<3x224xf32>
    %242 = vector.extract_strided_slice %0 {offsets = [1, 0, 0, 17], sizes = [1, 1, 3, 224], strides = [1, 1, 1, 1]} : vector<4x4x3x256xf32> to vector<1x1x3x224xf32>
    %243 = vector.shape_cast %242 : vector<1x1x3x224xf32> to vector<3x224xf32>
    %244 = vector.extract_strided_slice %0 {offsets = [1, 1, 0, 17], sizes = [1, 1, 3, 224], strides = [1, 1, 1, 1]} : vector<4x4x3x256xf32> to vector<1x1x3x224xf32>
    %245 = vector.shape_cast %244 : vector<1x1x3x224xf32> to vector<3x224xf32>
    %246 = vector.extract_strided_slice %0 {offsets = [1, 2, 0, 17], sizes = [1, 1, 3, 224], strides = [1, 1, 1, 1]} : vector<4x4x3x256xf32> to vector<1x1x3x224xf32>
    %247 = vector.shape_cast %246 : vector<1x1x3x224xf32> to vector<3x224xf32>
    %248 = vector.extract_strided_slice %0 {offsets = [2, 2, 0, 16], sizes = [1, 1, 3, 224], strides = [1, 1, 1, 1]} : vector<4x4x3x256xf32> to vector<1x1x3x224xf32>
    %249 = vector.shape_cast %248 : vector<1x1x3x224xf32> to vector<3x224xf32>
    %250 = vector.extract_strided_slice %0 {offsets = [2, 3, 0, 16], sizes = [1, 1, 3, 224], strides = [1, 1, 1, 1]} : vector<4x4x3x256xf32> to vector<1x1x3x224xf32>
    %251 = vector.shape_cast %250 : vector<1x1x3x224xf32> to vector<3x224xf32>
    %252 = vector.extract_strided_slice %0 {offsets = [2, 0, 0, 17], sizes = [1, 1, 3, 224], strides = [1, 1, 1, 1]} : vector<4x4x3x256xf32> to vector<1x1x3x224xf32>
    %253 = vector.shape_cast %252 : vector<1x1x3x224xf32> to vector<3x224xf32>
    %254 = vector.extract_strided_slice %0 {offsets = [2, 1, 0, 17], sizes = [1, 1, 3, 224], strides = [1, 1, 1, 1]} : vector<4x4x3x256xf32> to vector<1x1x3x224xf32>
    %255 = vector.shape_cast %254 : vector<1x1x3x224xf32> to vector<3x224xf32>
    %256 = vector.extract_strided_slice %0 {offsets = [2, 2, 0, 17], sizes = [1, 1, 3, 224], strides = [1, 1, 1, 1]} : vector<4x4x3x256xf32> to vector<1x1x3x224xf32>
    %257 = vector.shape_cast %256 : vector<1x1x3x224xf32> to vector<3x224xf32>
    %258 = tpu.concatenate %209, %211, %213, %215, %217, %219, %221, %223, %225, %227, %229, %231, %233, %235, %237, %239 in 0 : vector<3x224xf32>, vector<3x224xf32>, vector<3x224xf32>, vector<3x224xf32>, vector<3x224xf32>, vector<3x224xf32>, vector<3x224xf32>, vector<3x224xf32>, vector<3x224xf32>, vector<3x224xf32>, vector<3x224xf32>, vector<3x224xf32>, vector<3x224xf32>, vector<3x224xf32>, vector<3x224xf32>, vector<3x224xf32> -> vector<48x224xf32>
    %259 = tpu.concatenate %241, %243, %245, %247, %249, %251, %253, %255, %257, %3 in 0 : vector<3x224xf32>, vector<3x224xf32>, vector<3x224xf32>, vector<3x224xf32>, vector<3x224xf32>, vector<3x224xf32>, vector<3x224xf32>, vector<3x224xf32>, vector<3x224xf32>, vector<1x224xf32> -> vector<28x224xf32>
    %260 = tpu.concatenate %258, %259 in 0 : vector<48x224xf32>, vector<28x224xf32> -> vector<76x224xf32>
    %cst_29 = arith.constant dense<0.000000e+00> : vector<20x224xf32>
    %261 = tpu.matmul %1, %260, %cst_29 {dimension_numbers = #tpu.dot_dimension_numbers<[1], [0], [0], [1], [0, 0, 1, 1], [], []>} : vector<20x76xf32>, vector<76x224xf32>, vector<20x224xf32> -> vector<20x224xf32>
    %cst_30 = arith.constant 0.000000e+00 : f32
    %262 = vector.broadcast %cst_30 : f32 to vector<20x224xf32>
    %263 = arith.maximumf %261, %262 : vector<20x224xf32>
    %cst_31 = arith.constant 0.000000e+00 : f32
    %264 = vector.broadcast %cst_31 : f32 to vector<20x224xf32>
    %265 = arith.select %22, %263, %264 : vector<20x224xi1>, vector<20x224xf32>
    %c3 = arith.constant 3 : index
    %c0_32 = arith.constant 0 : index
    %c17_33 = arith.constant 17 : index
    %266 = vector.load %arg5[%c3, %c0_32, %c17_33] : memref<4x20x272xf32, #tpu.memory_space<vmem>>, vector<1x20x224xf32>
    %267 = vector.shape_cast %266 : vector<1x20x224xf32> to vector<20x224xf32>
    %268 = vector.shape_cast %265 : vector<20x224xf32> to vector<1x20x224xf32>
    tpu.vector_store %arg5[%c3, %c0_32, %c17_33], %268 {strides = array<i32>} : memref<4x20x272xf32, #tpu.memory_space<vmem>>, vector<1x20x224xf32>,
    %c0_34 = arith.constant 0 : index
    %c0_35 = arith.constant 0 : index
    %c0_36 = arith.constant 0 : index
    %269 = vector.load %arg5[%c0_34, %c0_35, %c0_36] : memref<4x20x272xf32, #tpu.memory_space<vmem>>, vector<4x20x272xf32>
    %270 = vector.extract_strided_slice %269 {offsets = [0, 0, 0], sizes = [1, 20, 224], strides = [1, 1, 1]} : vector<4x20x272xf32> to vector<1x20x224xf32>
    %271 = vector.shape_cast %270 : vector<1x20x224xf32> to vector<20x224xf32>
    %272 = vector.extract_strided_slice %269 {offsets = [1, 0, 0], sizes = [1, 20, 224], strides = [1, 1, 1]} : vector<4x20x272xf32> to vector<1x20x224xf32>
    %273 = vector.shape_cast %272 : vector<1x20x224xf32> to vector<20x224xf32>
    %274 = vector.extract_strided_slice %269 {offsets = [0, 0, 1], sizes = [1, 20, 224], strides = [1, 1, 1]} : vector<4x20x272xf32> to vector<1x20x224xf32>
    %275 = vector.shape_cast %274 : vector<1x20x224xf32> to vector<20x224xf32>
    %276 = vector.extract_strided_slice %269 {offsets = [1, 0, 1], sizes = [1, 20, 224], strides = [1, 1, 1]} : vector<4x20x272xf32> to vector<1x20x224xf32>
    %277 = vector.shape_cast %276 : vector<1x20x224xf32> to vector<20x224xf32>
    %278 = vector.extract_strided_slice %269 {offsets = [0, 0, 2], sizes = [1, 20, 224], strides = [1, 1, 1]} : vector<4x20x272xf32> to vector<1x20x224xf32>
    %279 = vector.shape_cast %278 : vector<1x20x224xf32> to vector<20x224xf32>
    %280 = vector.extract_strided_slice %269 {offsets = [2, 0, 0], sizes = [1, 20, 224], strides = [1, 1, 1]} : vector<4x20x272xf32> to vector<1x20x224xf32>
    %281 = vector.shape_cast %280 : vector<1x20x224xf32> to vector<20x224xf32>
    %282 = vector.extract_strided_slice %269 {offsets = [3, 0, 0], sizes = [1, 20, 224], strides = [1, 1, 1]} : vector<4x20x272xf32> to vector<1x20x224xf32>
    %283 = vector.shape_cast %282 : vector<1x20x224xf32> to vector<20x224xf32>
    %284 = vector.extract_strided_slice %269 {offsets = [2, 0, 1], sizes = [1, 20, 224], strides = [1, 1, 1]} : vector<4x20x272xf32> to vector<1x20x224xf32>
    %285 = vector.shape_cast %284 : vector<1x20x224xf32> to vector<20x224xf32>
    %286 = vector.extract_strided_slice %269 {offsets = [3, 0, 1], sizes = [1, 20, 224], strides = [1, 1, 1]} : vector<4x20x272xf32> to vector<1x20x224xf32>
    %287 = vector.shape_cast %286 : vector<1x20x224xf32> to vector<20x224xf32>
    %288 = vector.extract_strided_slice %269 {offsets = [2, 0, 2], sizes = [1, 20, 224], strides = [1, 1, 1]} : vector<4x20x272xf32> to vector<1x20x224xf32>
    %289 = vector.shape_cast %288 : vector<1x20x224xf32> to vector<20x224xf32>
    %290 = vector.extract_strided_slice %269 {offsets = [0, 0, 16], sizes = [1, 20, 224], strides = [1, 1, 1]} : vector<4x20x272xf32> to vector<1x20x224xf32>
    %291 = vector.shape_cast %290 : vector<1x20x224xf32> to vector<20x224xf32>
    %292 = vector.extract_strided_slice %269 {offsets = [1, 0, 16], sizes = [1, 20, 224], strides = [1, 1, 1]} : vector<4x20x272xf32> to vector<1x20x224xf32>
    %293 = vector.shape_cast %292 : vector<1x20x224xf32> to vector<20x224xf32>
    %294 = vector.extract_strided_slice %269 {offsets = [0, 0, 17], sizes = [1, 20, 224], strides = [1, 1, 1]} : vector<4x20x272xf32> to vector<1x20x224xf32>
    %295 = vector.shape_cast %294 : vector<1x20x224xf32> to vector<20x224xf32>
    %296 = vector.extract_strided_slice %269 {offsets = [1, 0, 17], sizes = [1, 20, 224], strides = [1, 1, 1]} : vector<4x20x272xf32> to vector<1x20x224xf32>
    %297 = vector.shape_cast %296 : vector<1x20x224xf32> to vector<20x224xf32>
    %298 = vector.extract_strided_slice %269 {offsets = [0, 0, 18], sizes = [1, 20, 224], strides = [1, 1, 1]} : vector<4x20x272xf32> to vector<1x20x224xf32>
    %299 = vector.shape_cast %298 : vector<1x20x224xf32> to vector<20x224xf32>
    %300 = vector.extract_strided_slice %269 {offsets = [2, 0, 16], sizes = [1, 20, 224], strides = [1, 1, 1]} : vector<4x20x272xf32> to vector<1x20x224xf32>
    %301 = vector.shape_cast %300 : vector<1x20x224xf32> to vector<20x224xf32>
    %302 = vector.extract_strided_slice %269 {offsets = [3, 0, 16], sizes = [1, 20, 224], strides = [1, 1, 1]} : vector<4x20x272xf32> to vector<1x20x224xf32>
    %303 = vector.shape_cast %302 : vector<1x20x224xf32> to vector<20x224xf32>
    %304 = vector.extract_strided_slice %269 {offsets = [2, 0, 17], sizes = [1, 20, 224], strides = [1, 1, 1]} : vector<4x20x272xf32> to vector<1x20x224xf32>
    %305 = vector.shape_cast %304 : vector<1x20x224xf32> to vector<20x224xf32>
    %306 = vector.extract_strided_slice %269 {offsets = [3, 0, 17], sizes = [1, 20, 224], strides = [1, 1, 1]} : vector<4x20x272xf32> to vector<1x20x224xf32>
    %307 = vector.shape_cast %306 : vector<1x20x224xf32> to vector<20x224xf32>
    %308 = vector.extract_strided_slice %269 {offsets = [2, 0, 18], sizes = [1, 20, 224], strides = [1, 1, 1]} : vector<4x20x272xf32> to vector<1x20x224xf32>
    %309 = vector.shape_cast %308 : vector<1x20x224xf32> to vector<20x224xf32>
    %310 = vector.extract_strided_slice %269 {offsets = [0, 0, 32], sizes = [1, 20, 224], strides = [1, 1, 1]} : vector<4x20x272xf32> to vector<1x20x224xf32>
    %311 = vector.shape_cast %310 : vector<1x20x224xf32> to vector<20x224xf32>
    %312 = vector.extract_strided_slice %269 {offsets = [1, 0, 32], sizes = [1, 20, 224], strides = [1, 1, 1]} : vector<4x20x272xf32> to vector<1x20x224xf32>
    %313 = vector.shape_cast %312 : vector<1x20x224xf32> to vector<20x224xf32>
    %314 = vector.extract_strided_slice %269 {offsets = [0, 0, 33], sizes = [1, 20, 224], strides = [1, 1, 1]} : vector<4x20x272xf32> to vector<1x20x224xf32>
    %315 = vector.shape_cast %314 : vector<1x20x224xf32> to vector<20x224xf32>
    %316 = vector.extract_strided_slice %269 {offsets = [1, 0, 33], sizes = [1, 20, 224], strides = [1, 1, 1]} : vector<4x20x272xf32> to vector<1x20x224xf32>
    %317 = vector.shape_cast %316 : vector<1x20x224xf32> to vector<20x224xf32>
    %318 = vector.extract_strided_slice %269 {offsets = [0, 0, 34], sizes = [1, 20, 224], strides = [1, 1, 1]} : vector<4x20x272xf32> to vector<1x20x224xf32>
    %319 = vector.shape_cast %318 : vector<1x20x224xf32> to vector<20x224xf32>
    %320 = tpu.concatenate %271, %273, %275, %277, %279, %281, %283, %285, %287, %289, %291, %293, %295, %297, %299, %301 in 0 : vector<20x224xf32>, vector<20x224xf32>, vector<20x224xf32>, vector<20x224xf32>, vector<20x224xf32>, vector<20x224xf32>, vector<20x224xf32>, vector<20x224xf32>, vector<20x224xf32>, vector<20x224xf32>, vector<20x224xf32>, vector<20x224xf32>, vector<20x224xf32>, vector<20x224xf32>, vector<20x224xf32>, vector<20x224xf32> -> vector<320x224xf32>
    %321 = tpu.concatenate %303, %305, %307, %309, %311, %313, %315, %317, %319, %3 in 0 : vector<20x224xf32>, vector<20x224xf32>, vector<20x224xf32>, vector<20x224xf32>, vector<20x224xf32>, vector<20x224xf32>, vector<20x224xf32>, vector<20x224xf32>, vector<20x224xf32>, vector<1x224xf32> -> vector<181x224xf32>
    %322 = tpu.concatenate %320, %321 in 0 : vector<320x224xf32>, vector<181x224xf32> -> vector<501x224xf32>
    %cst_37 = arith.constant dense<0.000000e+00> : vector<32x224xf32>
    %323 = tpu.matmul %2, %322, %cst_37 {dimension_numbers = #tpu.dot_dimension_numbers<[1], [0], [0], [1], [0, 0, 1, 1], [], []>} : vector<32x501xf32>, vector<501x224xf32>, vector<32x224xf32> -> vector<32x224xf32>
    %cst_38 = arith.constant 0.000000e+00 : f32
    %324 = vector.broadcast %cst_38 : f32 to vector<32x224xf32>
    %325 = arith.maximumf %323, %324 : vector<32x224xf32>
    %c0_39 = arith.constant 0 : index
    %c0_40 = arith.constant 0 : index
    %326 = vector.load %arg4[%c0_39, %c0_40] : memref<32x224xf32, #tpu.memory_space<vmem>>, vector<32x224xf32>
    tpu.vector_store %arg4[%c0_39, %c0_40], %325 {strides = array<i32>} : memref<32x224xf32, #tpu.memory_space<vmem>>, vector<32x224xf32>,
    return
  }
  func.func @transform_0(%arg0: i32) -> (i32, i32, i32, i32) {
    %c0_i32 = arith.constant 0 : i32
    %c0_i32_0 = arith.constant 0 : i32
    %c0_i32_1 = arith.constant 0 : i32
    %c0_i32_2 = arith.constant 0 : i32
    %c0_i32_3 = arith.constant 0 : i32
    return %c0_i32, %c0_i32_0, %c0_i32_1, %c0_i32_2 : i32, i32, i32, i32
  }
  func.func @transform_1(%arg0: i32) -> (i32, i32) {
    %c0_i32 = arith.constant 0 : i32
    %c0_i32_0 = arith.constant 0 : i32
    %c0_i32_1 = arith.constant 0 : i32
    return %c0_i32, %c0_i32_0 : i32, i32
  }
  func.func @transform_2(%arg0: i32) -> (i32, i32) {
    %c0_i32 = arith.constant 0 : i32
    %c0_i32_0 = arith.constant 0 : i32
    %c0_i32_1 = arith.constant 0 : i32
    return %c0_i32, %c0_i32_0 : i32, i32
  }
  func.func @transform_3(%arg0: i32) -> (i32, i32) {
    %c0_i32 = arith.constant 0 : i32
    %c0_i32_0 = arith.constant 0 : i32
    %c0_i32_1 = arith.constant 0 : i32
    return %c0_i32, %c0_i32_0 : i32, i32
  }
}

</mosaic_0001>

<bundles_post_ra>
// kernel: model_forward.1
= control target key start
LH: loop header
LB: loop body
LE: loop exit
PB: predicated region body
PF: predicated region fallthrough
CT: control target
= control target key end

     0   :  { %s3062_s22 = smov 127   ;;  %vm212_vm0 = vcmask 1042432   ;;  %vm215_vm1 = vcmask 1045504   ;;  %vm218_vm2 = vcmask 1040384   ;;  %s3063_s14 = smov 112   ;;  %vm227_vm3 = vcmask 1041408   ;;  %s4813_s0 = inlined_call_operand.vmem [shape: f32[4,4,3,256], index: 0, kind: input, shape index: {}]   ;;  %s4814_s1 = inlined_call_operand.vmem [shape: f32[20,76], index: 1, kind: input, shape index: {}]   ;;  %s4815_s2 = inlined_call_operand.vmem [shape: f32[32,501], index: 2, kind: input, shape index: {}]   ;;  %s4816_s3 = inlined_call_operand.vmem [shape: f32[32,224], index: 3, kind: output, shape index: {}]  }
   0x1   :  { %v3093_v0 = vld [vmem:[%s4813_s0 + $0x40] sm:$0x77]  ;;  %v3098_v1 = vld [vmem:[%s4813_s0 + $0x28] sm:$0x77]  ;;  %v3121_v7 = vld [vmem:[%s4813_s0 + $0x30] sm:$0x77] }
   0x2   :  { %v3103_v2 = vld [vmem:[%s4813_s0 + $0x20] sm:$0x77]  ;;  %v3107_v3 = vcombine.high %v3093_v0, %v3093_v0  ;;  %v3111_v4 = vcombine.high %v3098_v1, %v3098_v1  ;;  %v1220_v5 = vrot.slane %v3098_v1, 2  ;;  %v3126_v9 = vcombine.high %v3121_v7, %v3121_v7  ;;  %v3137_v15 = vld [vmem:[%s4813_s0 + $0x48] sm:$0x77]  ;;  %s3065_s19 = smov 111  }
   0x3   :  { %4843 = vst [vmem:[#allocation3_spill] sm:$0xff] %v3103_v2  ;;  %v3116_v6 = vcombine.high %v3103_v2, %v3103_v2  ;;  %v891_v8 = vrot.slane %v3103_v2, 7  ;;  %v1229_v13 = vrot.slane %v3121_v7, 7  ;;  %v167_v18 = vrot.slane %v3103_v2, 5  ;;  %v3152_v24 = vld [vmem:[%s4813_s0 + $0x50] sm:$0x77] }
   0x4   :  { %v2470_v10 = vpack.i.bf16 %v3107_v3, %v3093_v0  ;;  %v1221_v11 = vrot.slane %v3111_v4, 2  ;;  %v1230_v14 = vrot.slane %v3126_v9, 7  ;;  %v197_v21 = vrot.slane %v3093_v0, 6  ;;  %v3157_v25 = vld [vmem:[%s4813_s0] sm:$0x77]  ;;  %s3068_s28 = smov 126  }
   0x5   :  { %4844 = vst [vmem:[#allocation4_spill] sm:$0xff] %v3116_v6  ;;  %v892_v12 = vrot.slane %v3116_v6, 7  ;;  %v168_v19 = vrot.slane %v3116_v6, 5  ;;  %v198_v22 = vrot.slane %v3107_v3, 6  ;;  %v3147_v23 = vcombine.high %v3137_v15, %v3137_v15  ;;  %v3164_v28 = vld [vmem:[%s4813_s0 + $0x8] sm:$0x77] }
   0x6   :  { %2471 = vrot.lane.b32.xlu0 %v2470_v10, %s3062_s22  ;;  %v2480_v16 = vpack.i.bf16 %v1221_v11, %v1220_v5  ;;  %v2485_v20 = vpack.i.bf16 %v1230_v14, %v1229_v13  ;;  %v1238_v27 = vrot.slane %v3137_v15, 3  ;;  %v3169_v30 = vcombine.high %v3152_v24, %v3152_v24  ;;  %v3193_v39 = vld [vmem:[%s4813_s0 + $0x10] sm:$0x77]  ;;  %v3198_v40 = vld [vmem:[%s4813_s0 + $0x60] sm:$0x77]  ;;  %s3069_s29 = smov 110  }
   0x7   :  { %v2475_v17 = vpack.i.bf16 %v892_v12, %v891_v8  ;;  %v2490_v26 = vpack.i.bf16 %v168_v19, %v167_v18  ;;  %v2495_v29 = vpack.i.bf16 %v198_v22, %v197_v21  ;;  %v1239_v31 = vrot.slane %v3147_v23, 3  ;;  %v3236_v54 = vld [vmem:[%s4813_s0 + $0x68] sm:$0x77]  ;;  %v3244_v59 = vld [vmem:[%s4813_s0 + $0x38] sm:$0x77] }
   0x8   :  { %2481 = vrot.lane.b32.xlu1 %v2480_v16, %s3062_s22  ;;  %v3174_v32 = vcombine.high %v3157_v25, %v3157_v25  ;;  %v2500_v33 = vpack.i.bf16 %v1238_v27, %v3152_v24  ;;  %v3180_v34 = vcombine.low %v3157_v25, %v3157_v25  ;;  %v3184_v35 = vcombine.high %v3164_v28, %v3164_v28  ;;  %v3259_v5 = vld [vmem:[%s4813_s0 + $0x18] sm:$0x77] }
   0x9   :  { %v2505_v36 = vpack.i.bf16 %v3169_v30, %v1239_v31  ;;  %v484_v37 = vrot.slane %v3157_v25, 2  ;;  %v493_v42 = vrot.slane %v3164_v28, 7  ;;  %v502_v45 = vcombine.low %v3193_v39, %v3193_v39 }
   0xa   :  { %2476 = vrot.lane.b32.xlu0 %v2475_v17, %s3062_s22  ;;  %v485_v38 = vrot.slane %v3174_v32, 2  ;;  %v3203_v41 = vpack.i.bf16 %v3157_v25, %v3180_v34  ;;  %v494_v43 = vrot.slane %v3184_v35, 7  ;;  %v3214_v46 = vcombine.high %v3198_v40, %v3198_v40 }
   0xb   :  { %v534_v48 = vrot.slane %v3121_v7, 5  ;;  %v535_v49 = vrot.slane %v3126_v9, 5  ;;  %v3225_v50 = vpack.i.bf16 %v3193_v39, %v502_v45  ;;  %v262_v51 = vrot.slane %v3198_v40, 7  ;;  %v3319_v45 = vld [vmem:[%s4813_s0 + $0x58] sm:$0x77] }
   0xc   :  { %2486 = vrot.lane.b32.xlu1 %v2485_v20, %s3062_s22  ;;  %v3208_v44 = vpack.i.bf16 %v485_v38, %v484_v37  ;;  %v3218_v47 = vpack.i.bf16 %v494_v43, %v493_v42  ;;  %v263_v52 = vrot.slane %v3214_v46, 7  ;;  %v2530_v53 = vpack.i.bf16 %v3111_v4, %v3098_v1 }
   0xd   :  { %v2535_v55 = vpack.i.bf16 %v535_v49, %v534_v48  ;;  %v518_v56 = vrot.slane %v3103_v2, 3  ;;  %v519_v57 = vrot.slane %v3116_v6, 3  ;;  %v4821_v58 = vrot.slane %v3164_v28, 1 }
   0xe   :  { %2491 = vrot.lane.b32.xlu0 %v2490_v26, %s3062_s22  ;;  %v2540_v60 = vpack.i.bf16 %v263_v52, %v262_v51  ;;  %v4822_v61 = vrot.slane %v3184_v35, 1  ;;  %v3251_v62 = vcombine.low %v3093_v0, %v3093_v0  ;;  %v3254_v63 = vrot.slane %v3137_v15, 1  ;;  %v3369_v51 = vld [vmem:[%s4813_s0 + $0x70] sm:$0x77] }
   0xf   :  { %v3262_v8 = vrot.slane %v3147_v23, 1  ;;  %v4820_v10 = vrot.slane %v3152_v24, 6  ;;  %v4819_v11 = vrot.slane %v3169_v30, 6  ;;  %v620_v12 = vrot.slane %v3236_v54, 2 }
  0x10   :  { %2496 = vrot.lane.b32.xlu1 %v2495_v29, %s3062_s22  ;;  %v3270_v13 = vcombine.high %v3193_v39, %v3193_v39  ;;  %v3274_v14 = vcombine.high %v3244_v59, %v3244_v59  ;;  %v4817_v16 = vrot.slane %v3244_v59, 2  ;;  %v914_v17 = vsel %vm212_vm0, %v3098_v1, %v534_v48 }
  0x11   :  { %v3279_v18 = vpack.i.bf16 %v519_v57, %v518_v56  ;;  %v3283_v19 = vcombine.high %v3259_v5, %v3259_v5  ;;  %v915_v20 = vsel %vm212_vm0, %v3111_v4, %v535_v49  ;;  %v2555_v21 = vpack.i.bf16 %v4822_v61, %v4821_v58 }
  0x12   :  { %2501 = vrot.lane.b32.xlu0 %v2500_v33, %s3062_s22  ;;  %v4818_v22 = vrot.slane %v3274_v14, 2  ;;  %v3296_v26 = vsel %vm215_vm1, %v914_v17, %v4817_v16  ;;  %v160_v27 = vrot.slane %v3121_v7, 3  ;;  %v2560_v29 = vpack.i.bf16 %v3254_v63, %v3251_v62 }
  0x13   :  { %v2565_v31 = vpack.i.bf16 %v4820_v10, %v3262_v8  ;;  %v2570_v37 = vpack.i.bf16 %v620_v12, %v4819_v11  ;;  %v297_v42 = vrot.slane %v3259_v5, 3  ;;  %v298_v48 = vrot.slane %v3283_v19, 3  ;;  %v3357_v11 = vld [vmem:[%s4813_s0 + $0x78] sm:$0x77] }
  0x14   :  { %2506 = vrot.lane.b32.xlu1 %v2505_v36, %s3062_s22  ;;  %v161_v36 = vrot.slane %v3126_v9, 3  ;;  %v3314_v43 = vsel %vm215_vm1, %v915_v20, %v4818_v22  ;;  %v3324_v49 = vcombine.high %v3236_v54, %v3236_v54  ;;  %v4823_v57 = vrot.slane %v3147_v23, 7 }
  0x15   :  { %v3346_v12 = vcombine.high %v3319_v45, %v3319_v45  ;;  %v122_v17 = vrot.slane %v3184_v35, 5  ;;  %v4824_v20 = vrot.slane %v3116_v6, 1  ;;  %vm230_vm4 = vcmask 1044480  }
  0x16   :  { %2511 = vrot.lane.b32.xlu0 %v3203_v41, %s3062_s22  ;;  %v3328_v52 = vpack.i.bf16 %v161_v36, %v160_v27  ;;  %v121_v16 = vrot.slane %v3164_v28, 5  ;;  %v4826_v22 = vrot.slane %v3103_v2, 1  ;;  %vm221_vm5 = vcmask 1043456  }
  0x17   :  { %v3361_v10 = vsel %vm212_vm0, %v3174_v32, %v122_v17  ;;  %v155_v58 = vrot.slane %v3111_v4, 6  ;;  %vm224_vm6 = vcmask 1046528   ;;  %v3372_v61 = vrot.slane %v3319_v45, 1 }
  0x18   :  { %2516 = vrot.lane.b32.xlu1 %v3208_v44, %s3062_s22  ;;  %v3376_v38 = vsel %vm212_vm0, %v3157_v25, %v121_v16  ;;  %v3383_v4 = vrot.slane %v3346_v12, 1  ;;  %v3390_v17 = vcombine.high %v3357_v11, %v3357_v11  ;;  %v3410_v2 = vcombine.high %v3369_v51, %v3369_v51 }
  0x19   :  { %vm142_vm7 = vcmask 1039360   ;;  %vm275_vm8 = vcmask 916480   ;;  %vm310_vm9 = vcmask 908288   ;;  %vm3066_vm10 = vmmov 1  }
  0x1a   :  { %2521 = vrot.lane.b32.xlu0 %v3218_v47, %s3062_s22  ;;  %vm3850_vm11 = vmpackc.low %vm221_vm5, %vm3066_vm10  ;;  %vm330_vm12 = vcmask 621568   ;;  %vm80_vm15 = vcmask 130048   ;;  %vm477_vm10 = vcmask 920576  }
  0x1c   :  { %2526 = vrot.lane.b32.xlu1 %v3225_v50, %s3062_s22 }
  0x1e   :  { %2531 = vrot.lane.b32.xlu0 %v2530_v53, %s3062_s22  ;;  %v3333_v53 = vrot.slane %v3093_v0, 2 }
  0x20   :  { %2536 = vrot.lane.b32.xlu1 %v2535_v55, %s3062_s22  ;;  %v3336_v55 = vrot.slane %v3107_v3, 2 }
  0x22   :  { %2541 = vrot.lane.b32.xlu0 %v2540_v60, %s3062_s22  ;;  %v3342_v60 = vcombine.low %v3152_v24, %v3152_v24 }
  0x24   :  { %2546 = vrot.lane.b32.xlu1 %v3279_v18, %s3062_s22 }
  0x26   :  { %2551 = vrot.lane.b32.xlu0 %v3203_v41, %s3063_s14  ;;  %v154_v41 = vrot.slane %v3098_v1, 6  ;;  %v238_v1 = vsel %vm218_vm2, %v3336_v55, %v4823_v57 }
  0x27   :  { %v240_v56 = vsel %vm221_vm5, %v238_v1, %v3152_v24  ;;  %v4850_v1 = vrot.slane %v3270_v13, 6 }
  0x28   :  { %2556 = vrot.lane.b32.xlu1 %v2555_v21, %s3063_s14  ;;  %v229_v21 = vsel %vm227_vm3, %v4824_v20, %v155_v58  ;;  %v228_v16 = vsel %vm227_vm3, %v4826_v22, %v154_v41  ;;  %v4847_v58 = vrot.slane %v3137_v15, 7  ;;  %v4849_v41 = vrot.slane %v3193_v39, 6 }
  0x29   :  { %v3397_v33 = vsel %vm230_vm4, %v229_v21, %v161_v36  ;;  %v3400_v57 = vsel %vm230_vm4, %v228_v16, %v160_v27  ;;  %v481_v36 = vrot.slane %v3283_v19, 5  ;;  %v629_v16 = vrot.slane %v3369_v51, 7 }
  0x2a   :  { %2561 = vrot.lane.b32.xlu0 %v2560_v29, %s3062_s22  ;;  %4845 = vst [vmem:[#allocation5_spill] sm:$0xff] %v3397_v33  ;;  %4846 = vst [vmem:[#allocation6_spill] sm:$0xff] %v3400_v57  ;;  %v237_v20 = vsel %vm218_vm2, %v3333_v53, %v4847_v58  ;;  %v3414_v29 = vsel %vm224_vm6, %v240_v56, %v3383_v4  ;;  %v2575_v21 = vpack.i.bf16 %v4850_v1, %v4849_v41 }
  0x2b   :  { %4848 = vst [vmem:[#allocation7_spill] sm:$0xff] %v3414_v29  ;;  %v239_v27 = vsel %vm221_vm5, %v237_v20, %v3342_v60  ;;  %v480_v56 = vrot.slane %v3259_v5, 5  ;;  %v2580_v22 = vpack.i.bf16 %v298_v48, %v297_v42  ;;  %v3433_v29 = vsel %vm212_vm0, %v3270_v13, %v481_v36 }
  0x2c   :  { %2566 = vrot.lane.b32.xlu1 %v2565_v31, %s3062_s22  ;;  %v3427_v58 = vsel %vm224_vm6, %v239_v27, %v3372_v61  ;;  %4852 = vst [vmem:[#allocation9_spill] sm:$0xff] %v3433_v29  ;;  %v3436_v31 = vrot.slane %v3169_v30, 2  ;;  %v621_v41 = vrot.slane %v3324_v49, 2  ;;  %v549_v42 = vrot.slane %v3346_v12, 7 }
  0x2d   :  { %4851 = vst [vmem:[#allocation8_spill] sm:$0xff] %v3427_v58  ;;  %v3443_v27 = vsel %vm212_vm0, %v3193_v39, %v480_v56  ;;  %v2585_v48 = vpack.i.bf16 %v3174_v32, %v3157_v25  ;;  %v611_v36 = vrot.slane %v3198_v40, 5  ;;  %v4854_v29 = vrot.slane %v3410_v2, 5 }
  0x2e   :  { %2571 = vrot.lane.b32.xlu0 %v2570_v37, %s3062_s22  ;;  %4853 = vst [vmem:[#allocation10_spill] sm:$0xff] %v3443_v27  ;;  %v630_v1 = vrot.slane %v3410_v2, 7  ;;  %v3458_v56 = vsel %vm218_vm2, %v3436_v31, %v549_v42  ;;  %v4855_v27 = vrot.slane %v3390_v17, 2  ;;  %v258_v20 = vrot.slane %v3357_v11, 2 }
  0x2f   :  { %v315_v37 = vsel %vm212_vm0, %v3324_v49, %v4854_v29  ;;  %v4856_v57 = vrot.slane %v3369_v51, 5  ;;  %v2590_v6 = vpack.i.bf16 %v629_v16, %v621_v41  ;;  %v612_v42 = vrot.slane %v3214_v46, 5 }
  0x30   :  { %2576 = vrot.lane.b32.xlu1 %v2575_v21, %s3063_s14  ;;  %v3463_v58 = vsel %vm215_vm1, %v315_v37, %v4855_v27  ;;  %v832_v21 = vrot.slane %v3147_v23, 5  ;;  %v4828_v37 = vmov 0.0   ;;  %v645_v16 = vrot.slane %v3259_v5, 1 }
  0x31   :  { %v314_v29 = vsel %vm212_vm0, %v3236_v54, %v4856_v57  ;;  %410 = vmatprep.mubr.f32.mxu0 %v4828_v37  ;;  %78 = vst [vmem:[#allocation2] sm:$0xff] %v4828_v37  ;;  %79 = vst [vmem:[#allocation2 + $0x8] sm:$0xff] %v4828_v37  ;;  %765 = vmatprep.mubr.f32.mxu1 %v4828_v37  ;;  %v2600_v57 = vpack.i.bf16 %v3333_v53, %v612_v42  ;;  %v646_v41 = vrot.slane %v3283_v19, 1 }
  0x32   :  { %2581 = vrot.lane.b32.xlu0 %v2580_v22, %s3063_s14  ;;  %v3476_v33 = vsel %vm215_vm1, %v314_v29, %v258_v20  ;;  %v865_v27 = vsel %vm212_vm0, %v3107_v3, %v832_v21  ;;  %82 = vst [vmem:[#allocation2 + $0x18] sm:$0xff] %v4828_v37  ;;  %83 = vst [vmem:[#allocation2 + $0x20] sm:$0xff] %v4828_v37  ;;  %v2595_v3 = vpack.i.bf16 %v611_v36, %v630_v1 }
  0x33   :  { %85 = vst [vmem:[#allocation2 + $0x30] sm:$0xf] %v4828_v37  ;;  %86 = vst [vmem:[#allocation2 + $0x38] sm:$0xf] %v4828_v37  ;;  %v3509_v22 = vsel %vm215_vm1, %v865_v27, %v3436_v31  ;;  %v654_v29 = vrot.slane %v3157_v25, 6  ;;  %v655_v21 = vrot.slane %v3174_v32, 6  ;;  %v2610_v1 = vpack.i.bf16 %v646_v41, %v645_v16 }
  0x34   :  { %89 = vst [vmem:[#allocation2 + $0x48] sm:$0xff] %v4828_v37  ;;  %90 = vst [vmem:[#allocation2 + $0x50] sm:$0xff] %v4828_v37  ;;  %2586 = vrot.lane.b32.xlu1 %v2585_v48, %s3065_s19  ;;  %v663_v48 = vrot.slane %v3164_v28, 3  ;;  %v664_v36 = vrot.slane %v3184_v35, 3  ;;  %v2625_v25 = vpack.i.bf16 %v3270_v13, %v3193_v39  ;;  %v1099_v32 = vrot.slane %v3346_v12, 5 }
  0x35   :  { %92 = vst [vmem:[#allocation2 + $0x60] sm:$0xff] %v4828_v37  ;;  %93 = vst [vmem:[#allocation2 + $0x68] sm:$0xff] %v4828_v37  ;;  %v4857_v27 = vrot.slane %v3137_v15, 7  ;;  %v2655_v41 = vpack.i.bf16 %v3324_v49, %v3236_v54 }
  0x36   :  { %95 = vst [vmem:[#allocation2 + $0x78] sm:$0xf] %v4828_v37  ;;  %96 = vst [vmem:[#allocation2 + $0x80] sm:$0xf] %v4828_v37  ;;  %2591 = vrot.lane.b32.xlu0 %v2590_v6, %s3062_s22  ;;  %v2615_v6 = vpack.i.bf16 %v655_v21, %v654_v29  ;;  %v2620_v42 = vpack.i.bf16 %v664_v36, %v663_v48  ;;  %v208_v29 = vrot.slane %v3198_v40, 3  ;;  %v209_v21 = vrot.slane %v3214_v46, 3 }
  0x37   :  { %98 = vst [vmem:[#allocation2 + $0x90] sm:$0xff] %v4828_v37  ;;  %99 = vst [vmem:[#allocation2 + $0x98] sm:$0xff] %v4828_v37  ;;  %v127_v48 = vrot.slane %v3193_v39, 2  ;;  %v128_v36 = vrot.slane %v3270_v13, 2 }
  0x38   :  { %101 = vst [vmem:[#allocation2 + $0xa8] sm:$0xff] %v4828_v37  ;;  %102 = vst [vmem:[#allocation2 + $0xb0] sm:$0xff] %v4828_v37  ;;  %2596 = vrot.lane.b32.xlu1 %v2595_v3, %s3062_s22  ;;  %v2635_v3 = vpack.i.bf16 %v4857_v27, %v3336_v55  ;;  %v4834_v27 = vrot.slane %v3198_v40, 1 }
  0x39   :  { %104 = vst [vmem:[#allocation2 + $0xc0] sm:$0xf] %v4828_v37  ;;  %105 = vst [vmem:[#allocation2 + $0xc8] sm:$0xf] %v4828_v37 }
  0x3a   :  { %107 = vst [vmem:[#allocation2 + $0xd8] sm:$0xff] %v4828_v37  ;;  %108 = vst [vmem:[#allocation2 + $0xe0] sm:$0xff] %v4828_v37  ;;  %2601 = vrot.lane.b32.xlu0 %v2600_v57, %s3062_s22  ;;  %v4858_v57 = vrot.slane %v3147_v23, 7  ;;  %v4859_v23 = vrot.slane %v3369_v51, 5 }
  0x3b   :  { %110 = vst [vmem:[#allocation2 + $0xf0] sm:$0xff] %v4828_v37  ;;  %111 = vst [vmem:[#allocation2 + $0xf8] sm:$0xff] %v4828_v37 }
  0x3c   :  { %113 = vst [vmem:[#allocation2 + $0x108] sm:$0xf] %v4828_v37  ;;  %114 = vst [vmem:[#allocation2 + $0x110] sm:$0xf] %v4828_v37  ;;  %2606 = vrot.lane.b32.xlu1 %v3225_v50, %s3063_s14  ;;  %v3535_v50 = vsel %vm212_vm0, %v3169_v30, %v1099_v32  ;;  %v2640_v16 = vpack.i.bf16 %v3342_v60, %v4858_v57  ;;  %v4833_v32 = vrot.slane %v3410_v2, 3  ;;  %v4830_v57 = vrot.slane %v3369_v51, 3 }
  0x3e   :  { %2611 = vrot.lane.b32.xlu0 %v2610_v1, %s3063_s14 }
  0x40   :  { %2616 = vrot.lane.b32.xlu1 %v2615_v6, %s3065_s19  ;;  %v2665_v6 = vpack.i.bf16 %v209_v21, %v208_v29 }
  0x42   :  { %2621 = vrot.lane.b32.xlu0 %v2620_v42, %s3065_s19  ;;  %v836_v42 = vrot.slane %v3214_v46, 1 }
  0x44   :  { %2626 = vrot.lane.b32.xlu1 %v2625_v25, %s3065_s19  ;;  %v840_v25 = vrot.slane %v3324_v49, 6 }
  0x46   :  { %2631 = vrot.lane.b32.xlu0 %v3208_v44, %s3063_s14  ;;  %v4860_v44 = vrot.slane %v3410_v2, 5 }
  0x48   :  { %2636 = vrot.lane.b32.xlu1 %v2635_v3, %s3062_s22  ;;  %v2660_v1 = vpack.i.bf16 %v4860_v44, %v4859_v23  ;;  %v839_v3 = vrot.slane %v3236_v54, 6  ;;  %v1128_v54 = vrot.slane %v3390_v17, 6  ;;  %v4832_v44 = vrot.slane %v3369_v51, 1 }
  0x4a   :  { %2641 = vrot.lane.b32.xlu0 %v2640_v16, %s3062_s22  ;;  %v871_v16 = vsel %vm227_vm3, %v836_v42, %v840_v25  ;;  %v870_v49 = vsel %vm227_vm3, %v4834_v27, %v839_v3  ;;  %v1127_v25 = vrot.slane %v3357_v11, 6  ;;  %v4861_v3 = vrot.slane %v3184_v35, 1 }
  0x4b   :  { %v4865_v35 = vrot.slane %v3152_v24, 6 }
  0x4c   :  { %2646 = vrot.lane.b32.xlu1 %v3218_v47, %s3063_s14  ;;  %v133_v47 = vrot.slane %v3259_v5, 7  ;;  %v2670_v5 = vpack.i.bf16 %v128_v36, %v127_v48 }
  0x4e   :  { %2651 = vrot.lane.b32.xlu0 %v3279_v18, %s3063_s14  ;;  %v134_v18 = vrot.slane %v3283_v19, 7  ;;  %v3577_v19 = vsel %vm230_vm4, %v871_v16, %v4833_v32 }
  0x50   :  { %2656 = vrot.lane.b32.xlu1 %v2655_v41, %s3062_s22  ;;  %v4831_v41 = vrot.slane %v3410_v2, 1  ;;  %v2675_v23 = vpack.i.bf16 %v134_v18, %v133_v47 }
  0x52   :  { %2661 = vrot.lane.b32.xlu0 %v2660_v1, %s3062_s22  ;;  %v3588_v1 = vsel %vm230_vm4, %v870_v49, %v4830_v57  ;;  %v3594_v16 = vsel %vm227_vm3, %v4831_v41, %v1128_v54  ;;  %v4862_v49 = vrot.slane %v3193_v39, 6  ;;  %v4863_v57 = vpack.i.bf16 %v3314_v43, %v3296_v26 }
  0x53   :  { %v905_v41 = vrot.slane %v3319_v45, 3  ;;  %v924_v39 = vsel %vm227_vm3, %v3254_v63, %v4865_v35  ;;  %v4867_v43 = vrot.slane %v3270_v13, 6  ;;  %v3642_v13 = vsel %vm218_vm2, %v127_v48, %v133_v47 }
  0x54   :  { %2666 = vrot.lane.b32.xlu1 %v2665_v6, %s3062_s22  ;;  %v3600_v6 = vsel %vm227_vm3, %v4832_v44, %v1127_v25  ;;  %v2690_v37 = vpack.i.bf16 %v4862_v49, %v4861_v3  ;;  %v906_v25 = vrot.slane %v3346_v12, 3  ;;  %v3650_v35 = vsel %vm215_vm1, %v3376_v38, %v127_v48 }
  0x55   :  { %v515_v38 = vrot.slane %v3274_v14, 6 }
  0x56   :  { %2671 = vrot.lane.b32.xlu0 %v2670_v5, %s3063_s14  ;;  %v4864_v5 = vrot.slane %v3164_v28, 1  ;;  %v926_v28 = vsel %vm230_vm4, %v924_v39, %v905_v41  ;;  %v3637_v41 = vsel %vm218_vm2, %v128_v36, %v134_v18  ;;  %v511_v18 = vrot.slane %v3126_v9, 1 }
  0x58   :  { %2676 = vrot.lane.b32.xlu1 %v2675_v23, %s3063_s14  ;;  %v2685_v54 = vpack.i.bf16 %v4864_v5, %v3180_v34  ;;  %v4866_v23 = vrot.slane %v3169_v30, 6 }
  0x5a   :  { %2681 = vrot.lane.b32.xlu0 %v4863_v57, %s3063_s14  ;;  %v925_v26 = vsel %vm227_vm3, %v3262_v8, %v4866_v23 }
  0x5b   :  { %v927_v34 = vsel %vm230_vm4, %v925_v26, %v906_v25  ;;  %v3646_v25 = vsel %vm215_vm1, %v3361_v10, %v128_v36  ;;  %v510_v36 = vrot.slane %v3121_v7, 1 }
  0x5c   :  { %2691 = vrot.lane.b32.xlu1 %v2690_v37, %s3065_s19  ;;  %v2700_v12 = vpack.i.bf16 %v927_v34, %v926_v28 }
  0x5e   :  { %2686 = vrot.lane.b32.xlu0 %v2685_v54, %s3065_s19 }
  0x60   :  { %2696 = vrot.lane.b32.xlu1 %v3328_v52, %s3063_s14 }
  0x62   :  { %1180 = vrot.lane.b32.xlu0 %v4867_v43, %s3065_s19 }
  0x66   :  { %2701 = vrot.lane.b32.xlu0 %v2700_v12, %s3063_s14 }
  0x78   :  { %v2472_v30 = vpop.permute.xlu0 %2471 }
  0x79   :  { %v2474_v37 = vunpack.i.h.bf16 %v2472_v30  ;;  %v3634_v57 = vunpack.i.l.bf16 %v2472_v30 }
  0x7a   :  { %v2482_v3 = vpop.permute.xlu1 %2481 }
  0x7b   :  { %v2484_v49 = vunpack.i.h.bf16 %v2482_v3  ;;  %v2483_v5 = vunpack.i.l.bf16 %v2482_v3  ;;  %v911_v52 = vsel %vm142_vm7, %v3634_v57, %v2474_v37  ;;  %v3656_v39 = vsel %vm221_vm5, %v3458_v56, %v3634_v57 }
  0x7c   :  { %v2477_v54 = vpop.permute.xlu0 %2476  ;;  %v928_v47 = vsel %vm212_vm0, %v911_v52, 1.0  ;;  %v929_v28 = vsel %vm212_vm0, %v2474_v37, 1.0  ;;  %v3665_v48 = vsel %vm224_vm6, %v3656_v39, %v836_v42  ;;  %v4868_v56 = vrot.slane %v3274_v14, 2 }
  0x7d   :  { %v2479_v23 = vunpack.i.h.bf16 %v2477_v54  ;;  %v2478_v26 = vunpack.i.l.bf16 %v2477_v54  ;;  %v1226_v10 = vsel %vm142_vm7, %v2483_v5, %v2484_v49  ;;  %v4869_v52 = vrot.slane %v3244_v59, 2 }
  0x7e   :  { %v2487_v34 = vpop.permute.xlu1 %2486  ;;  %v2710_v44 = vpack.i.bf16 %v929_v28, %v928_v47 }
  0x7f   :  { %v919_v43 = vsel %vm218_vm2, %v4868_v56, %v2479_v23  ;;  %v897_v12 = vsel %vm142_vm7, %v2478_v26, %v2479_v23  ;;  %v2489_v30 = vunpack.i.h.bf16 %v2487_v34  ;;  %v2488_v3 = vunpack.i.l.bf16 %v2487_v34 }
  0x80   :  { %v2492_v37 = vpop.permute.xlu0 %2491  ;;  %v918_v5 = vsel %vm218_vm2, %v4869_v52, %v897_v12  ;;  %v921_v54 = vsel %vm221_vm5, %v919_v43, %v3093_v0 }
  0x81   :  { %v1235_v32 = vsel %vm142_vm7, %v2488_v3, %v2489_v30  ;;  %v1255_v56 = vsel %vm218_vm2, %v2484_v49, %v2489_v30  ;;  %v2494_v27 = vunpack.i.h.bf16 %v2492_v37  ;;  %v2493_v23 = vunpack.i.l.bf16 %v2492_v37 }
  0x82   :  { %v2497_v26 = vpop.permute.xlu1 %2496  ;;  %v920_v34 = vsel %vm221_vm5, %v918_v5, %v3251_v62  ;;  %v923_v12 = vsel %vm224_vm6, %v921_v54, %v3262_v8  ;;  %v1254_v52 = vsel %vm218_vm2, %v1226_v10, %v1235_v32  ;;  %v1257_v47 = vsel %vm221_vm5, %v1255_v56, %v3152_v24 }
  0x83   :  { %v173_v28 = vsel %vm142_vm7, %v2493_v23, %v2494_v27  ;;  %v2499_v43 = vunpack.i.h.bf16 %v2497_v26  ;;  %v2498_v3 = vunpack.i.l.bf16 %v2497_v26  ;;  %v922_v30 = vsel %vm224_vm6, %v920_v34, %v3254_v63 }
  0x84   :  { %v2502_v37 = vpop.permute.xlu0 %2501  ;;  %v2705_v42 = vpack.i.bf16 %v923_v12, %v922_v30  ;;  %v233_v62 = vsel %vm212_vm0, %v3244_v59, %v173_v28  ;;  %v234_v8 = vsel %vm212_vm0, %v3274_v14, %v2494_v27  ;;  %v1256_v32 = vsel %vm221_vm5, %v1254_v52, %v3342_v60 }
  0x85   :  { %v203_v5 = vsel %vm142_vm7, %v2498_v3, %v2499_v43  ;;  %v2504_v54 = vunpack.i.h.bf16 %v2502_v37  ;;  %v3697_v56 = vunpack.i.l.bf16 %v2502_v37  ;;  %v1252_v23 = vsel %vm215_vm1, %v233_v62, %v1226_v10 }
  0x86   :  { %2706 = vrot.lane.b32.xlu1 %v2705_v42, %s3063_s14  ;;  %v2507_v63 = vpop.permute.xlu1 %2506  ;;  %v1253_v26 = vsel %vm215_vm1, %v234_v8, %v2484_v49  ;;  %v243_v34 = vsel %vm227_vm3, %v3372_v61, %v203_v5  ;;  %v244_v27 = vsel %vm227_vm3, %v3383_v4, %v2499_v43  ;;  %v1258_v60 = vsel %vm224_vm6, %v1256_v32, %v3372_v61 }
  0x87   :  { %v2509_v12 = vunpack.i.h.bf16 %v2507_v63  ;;  %v2508_v52 = vunpack.i.l.bf16 %v2507_v63  ;;  %v2715_v28 = vpack.i.bf16 %v1253_v26, %v1252_v23  ;;  %v1259_v10 = vsel %vm224_vm6, %v1257_v47, %v3383_v4  ;;  %v4871_v26 = vld [vmem:[#allocation4_spill] sm:$0xff] }
  0x88   :  { %v2512_v3 = vpop.permute.xlu0 %2511  ;;  %v2725_v42 = vpack.i.bf16 %v1259_v10, %v1258_v60  ;;  %v236_v49 = vsel %vm215_vm1, %v234_v8, %v3336_v55  ;;  %v3714_v30 = vsel %vm215_vm1, %v233_v62, %v3333_v53  ;;  %v3719_v43 = vsel %vm230_vm4, %v244_v27, %v209_v21  ;;  %v4870_v21 = vld [vmem:[#allocation5_spill] sm:$0xff] }
  0x89   :  { %v2514_v61 = vunpack.i.h.bf16 %v2512_v3  ;;  %v2513_v37 = vunpack.i.l.bf16 %v2512_v3  ;;  %2716 = vrot.lane.b32.xlu0 %v2715_v28, %s3063_s14  ;;  %v1244_v4 = vsel %vm142_vm7, %v2504_v54, %v2508_v52  ;;  %v1261_v47 = vsel %vm230_vm4, %v244_v27, %v2508_v52  ;;  %v4873_v28 = vld [vmem:[#allocation6_spill] sm:$0xff] }
  0x8a   :  { %2711 = vrot.lane.b32.xlu1 %v2710_v44, %s3063_s14  ;;  %v2517_v55 = vpop.permute.xlu1 %2516  ;;  %v1260_v8 = vsel %vm230_vm4, %v243_v34, %v1244_v4  ;;  %v1249_v53 = vsel %vm142_vm7, %v3697_v56, %v2509_v12  ;;  %v1263_v46 = vsel %vm212_vm0, %v2509_v12, 1.0  ;;  %v2246_v62 = vpack.c.bf16 %v236_v49, %v4870_v21 }
  0x8b   :  { %v2519_v32 = vunpack.i.h.bf16 %v2517_v55  ;;  %v2518_v5 = vunpack.i.l.bf16 %v2517_v55  ;;  %v2720_v23 = vpack.i.bf16 %v1261_v47, %v1260_v8  ;;  %v223_v54 = vsel %vm221_vm5, %v3637_v41, %v2514_v61  ;;  %v4874_v47 = vld [vmem:[#allocation3_spill] sm:$0xff] }
  0x8c   :  { %v2522_v63 = vpop.permute.xlu0 %2521  ;;  %v4872_v27 = vrot.slane %v4871_v26, 1  ;;  %v143_v60 = vsel %vm142_vm7, %v2513_v37, %v2514_v61  ;;  %v1262_v52 = vsel %vm212_vm0, %v1249_v53, 1.0  ;;  %v2248_v12 = vpack.c.bf16 %v3714_v30, %v4873_v28  ;;  %v4876_v8 = vld [vmem:[#allocation7_spill] sm:$0xff]  ;;  %v4878_v26 = vld [vmem:[#allocation9_spill] sm:$0xff]  ;;  %v4879_v28 = vld [vmem:[#allocation10_spill] sm:$0xff] }
  0x8d   :  { %v2524_v10 = vunpack.i.h.bf16 %v2522_v63  ;;  %v2523_v3 = vunpack.i.l.bf16 %v2522_v63  ;;  %2721 = vrot.lane.b32.xlu0 %v2720_v23, %s3063_s14  ;;  %v222_v41 = vsel %vm221_vm5, %v3642_v13, %v143_v60  ;;  %v4875_v55 = vrot.slane %v4874_v47, 1 }
  0x8e   :  { %v226_v44 = vsel %vm224_vm6, %v223_v54, %v4872_v27  ;;  %2726 = vrot.lane.b32.xlu1 %v2725_v42, %s3063_s14  ;;  %v2527_v4 = vpop.permute.xlu1 %2526  ;;  %v2730_v37 = vpack.i.bf16 %v1263_v46, %v1262_v52  ;;  %v2250_v30 = vpack.c.bf16 %v3719_v43, %v4876_v8  ;;  %v245_v53 = vsel %vm230_vm4, %v243_v34, %v208_v29  ;;  %v4877_v54 = vld [vmem:[#allocation8_spill] sm:$0xff] }
  0x8f   :  { %v2242_v49 = vpack.c.bf16 %v226_v44, %v3646_v25  ;;  %v225_v61 = vsel %vm224_vm6, %v222_v41, %v4875_v55  ;;  %v499_v25 = vsel %vm142_vm7, %v2523_v3, %v2524_v10  ;;  %v2529_v21 = vunpack.i.h.bf16 %v2527_v4 }
  0x90   :  { %v2528_v23 = vunpack.i.l.bf16 %v2527_v4  ;;  %v2244_v13 = vpack.c.bf16 %v225_v61, %v3650_v35  ;;  %v2532_v42 = vpop.permute.xlu0 %2531  ;;  %v2252_v63 = vpack.c.bf16 %v245_v53, %v4877_v54  ;;  %v585_v46 = vsel %vm215_vm1, %v4878_v26, %v2519_v32 }
  0x91   :  { %2243 = vmatprep.subr.bf16.mxu0 %v2242_v49  ;;  %v587_v27 = vsel %vm218_vm2, %v2519_v32, %v2524_v10  ;;  %v490_v43 = vsel %vm142_vm7, %v2518_v5, %v2519_v32  ;;  %v2534_v44 = vunpack.i.h.bf16 %v2532_v42  ;;  %v2533_v60 = vunpack.i.l.bf16 %v2532_v42 }
  0x92   :  { %2245 = vmatpush1.bf16.msra.mxu0 %v2244_v13  ;;  %v589_v29 = vsel %vm221_vm5, %v587_v27, %v2529_v21  ;;  %v507_v34 = vsel %vm142_vm7, %v2528_v23, %v2529_v21  ;;  %2731 = vrot.lane.b32.xlu1 %v2730_v37, %s3063_s14  ;;  %v2537_v35 = vpop.permute.xlu1 %2536  ;;  %v584_v10 = vsel %vm215_vm1, %v4879_v28, %v490_v43  ;;  %v514_v5 = vrot.slane %v3244_v59, 6 }
  0x93   :  { %2247 = vmatprep.subr.bf16.mxu0 %v2246_v62  ;;  %v591_v52 = vsel %vm224_vm6, %v589_v29, %v511_v18  ;;  %v586_v32 = vsel %vm218_vm2, %v490_v43, %v499_v25  ;;  %v531_v3 = vsel %vm142_vm7, %v2533_v60, %v2534_v44  ;;  %v2539_v49 = vunpack.i.h.bf16 %v2537_v35 }
  0x94   :  { %v2538_v41 = vunpack.i.l.bf16 %v2537_v35  ;;  %v2264_v4 = vpack.c.bf16 %v591_v52, %v585_v46  ;;  %v2542_v47 = vpop.permute.xlu0 %2541  ;;  %v588_v62 = vsel %vm221_vm5, %v586_v32, %v507_v34  ;;  %v593_v55 = vsel %vm227_vm3, %v511_v18, %v515_v38 }
  0x95   :  { %v544_v61 = vrot.slane %v3152_v24, 2  ;;  %v2544_v59 = vunpack.i.h.bf16 %v2542_v47  ;;  %v2543_v8 = vunpack.i.l.bf16 %v2542_v47  ;;  %v590_v53 = vsel %vm224_vm6, %v588_v62, %v510_v36 }
  0x96   :  { %v540_v37 = vsel %vm142_vm7, %v2538_v41, %v2539_v49  ;;  %2249 = vmatpush1.bf16.msra.mxu0 %v2248_v12  ;;  %2265 = vmatprep.subr.bf16.mxu1 %v2264_v4  ;;  %v2547_v25 = vpop.permute.xlu1 %2546  ;;  %v2266_v21 = vpack.c.bf16 %v590_v53, %v584_v10  ;;  %v597_v14 = vsel %vm212_vm0, %v2534_v44, %v2539_v49  ;;  %v548_v23 = vrot.slane %v3319_v45, 7 }
  0x97   :  { %2251 = vmatprep.subr.bf16.mxu0 %v2250_v30  ;;  %v592_v9 = vsel %vm227_vm3, %v510_v36, %v514_v5  ;;  %v596_v24 = vsel %vm212_vm0, %v531_v3, %v540_v37  ;;  %v268_v18 = vsel %vm142_vm7, %v2543_v8, %v2544_v59  ;;  %v2549_v38 = vunpack.i.h.bf16 %v2547_v25 }
  0x98   :  { %v2548_v12 = vunpack.i.l.bf16 %v2547_v25  ;;  %v4880_v13 = vrot.slane %v3390_v17, 2  ;;  %v2552_v42 = vpop.permute.xlu0 %2551  ;;  %2267 = vmatpush1.bf16.msra.mxu1 %v2266_v21  ;;  %v599_v54 = vsel %vm215_vm1, %v597_v14, %v3436_v31  ;;  %v598_v7 = vsel %vm215_vm1, %v596_v24, %v544_v61 }
  0x99   :  { %v318_v36 = vsel %vm218_vm2, %v258_v20, %v268_v18  ;;  %v2554_v26 = vunpack.i.h.bf16 %v2552_v42  ;;  %v2553_v46 = vunpack.i.l.bf16 %v2552_v42  ;;  %v595_v27 = vsel %vm230_vm4, %v593_v55, %v2549_v38 }
  0x9a   :  { %v319_v30 = vsel %vm218_vm2, %v4880_v13, %v2544_v59  ;;  %2253 = vmatpush1.bf16.msra.mxu0 %v2252_v63  ;;  %v524_v43 = vsel %vm142_vm7, %v2548_v12, %v2549_v38  ;;  %v2557_v44 = vpop.permute.xlu1 %2556  ;;  %v2268_v60 = vpack.c.bf16 %v599_v54, %v595_v27  ;;  %v831_v34 = vrot.slane %v3137_v15, 5 }
  0x9b   :  { %v594_v29 = vsel %vm230_vm4, %v592_v9, %v524_v43  ;;  %v276_v31 = vsel %vm275_vm8, %v2553_v46, %v2554_v26  ;;  %v2559_v35 = vunpack.i.h.bf16 %v2557_v44  ;;  %v2558_v52 = vunpack.i.l.bf16 %v2557_v44 }
  0x9c   :  { %v2270_v28 = vpack.c.bf16 %v598_v7, %v594_v29  ;;  %v2562_v10 = vpop.permute.xlu0 %2561  ;;  %2269 = vmatprep.subr.bf16.mxu1 %v2268_v60  ;;  %v321_v20 = vsel %vm221_vm5, %v319_v30, %v2554_v26  ;;  %v320_v63 = vsel %vm221_vm5, %v318_v36, %v276_v31  ;;  %v600_v3 = vsel %vm218_vm2, %v544_v61, %v548_v23 }
  0x9d   :  { %v2563_v32 = vunpack.i.l.bf16 %v2562_v10  ;;  %v323_v5 = vsel %vm224_vm6, %v321_v20, %v2559_v35  ;;  %v285_v49 = vsel %vm275_vm8, %v2558_v52, %v2559_v35  ;;  %v2564_v15 = vunpack.i.h.bf16 %v2562_v10 }
  0x9e   :  { %2271 = vmatpush1.bf16.msra.mxu1 %v2270_v28  ;;  %v2567_v41 = vpop.permute.xlu1 %2566  ;;  %v2254_v4 = vpack.c.bf16 %v323_v5, %v3463_v58  ;;  %v322_v47 = vsel %vm224_vm6, %v320_v63, %v285_v49  ;;  %v864_v62 = vsel %vm212_vm0, %v3093_v0, %v831_v34  ;;  %v4882_v13 = vrot.slane %v3410_v2, 3 }
  0x9f   :  { %v557_v55 = vsel %vm142_vm7, %v2563_v32, %v3634_v57  ;;  %v2569_v37 = vunpack.i.h.bf16 %v2567_v41  ;;  %v2568_v59 = vunpack.i.l.bf16 %v2567_v41  ;;  %v2256_v8 = vpack.c.bf16 %v322_v47, %v3476_v33 }
  0xa0   :  { %v2572_v53 = vpop.permute.xlu0 %2571  ;;  %2255 = vmatprep.subr.bf16.mxu0 %v2254_v4  ;;  %v602_v25 = vsel %vm221_vm5, %v600_v3, %v557_v55  ;;  %v3816_v58 = vsel %vm215_vm1, %v864_v62, %v544_v61  ;;  %v4881_v57 = vrot.slane %v3198_v40, 1  ;;  %v49_v3 = vlaneseq }
  0xa1   :  { %v2573_v21 = vunpack.i.l.bf16 %v2572_v53  ;;  %2257 = vmatpush1.bf16.msra.mxu0 %v2256_v8  ;;  %v2574_v14 = vunpack.i.h.bf16 %v2572_v53  ;;  %v566_v0 = vsel %vm142_vm7, %v2564_v15, %v2568_v59  ;;  %v605_v61 = vsel %vm224_vm6, %v3656_v39, %v2568_v59  ;;  %v3867_v53 = vld [vmem:[%s4814_s1] sm:$0xff] }
  0xa2   :  { %v2577_v9 = vpop.permute.xlu1 %2576  ;;  %v3822_v24 = vsel %vm224_vm6, %v602_v25, %v4881_v57  ;;  %v604_v43 = vsel %vm224_vm6, %v602_v25, %v566_v0  ;;  %v4883_v39 = vrot.slane %v3369_v51, 3 }
  0xa3   :  { %v575_v33 = vsel %vm142_vm7, %v2569_v37, %v2573_v21  ;;  %v2579_v18 = vunpack.i.h.bf16 %v2577_v9  ;;  %v2578_v38 = vunpack.i.l.bf16 %v2577_v9  ;;  %v607_v12 = vsel %vm227_vm3, %v2568_v59, %v2573_v21 }
  0xa4   :  { %v2582_v23 = vpop.permute.xlu0 %2581  ;;  %v609_v30 = vsel %vm230_vm4, %v607_v12, %v4882_v13  ;;  %v606_v42 = vsel %vm227_vm3, %v566_v0, %v575_v33  ;;  %v2288_v40 = vpack.c.bf16 %v3822_v24, %v3816_v58  ;;  %v4886_v58 = vpack.c.bf16 %v3665_v48, %v3509_v22 }
  0xa5   :  { %v294_v54 = vsel %vm275_vm8, %v2578_v38, %v2579_v18  ;;  %v325_v7 = vsel %vm227_vm3, %v2559_v35, %v2579_v18  ;;  %v2584_v36 = vunpack.i.h.bf16 %v2582_v23  ;;  %v2583_v26 = vunpack.i.l.bf16 %v2582_v23 }
  0xa6   :  { %v2587_v46 = vpop.permute.xlu1 %2586  ;;  %v2272_v27 = vpack.c.bf16 %v609_v30, %v605_v61  ;;  %v608_v44 = vsel %vm230_vm4, %v606_v42, %v4883_v39  ;;  %v324_v60 = vsel %vm227_vm3, %v285_v49, %v294_v54  ;;  %v4887_v23 = vmov 0.0   ;;  %v3896_v61 = vld [vmem:[%s4814_s1 + $0x8] sm:$0xff] }
  0xa7   :  { %v303_v29 = vsel %vm275_vm8, %v2583_v26, %v2584_v36  ;;  %v2589_v34 = vunpack.i.h.bf16 %v2587_v46  ;;  %v3842_v31 = vunpack.i.l.bf16 %v2587_v46  ;;  %v327_v52 = vsel %vm230_vm4, %v325_v7, %v2584_v36 }
  0xa8   :  { %2273 = vmatprep.subr.bf16.mxu1 %v2272_v27  ;;  %v2592_v35 = vpop.permute.xlu0 %2591  ;;  %v2274_v28 = vpack.c.bf16 %v608_v44, %v604_v43  ;;  %v326_v10 = vsel %vm230_vm4, %v324_v60, %v303_v29  ;;  %v3920_v60 = vld [vmem:[%s4814_s1 + $0x10] sm:$0xf] }
  0xa9   :  { %v329_v20 = vsel %vm212_vm0, %v2589_v34, 1.0  ;;  %v311_v63 = vsel %vm310_vm9, %v3842_v31, %v2589_v34  ;;  %v2594_v32 = vunpack.i.h.bf16 %v2592_v35  ;;  %v2593_v5 = vunpack.i.l.bf16 %v2592_v35 }
  0xaa   :  { %v2258_v49 = vpack.c.bf16 %v329_v20, %v327_v52  ;;  %2275 = vmatpush1.bf16.msra.mxu1 %v2274_v28  ;;  %v2597_v15 = vpop.permute.xlu1 %2596  ;;  %v328_v41 = vsel %vm212_vm0, %v311_v63, 1.0 }
  0xab   :  { %v2599_v4 = vunpack.i.h.bf16 %v2597_v15  ;;  %v2598_v47 = vunpack.i.l.bf16 %v2597_v15  ;;  %v2261_v62 = vpack.c.bf16 %v328_v41, %v326_v10  ;;  %v626_v55 = vsel %vm142_vm7, %v2574_v14, %v2593_v5 }
  0xac   :  { %v3856_v37 = vpop.permute.xlu0 %2601  ;;  %2260 = vmatprep.subr.msk.bf16.mxu0 %vm3850_vm11, %v2258_v49  ;;  %v1098_v49 = vrot.slane %v3319_v45, 5 }
  0xad   :  { %v635_v59 = vsel %vm142_vm7, %v2594_v32, %v2598_v47  ;;  %v2603_v8 = vunpack.i.l.bf16 %v3856_v37  ;;  %2263 = vmatpush1.bf16.msk.msra.mxu0 %vm3850_vm11, %v2261_v62  ;;  %v684_v25 = vsel %vm218_vm2, %v2593_v5, %v2598_v47  ;;  %v2604_v63 = vunpack.i.h.bf16 %v3856_v37 }
  0xae   :  { %v2607_v21 = vpop.permute.xlu1 %2606  ;;  %2287 = vmatprep.subr.bf16.mxu0 %v4886_v58  ;;  %v683_v14 = vsel %vm218_vm2, %v626_v55, %v635_v59 }
  0xaf   :  { %v617_v9 = vsel %vm142_vm7, %v2599_v4, %v2603_v8  ;;  %v3875_v0 = vunpack.i.h.bf16 %v2607_v21  ;;  %v2608_v57 = vunpack.i.l.bf16 %v2607_v21  ;;  %v680_v24 = vsel %vm212_vm0, %v3390_v17, %v2603_v8 }
  0xb0   :  { %v2612_v33 = vpop.permute.xlu0 %2611  ;;  %2218 = vmatmul.mubr.msk.f32.vlgmr.msra.gmra.mrb[0].mxu0 %vm330_vm12, %v3867_v53  ;;  %v682_v18 = vsel %vm215_vm1, %v680_v24, %v2593_v5  ;;  %v679_v22 = vsel %vm212_vm0, %v3357_v11, %v617_v9 }
  0xb1   :  { %v3886_v48 = vsel %vm275_vm8, %v2608_v57, %v3875_v0  ;;  %v3888_v38 = vunpack.i.h.bf16 %v2612_v33  ;;  %v2613_v12 = vunpack.i.l.bf16 %v2612_v33  ;;  %2289 = vmatpush1.bf16.msra.mxu0 %v2288_v40  ;;  %v686_v17 = vsel %vm221_vm5, %v684_v25, %v3875_v0  ;;  %416 = vmatprep.mubr.f32.mxu0 %v4887_v23 }
  0xb2   :  { %v2617_v13 = vpop.permute.xlu1 %2616  ;;  %v681_v11 = vsel %vm215_vm1, %v679_v22, %v626_v55  ;;  %v685_v30 = vsel %vm221_vm5, %v683_v14, %v3886_v48 }
  0xb3   :  { %v2619_v42 = vunpack.i.h.bf16 %v2617_v13  ;;  %v2618_v54 = vunpack.i.l.bf16 %v2617_v13  ;;  %v688_v40 = vsel %vm224_vm6, %v686_v17, %v3888_v38  ;;  %v3905_v7 = vsel %vm275_vm8, %v2613_v12, %v3888_v38 }
  0xb4   :  { %v2622_v36 = vpop.permute.xlu0 %2621  ;;  %v2276_v26 = vpack.c.bf16 %v688_v40, %v682_v18  ;;  %v687_v46 = vsel %vm224_vm6, %v685_v30, %v3905_v7  ;;  %2219 = vmatmul.mubr.msk.f32.gmra.mrb[2].mxu0 %vm330_vm12, %v3896_v61  ;;  %v3060_v18 = vld [vmem:[%s4813_s0 + $0x50] sm:$0x77]  ;;  %s3067_s0 = smov 17  }
  0xb5   :  { %v3913_v27 = vsel %vm227_vm3, %v3888_v38, %v2619_v42  ;;  %v660_v43 = vsel %vm310_vm9, %v2618_v54, %v2619_v42  ;;  %v2624_v39 = vunpack.i.h.bf16 %v2622_v36  ;;  %v2623_v44 = vunpack.i.l.bf16 %v2622_v36  ;;  %422 = vmatprep.mubr.f32.mxu0 %v4887_v23 }
  0xb6   :  { %v2627_v29 = vpop.permute.xlu1 %2626  ;;  %2277 = vmatprep.subr.bf16.mxu1 %v2276_v26  ;;  %v3924_v34 = vsel %vm227_vm3, %v3905_v7, %v660_v43  ;;  %v2278_v52 = vpack.c.bf16 %v687_v46, %v681_v11  ;;  %v1192_v12 = vsel %vm212_vm0, %v3060_v18, %v1098_v49 }
  0xb7   :  { %v669_v35 = vsel %vm310_vm9, %v2623_v44, %v2624_v39  ;;  %v2629_v28 = vunpack.i.h.bf16 %v2627_v29  ;;  %v2628_v10 = vunpack.i.l.bf16 %v2627_v29  ;;  %v692_v20 = vsel %vm230_vm4, %v3913_v27, %v2624_v39 }
  0xb8   :  { %v2632_v32 = vpop.permute.xlu0 %2631  ;;  %2279 = vmatpush1.bf16.msra.mxu1 %v2278_v52  ;;  %v691_v5 = vsel %vm230_vm4, %v3924_v34, %v669_v35  ;;  %2220 = vmatmul.mubr.msk.f32.gmra.mrb[4].mxu0 %vm330_vm12, %v3920_v60  ;;  %v4889_v35 = vrot.slane %v3369_v51, 1 }
  0xb9   :  { %v694_v15 = vsel %vm212_vm0, %v2629_v28, 1.0  ;;  %v676_v41 = vsel %vm310_vm9, %v2628_v10, %v2629_v28  ;;  %v2634_v4 = vunpack.i.h.bf16 %v2632_v32  ;;  %v2633_v47 = vunpack.i.l.bf16 %v2632_v32  ;;  %1032 = vmatprep.mubr.f32.mxu0 %v4887_v23 }
  0xba   :  { %v2280_v62 = vpack.c.bf16 %v694_v15, %v692_v20  ;;  %v2637_v55 = vpop.permute.xlu1 %2636  ;;  %v693_v37 = vsel %vm212_vm0, %v676_v41, 1.0 }
  0xbb   :  { %v847_v59 = vsel %vm275_vm8, %v2633_v47, %v2634_v4  ;;  %v2639_v8 = vunpack.i.h.bf16 %v2637_v55  ;;  %v2638_v25 = vunpack.i.l.bf16 %v2637_v55  ;;  %v2283_v45 = vpack.c.bf16 %v693_v37, %v691_v5 }
  0xbc   :  { %v2642_v21 = vpop.permute.xlu0 %2641  ;;  %2282 = vmatprep.subr.msk.bf16.mxu1 %vm3850_vm11, %v2280_v62  ;;  %v875_v58 = vsel %vm215_vm1, %v680_v24, %v2634_v4  ;;  %v874_v14 = vsel %vm215_vm1, %v679_v22, %v847_v59 }
  0xbd   :  { %v1106_v9 = vsel %vm142_vm7, %v2604_v63, %v2638_v25  ;;  %v2644_v57 = vunpack.i.h.bf16 %v2642_v21  ;;  %v2643_v33 = vunpack.i.l.bf16 %v2642_v21  ;;  %2285 = vmatpush1.bf16.msk.msra.mxu1 %vm3850_vm11, %v2283_v45  ;;  %v1195_v13 = vsel %vm215_vm1, %v3535_v50, %v2638_v25 }
  0xbe   :  { %v2647_v17 = vpop.permute.xlu1 %2646  ;;  %v2290_v24 = vpack.c.bf16 %v875_v58, %v3577_v19  ;;  %v2292_v22 = vpack.c.bf16 %v874_v14, %v3588_v1  ;;  %v1194_v50 = vsel %vm215_vm1, %v1192_v12, %v1106_v9 }
  0xbf   :  { %v1120_v11 = vsel %vm142_vm7, %v2644_v57, %v3697_v56  ;;  %v1113_v30 = vsel %vm142_vm7, %v2639_v8, %v2643_v33  ;;  %v1197_v42 = vsel %vm218_vm2, %v2638_v25, %v2643_v33  ;;  %v2649_v54 = vunpack.i.h.bf16 %v2647_v17 }
  0xc0   :  { %v1196_v40 = vsel %vm218_vm2, %v1106_v9, %v1113_v30  ;;  %v2648_v36 = vunpack.i.l.bf16 %v2647_v17  ;;  %v2652_v26 = vpop.permute.xlu0 %2651  ;;  %v1199_v46 = vsel %vm221_vm5, %v1197_v42, %v3697_v56  ;;  %2223 = vmatmul.mubr.msk.f32.vlgmr.msra.gmra.mrb[0].mxu1 %vm330_vm12, %v3867_v53  ;;  %2291 = vmatprep.subr.bf16.mxu0 %v2290_v24  ;;  %v4888_v56 = vrot.slane %v3410_v2, 1 }
  0xc1   :  { %v1198_v19 = vsel %vm221_vm5, %v1196_v40, %v1120_v11  ;;  %v877_v1 = vsel %vm218_vm2, %v2634_v4, %v2649_v54  ;;  %v2654_v43 = vunpack.i.h.bf16 %v2652_v26  ;;  %v2653_v39 = vunpack.i.l.bf16 %v2652_v26  ;;  %2293 = vmatpush1.bf16.msra.mxu0 %v2292_v22  ;;  %771 = vmatprep.mubr.f32.mxu1 %v4887_v23 }
  0xc2   :  { %v854_v44 = vsel %vm275_vm8, %v2648_v36, %v2649_v54  ;;  %v2657_v29 = vpop.permute.xlu1 %2656  ;;  %v1201_v52 = vsel %vm224_vm6, %v1199_v46, %v4888_v56  ;;  %v1200_v28 = vsel %vm224_vm6, %v1198_v19, %v4889_v35  ;;  %v879_v10 = vsel %vm221_vm5, %v877_v1, %v3875_v0 }
  0xc3   :  { %v876_v20 = vsel %vm218_vm2, %v847_v59, %v854_v44  ;;  %v861_v63 = vsel %vm275_vm8, %v2653_v39, %v2654_v43  ;;  %v2659_v32 = vunpack.i.h.bf16 %v2657_v29  ;;  %v2658_v5 = vunpack.i.l.bf16 %v2657_v29 }
  0xc4   :  { %v2662_v49 = vpop.permute.xlu0 %2661  ;;  %v2308_v15 = vpack.c.bf16 %v1201_v52, %v1195_v13  ;;  %v2310_v41 = vpack.c.bf16 %v1200_v28, %v1194_v50  ;;  %v881_v2 = vsel %vm224_vm6, %v879_v10, %v3888_v38  ;;  %v883_v51 = vsel %vm230_vm4, %v3913_v27, %v2654_v43  ;;  %2224 = vmatmul.mubr.msk.f32.gmra.mrb[2].mxu1 %vm330_vm12, %v3896_v61 }
  0xc5   :  { %v1142_v0 = vsel %vm142_vm7, %v2658_v5, %v2659_v32  ;;  %v2664_v4 = vunpack.i.h.bf16 %v2662_v49  ;;  %v2663_v47 = vunpack.i.l.bf16 %v2662_v49  ;;  %v2294_v62 = vpack.c.bf16 %v883_v51, %v881_v2  ;;  %777 = vmatprep.mubr.f32.mxu1 %v4887_v23 }
  0xc6   :  { %2309 = vmatprep.subr.bf16.mxu1 %v2308_v15  ;;  %v2667_v55 = vpop.permute.xlu1 %2666  ;;  %v878_v37 = vsel %vm221_vm5, %v876_v20, %v3886_v48  ;;  %v882_v8 = vsel %vm230_vm4, %v3924_v34, %v861_v63 }
  0xc7   :  { %v1149_v38 = vsel %vm142_vm7, %v2663_v47, %v2664_v4  ;;  %2311 = vmatpush1.bf16.msra.mxu1 %v2310_v41  ;;  %v2669_v59 = vunpack.i.h.bf16 %v2667_v55  ;;  %v2668_v27 = vunpack.i.l.bf16 %v2667_v55  ;;  %2295 = vmatprep.subr.bf16.mxu0 %v2294_v62  ;;  %v1207_v21 = vsel %vm212_vm0, %v2659_v32, %v2664_v4 }
  0xc8   :  { %v1206_v25 = vsel %vm212_vm0, %v1142_v0, %v1149_v38  ;;  %v2672_v45 = vpop.permute.xlu0 %2671  ;;  %v880_v58 = vsel %vm224_vm6, %v878_v37, %v3905_v7  ;;  %2225 = vmatmul.mubr.msk.f32.gmra.mrb[4].mxu1 %vm330_vm12, %v3920_v60  ;;  %vm87_vm0 = vcmask 125952  }
  0xc9   :  { %v1135_v48 = vsel %vm142_vm7, %v2668_v27, %v2669_v59  ;;  %v2674_v14 = vunpack.i.h.bf16 %v2672_v45  ;;  %v2673_v9 = vunpack.i.l.bf16 %v2672_v45  ;;  %v1205_v57 = vsel %vm230_vm4, %v3594_v16, %v2669_v59  ;;  %1366 = vmatprep.mubr.f32.mxu1 %v4887_v23 }
  0xca   :  { %v2677_v34 = vpop.permute.xlu1 %2676  ;;  %v1204_v33 = vsel %vm230_vm4, %v3600_v6, %v1135_v48  ;;  %v2296_v18 = vpack.c.bf16 %v882_v8, %v880_v58 }
  0xcb   :  { %v1156_v12 = vsel %vm275_vm8, %v2673_v9, %v2674_v14  ;;  %v2679_v7 = vunpack.i.h.bf16 %v2677_v34  ;;  %v2678_v17 = vunpack.i.l.bf16 %v2677_v34  ;;  %v1209_v13 = vsel %vm215_vm1, %v1207_v21, %v2674_v14 }
  0xcc   :  { %v2682_v24 = vpop.permute.xlu0 %2681  ;;  %v2312_v22 = vpack.c.bf16 %v1209_v13, %v1205_v57  ;;  %v1208_v11 = vsel %vm215_vm1, %v1206_v25, %v1156_v12  ;;  %2297 = vmatpush1.bf16.msra.mxu0 %v2296_v18  ;;  %vm469_vm1 = vcmask 1047688  }
  0xcd   :  { %v1163_v16 = vsel %vm275_vm8, %v2678_v17, %v2679_v7  ;;  %v2314_v23 = vpack.c.bf16 %v1208_v11, %v1204_v33  ;;  %v1211_v46 = vsel %vm218_vm2, %v2674_v14, %v2679_v7  ;;  %v2684_v2 = vunpack.i.h.bf16 %v2682_v24 }
  0xce   :  { %v2692_v30 = vpop.permute.xlu1 %2691  ;;  %2313 = vmatprep.subr.bf16.mxu1 %v2312_v22  ;;  %v1210_v42 = vsel %vm218_vm2, %v1156_v12, %v1163_v16  ;;  %v1213_v28 = vsel %vm221_vm5, %v1211_v46, %v3842_v31  ;;  %v2683_v51 = vunpack.i.l.bf16 %v2682_v24  ;;  %vm459_vm2 = vcmask 138240  }
  0xcf   :  { %2315 = vmatpush1.bf16.msra.mxu1 %v2314_v23  ;;  %v2694_v54 = vunpack.i.h.bf16 %v2692_v30  ;;  %v2693_v40 = vunpack.i.l.bf16 %v2692_v30 }
  0xd0   :  { %v2687_v6 = vpop.permute.xlu0 %2686  ;;  %v954_v55 = vsel %vm275_vm8, %v2683_v51, %v2684_v2 }
  0xd1   :  { %v2689_v36 = vunpack.i.h.bf16 %v2687_v6  ;;  %v2688_v26 = vunpack.i.l.bf16 %v2687_v6  ;;  %v1215_v63 = vsel %vm224_vm6, %v1213_v28, %v2693_v40 }
  0xd2   :  { %v2697_v50 = vpop.permute.xlu1 %2696 }
  0xd3   :  { %v1168_v19 = vsel %vm310_vm9, %v2688_v26, %v3842_v31  ;;  %v2699_v1 = vunpack.i.h.bf16 %v2697_v50  ;;  %v2698_v43 = vunpack.i.l.bf16 %v2697_v50  ;;  %v1175_v39 = vsel %vm310_vm9, %v2689_v36, %v2693_v40 }
  0xd4   :  { %v1212_v44 = vsel %vm221_vm5, %v1210_v42, %v1168_v19  ;;  %v1181_v29 = vpop.permute.xlu0 %1180  ;;  %v4036_v42 = vld [vmem:[#allocation2] sm:$0xff]  ;;  %v50_v26 = vand.u32 127, %v49_v3 }
  0xd5   :  { %v1189_v56 = vsel %vm275_vm8, %v2698_v43, %v2699_v1  ;;  %v1182_v52 = vsel %vm310_vm9, %v2694_v54, %v1181_v29  ;;  %v1217_v35 = vsel %vm227_vm3, %v2693_v40, %v1181_v29  ;;  %v1214_v32 = vsel %vm224_vm6, %v1212_v44, %v1175_v39  ;;  %81 = vst.msk [vmem:[#allocation2 + $0x10] sm:$0xff] %vm80_vm15, %v4036_v42 }
  0xd6   :  { %v1216_v10 = vsel %vm227_vm3, %v1175_v39, %v1182_v52  ;;  %v1219_v20 = vsel %vm230_vm4, %v1217_v35, %v2699_v1  ;;  %v51_v46 = vadd.s32 128, %v50_v26  ;;  %v56_v50 = vand.u32 15, %v50_v26  ;;  %84 = vst.msk [vmem:[#allocation2 + $0x28] sm:$0xff] %vm80_vm15, %v4036_v42  ;;  %91 = vst.msk [vmem:[#allocation2 + $0x58] sm:$0xff] %vm80_vm15, %v4036_v42 }
  0xd7   :  { %v1218_v5 = vsel %vm230_vm4, %v1216_v10, %v1189_v56  ;;  %v2316_v49 = vpack.c.bf16 %v1219_v20, %v1215_v63  ;;  %94 = vst.msk [vmem:[#allocation2 + $0x70] sm:$0xff] %vm80_vm15, %v4036_v42  ;;  %vm471_vm3 = vcmask 924672   ;;  %vm475_vm6 = vcmask 1043592  }
  0xd8   :  { %v2318_v15 = vpack.c.bf16 %v1218_v5, %v1214_v32  ;;  %v2702_v41 = vpop.permute.xlu0 %2701  ;;  %v63_v19 = vand.u32 15, %v51_v46  ;;  %vm4058_vm13 = vcmp.lt.s32.totalorder %v56_v50, 14  ;;  %88 = vst.msk [vmem:[#allocation2 + $0x40] sm:$0xf] %vm87_vm0, %v4036_v42  ;;  %97 = vst.msk [vmem:[#allocation2 + $0x88] sm:$0xf] %vm87_vm0, %v4036_v42 }
  0xd9   :  { %2317 = vmatprep.subr.bf16.mxu1 %v2316_v49  ;;  %v2704_v4 = vunpack.i.h.bf16 %v2702_v41  ;;  %v2703_v31 = vunpack.i.l.bf16 %v2702_v41 }
  0xda   :  { %2319 = vmatpush1.bf16.msra.mxu1 %v2318_v15  ;;  %vm4062_vm14 = vcmp.lt.s32.totalorder %v63_v19, 14 }
  0xdb   :  { %v956_v25 = vsel %vm275_vm8, %v2703_v31, %v2704_v4 }
  0xf8   :  { %v2707_v0 = vpop.permute.xlu1 %2706 }
  0xf9   :  { %v2709_v47 = vunpack.i.h.bf16 %v2707_v0  ;;  %v2708_v62 = vunpack.i.l.bf16 %v2707_v0 }
  0xfb   :  { %v2298_v37 = vpack.c.bf16 %v2709_v47, %v2684_v2  ;;  %v955_v38 = vsel %vm275_vm8, %v2708_v62, %v2709_v47  ;;  %v2717_v59 = vpop.permute.xlu0 %2716 }
  0xfc   :  { %v2300_v27 = vpack.c.bf16 %v955_v38, %v954_v55  ;;  %v2712_v8 = vpop.permute.xlu1 %2711  ;;  %v2719_v58 = vunpack.i.h.bf16 %v2717_v59  ;;  %v2718_v48 = vunpack.i.l.bf16 %v2717_v59 }
  0xfd   :  { %v2714_v45 = vunpack.i.h.bf16 %v2712_v8  ;;  %v2713_v21 = vunpack.i.l.bf16 %v2712_v8  ;;  %2299 = vmatprep.subr.bf16.mxu0 %v2298_v37 }
  0xfe   :  { %2301 = vmatpush1.bf16.msra.mxu0 %v2300_v27  ;;  %v1288_v7 = vsel %vm275_vm8, %v2718_v48, %v2719_v58 }
  0xff   :  { %v2302_v14 = vpack.c.bf16 %v2714_v45, %v2704_v4  ;;  %v957_v9 = vsel %vm275_vm8, %v2713_v21, %v2714_v45  ;;  %v2722_v34 = vpop.permute.xlu0 %2721 }
 0x100   :  { %v2305_v57 = vpack.c.bf16 %v957_v9, %v956_v25  ;;  %v2727_v33 = vpop.permute.xlu1 %2726  ;;  %v2724_v17 = vunpack.i.h.bf16 %v2722_v34  ;;  %v2723_v13 = vunpack.i.l.bf16 %v2722_v34 }
 0x101   :  { %v2729_v18 = vunpack.i.h.bf16 %v2727_v33  ;;  %v2728_v12 = vunpack.i.l.bf16 %v2727_v33  ;;  %2304 = vmatprep.subr.msk.bf16.mxu0 %vm3850_vm11, %v2302_v14 }
 0x102   :  { %2307 = vmatpush1.bf16.msk.msra.mxu0 %vm3850_vm11, %v2305_v57  ;;  %v1290_v6 = vsel %vm275_vm8, %v2723_v13, %v2724_v17 }
 0x103   :  { %v2320_v24 = vpack.c.bf16 %v2729_v18, %v2719_v58  ;;  %v1289_v22 = vsel %vm275_vm8, %v2728_v12, %v2729_v18 }
 0x104   :  { %v2322_v11 = vpack.c.bf16 %v1289_v22, %v1288_v7  ;;  %v2732_v16 = vpop.permute.xlu1 %2731 }
 0x105   :  { %v2734_v30 = vunpack.i.h.bf16 %v2732_v16  ;;  %v2733_v23 = vunpack.i.l.bf16 %v2732_v16  ;;  %2321 = vmatprep.subr.bf16.mxu1 %v2320_v24  ;;  %2228 = vmatmul.mubr.msk.f32.vlgmr.msra.gmra.mrb[6].mxu0 %vm330_vm12, %v3867_v53 }
 0x106   :  { %2323 = vmatpush1.bf16.msra.mxu1 %v2322_v11  ;;  %1038 = vmatprep.mubr.f32.mxu0 %v4036_v42 }
 0x107   :  { %v2324_v54 = vpack.c.bf16 %v2734_v30, %v2724_v17  ;;  %v1291_v40 = vsel %vm275_vm8, %v2733_v23, %v2734_v30 }
 0x108   :  { %v2327_v36 = vpack.c.bf16 %v1291_v40, %v1290_v6 }
 0x109   :  { %2326 = vmatprep.subr.msk.bf16.mxu1 %vm3850_vm11, %v2324_v54  ;;  %2229 = vmatmul.mubr.msk.f32.gmra.mrb[8].mxu0 %vm330_vm12, %v3896_v61 }
 0x10a   :  { %2329 = vmatpush1.bf16.msk.msra.mxu1 %vm3850_vm11, %v2327_v36  ;;  %1044 = vmatprep.mubr.f32.mxu0 %v4036_v42  ;;  %vm1543_vm11 = vcmask 1031168  }
 0x10d   :  { %2233 = vmatmul.mubr.msk.f32.vlgmr.msra.gmra.mrb[6].mxu1 %vm330_vm12, %v3867_v53  ;;  %2230 = vmatmul.mubr.msk.f32.gmra.mrb[10].mxu0 %vm330_vm12, %v3920_v60 }
 0x10e   :  { %1372 = vmatprep.mubr.f32.mxu1 %v4036_v42 }
 0x111   :  { %2234 = vmatmul.mubr.msk.f32.gmra.mrb[8].mxu1 %vm330_vm12, %v3896_v61 }
 0x112   :  { %1378 = vmatprep.mubr.f32.mxu1 %v4036_v42 }
 0x115   :  { %2235 = vmatmul.mubr.msk.f32.gmra.mrb[10].mxu1 %vm330_vm12, %v3920_v60  ;;  %vm1740_vm12 = vcmask 900096  }
 0x183   :  { %v412_v1 = vpop.f32.mrb[0].mxu0 }
 0x184   :  { %v429_v43 = vmax.f32 %v412_v1, 0.0  ;;  %v414_v39 = vpop.f32.mrb[1].mxu0 }
 0x185   :  { %v430_v61 = vmax.f32 %v414_v39, 0.0 }
 0x186   :  { %v435_v60 = vsel %vm4058_vm13, %v429_v43, 0.0 }
 0x187   :  { %v418_v29 = vpop.f32.mrb[2].mxu0  ;;  %447 = vrot.lane.b32.xlu0 %v435_v60, %s3067_s0  ;;  %v436_v56 = vsel %vm4062_vm14, %v430_v61, 0.0 }
 0x188   :  { %v431_v52 = vmax.f32 %v418_v29, 0.0  ;;  %449 = vrot.lane.b32.xlu1 %v436_v56, %s3067_s0  ;;  %v420_v35 = vpop.f32.mrb[3].mxu0 }
 0x189   :  { %v432_v28 = vmax.f32 %v420_v35, 0.0 }
 0x18a   :  { %v437_v10 = vsel %vm4058_vm13, %v431_v52, 0.0 }
 0x18b   :  { %451 = vrot.lane.b32.xlu0 %v437_v10, %s3067_s0  ;;  %v438_v20 = vsel %vm4062_vm14, %v432_v28, 0.0  ;;  %v4077_v63 = vpop.f32.mrb[4].mxu0 }
 0x18c   :  { %453 = vrot.lane.b32.xlu1 %v438_v20, %s3067_s0  ;;  %v4080_v32 = vpop.f32.mrb[5].mxu0  ;;  %v433_v39 = vmax.f32 %v4077_v63, 0.0 }
 0x18d   :  { %v434_v29 = vmax.f32 %v4080_v32, 0.0 }
 0x18e   :  { %v439_v10 = vsel %vm4058_vm13, %v433_v39, 0.0 }
 0x18f   :  { %v440_v32 = vsel %vm4062_vm14, %v434_v29, 0.0 }
 0x193   :  { %v4082_v5 = vpop.f32.mrb[0].mxu1 }
 0x194   :  { %v4084_v49 = vpop.f32.mrb[1].mxu1  ;;  %v784_v3 = vmax.f32 %v4082_v5, 0.0 }
 0x195   :  { %v785_v26 = vmax.f32 %v4084_v49, 0.0 }
 0x196   :  { %v790_v50 = vsel %vm4058_vm13, %v784_v3, 0.0 }
 0x197   :  { %v4086_v15 = vpop.f32.mrb[2].mxu1  ;;  %v791_v42 = vsel %vm4062_vm14, %v785_v26, 0.0 }
 0x198   :  { %v4088_v41 = vpop.f32.mrb[3].mxu1  ;;  %v786_v46 = vmax.f32 %v4086_v15, 0.0 }
 0x199   :  { %v787_v19 = vmax.f32 %v4088_v41, 0.0 }
 0x19a   :  { %v792_v61 = vsel %vm4058_vm13, %v786_v46, 0.0 }
 0x19b   :  { %v4090_v2 = vpop.f32.mrb[4].mxu1  ;;  %v793_v56 = vsel %vm4062_vm14, %v787_v19, 0.0 }
 0x19c   :  { %v4092_v51 = vpop.f32.mrb[5].mxu1  ;;  %v788_v28 = vmax.f32 %v4090_v2, 0.0 }
 0x19d   :  { %v789_v63 = vmax.f32 %v4092_v51, 0.0 }
 0x19e   :  { %v794_v49 = vsel %vm4058_vm13, %v788_v28, 0.0 }
 0x19f   :  { %v795_v41 = vsel %vm4062_vm14, %v789_v63, 0.0 }
 0x1d8   :  { %v1034_v0 = vpop.f32.mrb[6].mxu0 }
 0x1d9   :  { %v1051_v4 = vmax.f32 %v1034_v0, 0.0  ;;  %v1036_v31 = vpop.f32.mrb[7].mxu0 }
 0x1da   :  { %v1052_v47 = vmax.f32 %v1036_v31, 0.0 }
 0x1db   :  { %v1057_v62 = vsel %vm4058_vm13, %v1051_v4, 0.0 }
 0x1dc   :  { %1069 = vrot.lane.b32.xlu0 %v1057_v62, %s3067_s0  ;;  %v1058_v55 = vsel %vm4062_vm14, %v1052_v47, 0.0  ;;  %v1040_v37 = vpop.f32.mrb[8].mxu0 }
 0x1dd   :  { %1071 = vrot.lane.b32.xlu1 %v1058_v55, %s3067_s0  ;;  %v1042_v38 = vpop.f32.mrb[9].mxu0  ;;  %v1053_v45 = vmax.f32 %v1040_v37, 0.0 }
 0x1de   :  { %v1054_v48 = vmax.f32 %v1042_v38, 0.0 }
 0x1df   :  { %v1059_v18 = vsel %vm4058_vm13, %v1053_v45, 0.0 }
 0x1e0   :  { %v1368_v59 = vpop.f32.mrb[6].mxu1  ;;  %v1046_v27 = vpop.f32.mrb[10].mxu0  ;;  %v1060_v7 = vsel %vm4062_vm14, %v1054_v48, 0.0 }
 0x1e1   :  { %v1385_v8 = vmax.f32 %v1368_v59, 0.0  ;;  %v1370_v25 = vpop.f32.mrb[7].mxu1  ;;  %v1048_v21 = vpop.f32.mrb[11].mxu0  ;;  %v1055_v13 = vmax.f32 %v1046_v27, 0.0 }
 0x1e2   :  { %v1386_v58 = vmax.f32 %v1370_v25, 0.0  ;;  %v1056_v11 = vmax.f32 %v1048_v21, 0.0 }
 0x1e3   :  { %v1391_v14 = vsel %vm4058_vm13, %v1385_v8, 0.0  ;;  %v1061_v23 = vsel %vm4058_vm13, %v1055_v13, 0.0 }
 0x1e4   :  { %1403 = vrot.lane.b32.xlu0 %v1391_v14, %s3067_s0  ;;  %v1392_v9 = vsel %vm4062_vm14, %v1386_v58, 0.0  ;;  %v1374_v57 = vpop.f32.mrb[8].mxu1  ;;  %v1062_v54 = vsel %vm4062_vm14, %v1056_v11, 0.0 }
 0x1e5   :  { %1405 = vrot.lane.b32.xlu1 %v1392_v9, %s3067_s0  ;;  %v1387_v34 = vmax.f32 %v1374_v57, 0.0  ;;  %v1376_v33 = vpop.f32.mrb[9].mxu1 }
 0x1e6   :  { %v1388_v12 = vmax.f32 %v1376_v33, 0.0 }
 0x1e7   :  { %v1393_v24 = vsel %vm4058_vm13, %v1387_v34, 0.0 }
 0x1e8   :  { %1073 = vrot.lane.b32.xlu0 %v1059_v18, %s3067_s0  ;;  %v1380_v17 = vpop.f32.mrb[10].mxu1  ;;  %v1394_v16 = vsel %vm4062_vm14, %v1388_v12, 0.0 }
 0x1e9   :  { %1075 = vrot.lane.b32.xlu1 %v1060_v7, %s3067_s0  ;;  %v1382_v22 = vpop.f32.mrb[11].mxu1  ;;  %v1389_v30 = vmax.f32 %v1380_v17, 0.0 }
 0x1ea   :  { %v1390_v6 = vmax.f32 %v1382_v22, 0.0 }
 0x1eb   :  { %v1395_v40 = vsel %vm4058_vm13, %v1389_v30, 0.0 }
 0x1ec   :  { %1407 = vrot.lane.b32.xlu0 %v1393_v24, %s3067_s0  ;;  %v1396_v36 = vsel %vm4062_vm14, %v1390_v6, 0.0 }
 0x1ed   :  { %1409 = vrot.lane.b32.xlu1 %v1394_v16, %s3067_s0 }
 0x1f0   :  { %1077 = vrot.lane.b32.xlu0 %v1061_v23, %s3067_s0 }
 0x1f1   :  { %1079 = vrot.lane.b32.xlu1 %v1062_v54, %s3067_s0 }
 0x1f4   :  { %1411 = vrot.lane.b32.xlu0 %v1395_v40, %s3067_s0 }
 0x1f5   :  { %1413 = vrot.lane.b32.xlu1 %v1396_v36, %s3067_s0 }
 0x1f8   :  { %802 = vrot.lane.b32.xlu0 %v790_v50, %s3067_s0 }
 0x1f9   :  { %804 = vrot.lane.b32.xlu1 %v791_v42, %s3067_s0  ;;  %v448_v1 = vpop.permute.xlu0 %447 }
 0x1fa   :  { %470 = vst.msk [vmem:[#allocation2] sm:$0xff] %vm469_vm1, %v448_v1  ;;  %v450_v43 = vpop.permute.xlu1 %449 }
 0x1fb   :  { %v460_v60 = vsel %vm459_vm2, %v448_v1, %v450_v43 }
 0x1fc   :  { %806 = vrot.lane.b32.xlu0 %v792_v61, %s3067_s0  ;;  %472 = vst.msk [vmem:[#allocation2 + $0x8] sm:$0xff] %vm471_vm3, %v460_v60 }
 0x1fd   :  { %808 = vrot.lane.b32.xlu1 %v793_v56, %s3067_s0  ;;  %v452_v52 = vpop.permute.xlu0 %451 }
 0x1fe   :  { %473 = vst.msk [vmem:[#allocation2 + $0x18] sm:$0xff] %vm469_vm1, %v452_v52  ;;  %v454_v35 = vpop.permute.xlu1 %453 }
 0x1ff   :  { %v461_v20 = vsel %vm459_vm2, %v452_v52, %v454_v35 }
 0x200   :  { %455 = vrot.lane.b32.xlu0 %v439_v10, %s3067_s0  ;;  %474 = vst.msk [vmem:[#allocation2 + $0x20] sm:$0xff] %vm471_vm3, %v461_v20  ;;  %v4247_v10 = vld [vmem:[#allocation2 + $0x40] sm:$0xf] }
 0x201   :  { %457 = vrot.lane.b32.xlu1 %v440_v32, %s3067_s0  ;;  %v1431_v5 = vld [vmem:[#allocation2] sm:$0xff] }
 0x203   :  { %v1432_v15 = vld [vmem:[#allocation2 + $0x8] sm:$0xff] }
 0x204   :  { %810 = vrot.lane.b32.xlu0 %v794_v49, %s3067_s0  ;;  %v4173_v2 = vpack.i.bf16 %v1432_v15, %v1431_v5 }
 0x205   :  { %812 = vrot.lane.b32.xlu1 %v795_v41, %s3067_s0  ;;  %v4176_v51 = vld [vmem:[#allocation2 + $0x18] sm:$0xff]  ;;  %v4257_v41 = vld [vmem:[#allocation2 + $0x10] sm:$0xff] }
 0x206   :  { %v2332_v4 = vpack.c.bf16 %v4176_v51, %v1431_v5 }
 0x207   :  { %v4178_v0 = vld [vmem:[#allocation2 + $0x20] sm:$0xff] }
 0x208   :  { %v2330_v31 = vpack.c.bf16 %v4178_v0, %v1432_v15  ;;  %v4184_v53 = vpack.i.bf16 %v4178_v0, %v4176_v51 }
 0x209   :  { %2736 = vrot.lane.b32.xlu1 %v4173_v2, %s3063_s14 }
 0x20a   :  { %2331 = vmatprep.subr.bf16.mxu1 %v2330_v31  ;;  %2746 = vrot.lane.b32.xlu0 %v4184_v53, %s3063_s14 }
 0x20b   :  { %2333 = vmatpush1.bf16.msra.mxu1 %v2332_v4 }
 0x20d   :  { %2741 = vrot.lane.b32.xlu1 %v4173_v2, %s3065_s19 }
 0x24e   :  { %v1070_v44 = vpop.permute.xlu0 %1069 }
 0x24f   :  { %1091 = vst.msk [vmem:[#allocation2 + $0x90] sm:$0xff] %vm469_vm1, %v1070_v44  ;;  %v1072_v47 = vpop.permute.xlu1 %1071 }
 0x250   :  { %v1081_v62 = vsel %vm459_vm2, %v1070_v44, %v1072_v47 }
 0x251   :  { %1092 = vst.msk [vmem:[#allocation2 + $0x98] sm:$0xff] %vm471_vm3, %v1081_v62 }
 0x256   :  { %v1404_v55 = vpop.permute.xlu0 %1403 }
 0x257   :  { %1425 = vst.msk [vmem:[#allocation2 + $0xd8] sm:$0xff] %vm469_vm1, %v1404_v55  ;;  %v1406_v37 = vpop.permute.xlu1 %1405 }
 0x258   :  { %v1415_v38 = vsel %vm459_vm2, %v1404_v55, %v1406_v37 }
 0x259   :  { %1426 = vst.msk [vmem:[#allocation2 + $0xe0] sm:$0xff] %vm471_vm3, %v1415_v38 }
 0x25a   :  { %v1074_v59 = vpop.permute.xlu0 %1073 }
 0x25b   :  { %1093 = vst.msk [vmem:[#allocation2 + $0xa8] sm:$0xff] %vm469_vm1, %v1074_v59  ;;  %v1076_v27 = vpop.permute.xlu1 %1075 }
 0x25c   :  { %v1082_v8 = vsel %vm459_vm2, %v1074_v59, %v1076_v27 }
 0x25d   :  { %1094 = vst.msk [vmem:[#allocation2 + $0xb0] sm:$0xff] %vm471_vm3, %v1082_v8 }
 0x25e   :  { %v1408_v25 = vpop.permute.xlu0 %1407  ;;  %v4218_v16 = vld [vmem:[#allocation2 + $0xd8] sm:$0xff] }
 0x25f   :  { %1427 = vst.msk [vmem:[#allocation2 + $0xf0] sm:$0xff] %vm469_vm1, %v1408_v25  ;;  %v1410_v45 = vpop.permute.xlu1 %1409 }
 0x260   :  { %v1416_v21 = vsel %vm459_vm2, %v1408_v25, %v1410_v45  ;;  %v4235_v46 = vld [vmem:[#allocation2 + $0xe0] sm:$0xff] }
 0x261   :  { %1428 = vst.msk [vmem:[#allocation2 + $0xf8] sm:$0xff] %vm471_vm3, %v1416_v21  ;;  %v1449_v21 = vld [vmem:[#allocation2 + $0x90] sm:$0xff] }
 0x262   :  { %v1078_v58 = vpop.permute.xlu0 %1077  ;;  %v4209_v33 = vld [vmem:[#allocation2 + $0xa8] sm:$0xff] }
 0x263   :  { %1095 = vst.msk [vmem:[#allocation2 + $0xc0] sm:$0xf] %vm475_vm6, %v1078_v58  ;;  %v1080_v48 = vpop.permute.xlu1 %1079  ;;  %v1561_v13 = vrot.slane %v4209_v33, 4  ;;  %v1448_v33 = vld [vmem:[#allocation2 + $0x88] sm:$0xf] }
 0x264   :  { %v1083_v14 = vsel %vm459_vm2, %v1078_v58, %v1080_v48  ;;  %v4212_v12 = vld [vmem:[#allocation2 + $0xb0] sm:$0xff]  ;;  %v1450_v58 = vld [vmem:[#allocation2 + $0x98] sm:$0xff] }
 0x265   :  { %1096 = vst.msk [vmem:[#allocation2 + $0xc8] sm:$0xf] %vm477_vm10, %v1083_v14  ;;  %v1563_v30 = vrot.slane %v4212_v12, 4 }
 0x266   :  { %v1412_v9 = vpop.permute.xlu0 %1411 }
 0x267   :  { %1429 = vst.msk [vmem:[#allocation2 + $0x108] sm:$0xf] %vm475_vm6, %v1412_v9  ;;  %v1414_v57 = vpop.permute.xlu1 %1413 }
 0x268   :  { %v1417_v34 = vsel %vm459_vm2, %v1412_v9, %v1414_v57  ;;  %v4285_v57 = vrot.slane %v1449_v21, 4 }
 0x269   :  { %1430 = vst.msk [vmem:[#allocation2 + $0x110] sm:$0xf] %vm477_vm10, %v1417_v34  ;;  %v4287_v34 = vrot.slane %v1450_v58, 4 }
 0x26a   :  { %v803_v18 = vpop.permute.xlu0 %802  ;;  %v1453_v7 = vld [vmem:[#allocation2 + $0xc0] sm:$0xf] }
 0x26b   :  { %824 = vst.msk [vmem:[#allocation2 + $0x48] sm:$0xff] %vm469_vm1, %v803_v18  ;;  %v805_v17 = vpop.permute.xlu1 %804  ;;  %v1565_v24 = vrot.slane %v1453_v7, 4  ;;  %v2790_v7 = vpack.i.bf16 %v4287_v34, %v4285_v57 }
 0x26c   :  { %v814_v22 = vsel %vm459_vm2, %v803_v18, %v805_v17  ;;  %v1454_v11 = vld [vmem:[#allocation2 + $0xc8] sm:$0xf]  ;;  %v2785_v17 = vpack.i.bf16 %v4235_v46, %v4218_v16 }
 0x26d   :  { %825 = vst.msk [vmem:[#allocation2 + $0x50] sm:$0xff] %vm471_vm3, %v814_v22  ;;  %v4224_v23 = vsel %vm221_vm5, %v1561_v13, %v1565_v24  ;;  %v1567_v6 = vrot.slane %v1454_v11, 4  ;;  %v4295_v24 = vld [vmem:[#allocation2 + $0xf8] sm:$0xff]  ;;  %v4299_v22 = vld [vmem:[#allocation2 + $0xf0] sm:$0xff] }
 0x26e   :  { %v807_v54 = vpop.permute.xlu0 %806  ;;  %v2800_v11 = vpack.i.bf16 %v4295_v24, %v4299_v22 }
 0x26f   :  { %826 = vst.msk [vmem:[#allocation2 + $0x60] sm:$0xff] %vm469_vm1, %v807_v54  ;;  %v809_v36 = vpop.permute.xlu1 %808  ;;  %v4232_v3 = vsel %vm221_vm5, %v1563_v30, %v1567_v6 }
 0x270   :  { %v815_v26 = vsel %vm459_vm2, %v807_v54, %v809_v36  ;;  %v4303_v6 = vld [vmem:[#allocation2 + $0x110] sm:$0xf]  ;;  %v4310_v54 = vsel %vm221_vm5, %v4287_v34, %v1563_v30  ;;  %v1442_v36 = vld [vmem:[#allocation2 + $0x58] sm:$0xff] }
 0x271   :  { %827 = vst.msk [vmem:[#allocation2 + $0x68] sm:$0xff] %vm471_vm3, %v815_v26  ;;  %v4313_v26 = vld [vmem:[#allocation2 + $0x108] sm:$0xf]  ;;  %v1803_v30 = vrot.slane %v1442_v36, 4 }
 0x272   :  { %v456_v19 = vpop.permute.xlu0 %455  ;;  %v1440_v42 = vld [vmem:[#allocation2 + $0x48] sm:$0xff] }
 0x273   :  { %476 = vst.msk [vmem:[#allocation2 + $0x30] sm:$0xf] %vm475_vm6, %v456_v19  ;;  %v458_v1 = vpop.permute.xlu1 %457  ;;  %v1467_v61 = vrot.slane %v1440_v42, 4  ;;  %v4321_v42 = vsel %vm221_vm5, %v4285_v57, %v1561_v13 }
 0x274   :  { %v462_v43 = vsel %vm459_vm2, %v456_v19, %v458_v1  ;;  %v1441_v39 = vld [vmem:[#allocation2 + $0x50] sm:$0xff]  ;;  %v2820_v19 = vpack.i.bf16 %v4303_v6, %v4313_v26  ;;  %v2805_v12 = vpack.i.bf16 %v4310_v54, %v4321_v42  ;;  %v2825_v1 = vpack.i.bf16 %v4232_v3, %v4224_v23 }
 0x275   :  { %478 = vst.msk [vmem:[#allocation2 + $0x38] sm:$0xf] %vm477_vm10, %v462_v43  ;;  %v1468_v60 = vrot.slane %v1441_v39, 4  ;;  %v2810_v43 = vpack.i.bf16 %v4176_v51, %v1803_v30  ;;  %v1436_v39 = vld [vmem:[#allocation2 + $0x28] sm:$0xff] }
 0x276   :  { %v811_v29 = vpop.permute.xlu0 %810  ;;  %v1443_v35 = vld [vmem:[#allocation2 + $0x60] sm:$0xff]  ;;  %v2830_v13 = vpack.i.bf16 %v1436_v39, %v4178_v0  ;;  %v2865_v0 = vpack.i.bf16 %v1436_v39, %v4257_v41 }
 0x277   :  { %828 = vst.msk [vmem:[#allocation2 + $0x78] sm:$0xf] %vm475_vm6, %v811_v29  ;;  %v813_v56 = vpop.permute.xlu1 %812  ;;  %v4244_v52 = vpack.i.bf16 %v1468_v60, %v1467_v61  ;;  %v1469_v5 = vrot.slane %v1443_v35, 4  ;;  %v2755_v49 = vpack.i.bf16 %v4247_v10, %v1468_v60 }
 0x278   :  { %v816_v28 = vsel %vm459_vm2, %v811_v29, %v813_v56  ;;  %v1444_v20 = vld [vmem:[#allocation2 + $0x68] sm:$0xff]  ;;  %v1806_v29 = vrot.slane %v1448_v33, 4 }
 0x279   :  { %829 = vst.msk [vmem:[#allocation2 + $0x80] sm:$0xf] %vm477_vm10, %v816_v28  ;;  %2751 = vrot.lane.b32.xlu0 %v4244_v52, %s3063_s14  ;;  %v1471_v63 = vrot.slane %v1444_v20, 4  ;;  %v1470_v55 = vsel %vm221_vm5, %v1467_v61, %v1469_v5 }
 0x27a   :  { %v4252_v32 = vld [vmem:[#allocation2 + $0x30] sm:$0xf] }
 0x27b   :  { %v1771_v4 = vsel %vm221_vm5, %v4252_v32, %v1467_v61  ;;  %v1472_v44 = vsel %vm221_vm5, %v1468_v60, %v1471_v63  ;;  %v2760_v38 = vpack.i.bf16 %v4252_v32, %v4257_v41 }
 0x27c   :  { %v4255_v15 = vld [vmem:[#allocation2 + $0x38] sm:$0xf]  ;;  %v2336_v59 = vpack.c.bf16 %v1470_v55, %v1771_v4  ;;  %v2775_v18 = vpack.i.bf16 %v1472_v44, %v1470_v55  ;;  %v4370_v28 = vpop.permute.xlu0 %2746 }
 0x27d   :  { %2756 = vrot.lane.b32.xlu0 %v2755_v49, %s3065_s19  ;;  %v4264_v31 = vpack.i.bf16 %v4255_v15, %v4252_v32  ;;  %v1772_v47 = vsel %vm221_vm5, %v4255_v15, %v1468_v60  ;;  %v2770_v25 = vpack.i.bf16 %v1467_v61, %v4255_v15  ;;  %v1445_v61 = vld [vmem:[#allocation2 + $0x70] sm:$0xff] }
 0x27e   :  { %v2334_v62 = vpack.c.bf16 %v1472_v44, %v1772_v47  ;;  %v1446_v37 = vld [vmem:[#allocation2 + $0x78] sm:$0xf]  ;;  %v1804_v60 = vrot.slane %v1445_v61, 4 }
 0x27f   :  { %2766 = vrot.lane.b32.xlu1 %v4264_v31, %s3063_s14  ;;  %v1473_v27 = vrot.slane %v1446_v37, 4 }
 0x280   :  { %2335 = vmatprep.subr.bf16.mxu1 %v2334_v62  ;;  %v1447_v8 = vld [vmem:[#allocation2 + $0x80] sm:$0xf]  ;;  %v1805_v56 = vsel %vm221_vm5, %v1803_v30, %v1804_v60  ;;  %v1807_v35 = vsel %vm221_vm5, %v1804_v60, %v1806_v29 }
 0x281   :  { %2761 = vrot.lane.b32.xlu0 %v2760_v38, %s3065_s19  ;;  %2337 = vmatpush1.bf16.msra.mxu1 %v2336_v59  ;;  %v1475_v45 = vrot.slane %v1447_v8, 4  ;;  %v4278_v48 = vsel %vm221_vm5, %v1469_v5, %v1473_v27  ;;  %v2850_v51 = vpack.i.bf16 %v1807_v35, %v1805_v56 }
 0x283   :  { %2771 = vrot.lane.b32.xlu1 %v2770_v25, %s3065_s19  ;;  %v4281_v14 = vsel %vm221_vm5, %v1471_v63, %v1475_v45 }
 0x284   :  { %v2780_v9 = vpack.i.bf16 %v4281_v14, %v4278_v48 }
 0x286   :  { %2781 = vrot.lane.b32.xlu0 %v2780_v9, %s3063_s14 }
 0x287   :  { %2776 = vrot.lane.b32.xlu1 %v2775_v18, %s3063_s14 }
 0x28a   :  { %2791 = vrot.lane.b32.xlu0 %v2790_v7, %s3062_s22 }
 0x28b   :  { %2786 = vrot.lane.b32.xlu1 %v2785_v17, %s3062_s22 }
 0x28e   :  { %2801 = vrot.lane.b32.xlu0 %v2800_v11, %s3062_s22 }
 0x28f   :  { %2796 = vrot.lane.b32.xlu1 %v2790_v7, %s3068_s28 }
 0x292   :  { %2821 = vrot.lane.b32.xlu0 %v2820_v19, %s3062_s22 }
 0x293   :  { %2806 = vrot.lane.b32.xlu1 %v2805_v12, %s3062_s22 }
 0x296   :  { %2826 = vrot.lane.b32.xlu0 %v2825_v1, %s3062_s22 }
 0x297   :  { %2811 = vrot.lane.b32.xlu1 %v2810_v43, %s3065_s19 }
 0x29a   :  { %2831 = vrot.lane.b32.xlu0 %v2830_v13, %s3065_s19 }
 0x29b   :  { %2816 = vrot.lane.b32.xlu1 %v2805_v12, %s3068_s28 }
 0x29e   :  { %2841 = vrot.lane.b32.xlu0 %v2825_v1, %s3068_s28 }
 0x29f   :  { %2836 = vrot.lane.b32.xlu1 %v2775_v18, %s3065_s19 }
 0x2a2   :  { %2846 = vrot.lane.b32.xlu0 %v2780_v9, %s3065_s19 }
 0x2a3   :  { %2851 = vrot.lane.b32.xlu1 %v2850_v51, %s3065_s19 }
 0x2a6   :  { %2856 = vrot.lane.b32.xlu0 %v4173_v2, %s3069_s29 }
 0x2a7   :  { %2861 = vrot.lane.b32.xlu1 %v4184_v53, %s3069_s29 }
 0x2aa   :  { %2866 = vrot.lane.b32.xlu0 %v2865_v0, %s3069_s29 }
 0x2ab   :  { %1736 = vrot.lane.b32.xlu1 %v4252_v32, %s3069_s29 }
 0x2ae   :  { %1738 = vrot.lane.b32.xlu0 %v4255_v15, %s3069_s29 }
 0x2af   :  { %1822 = vrot.lane.b32.xlu1 %v4247_v10, %s3069_s29 }
 0x2b2   :  { %2871 = vrot.lane.b32.xlu0 %v4173_v2, %s3062_s22 }
 0x2b3   :  { %2876 = vrot.lane.b32.xlu1 %v2790_v7, %s3063_s14 }
 0x2b6   :  { %2881 = vrot.lane.b32.xlu0 %v4264_v31, %s3062_s22 }
 0x2b7   :  { %2886 = vrot.lane.b32.xlu1 %v4244_v52, %s3062_s22  ;;  %v4368_v52 = vpop.permute.xlu1 %2736 }
 0x2ba   :  { %2891 = vrot.lane.b32.xlu0 %v4184_v53, %s3062_s22 }
 0x2bb   :  { %2896 = vrot.lane.b32.xlu1 %v2805_v12, %s3063_s14  ;;  %v4374_v20 = vpop.permute.xlu1 %2741 }
 0x2be   :  { %2906 = vrot.lane.b32.xlu0 %v2780_v9, %s3062_s22 }
 0x2bf   :  { %2901 = vrot.lane.b32.xlu1 %v2775_v18, %s3062_s22 }
 0x2c2   :  { %2916 = vrot.lane.b32.xlu0 %v2800_v11, %s3063_s14 }
 0x2c3   :  { %2911 = vrot.lane.b32.xlu1 %v2785_v17, %s3063_s14 }
 0x2c6   :  { %2926 = vrot.lane.b32.xlu0 %v2825_v1, %s3063_s14 }
 0x2c7   :  { %2921 = vrot.lane.b32.xlu1 %v4173_v2, %s3068_s28 }
 0x2ca   :  { %2931 = vrot.lane.b32.xlu0 %v4184_v53, %s3068_s28 }
 0x2cb   :  { %2936 = vrot.lane.b32.xlu1 %v4264_v31, %s3068_s28 }
 0x2eb   :  { %v4372_v10 = vpop.permute.xlu0 %2751 }
 0x2ef   :  { %v4376_v63 = vpop.permute.xlu0 %2756 }
 0x2f1   :  { %v4378_v32 = vpop.permute.xlu1 %2766 }
 0x2f2   :  { %v2769_v30 = vunpack.i.h.bf16 %v4378_v32 }
 0x2f3   :  { %v4380_v5 = vpop.permute.xlu0 %2761 }
 0x2f5   :  { %v4382_v2 = vpop.permute.xlu1 %2771 }
 0x2f8   :  { %v2782_v53 = vpop.permute.xlu0 %2781 }
 0x2f9   :  { %v4384_v49 = vunpack.i.h.bf16 %v2782_v53  ;;  %v2783_v15 = vunpack.i.l.bf16 %v2782_v53  ;;  %v2777_v41 = vpop.permute.xlu1 %2776 }
 0x2fa   :  { %v4386_v4 = vunpack.i.h.bf16 %v2777_v41  ;;  %v2778_v31 = vunpack.i.l.bf16 %v2777_v41 }
 0x2fb   :  { %v4390_v44 = vsel %vm275_vm8, %v2783_v15, %v4384_v49 }
 0x2fc   :  { %4894 = vst [vmem:[#allocation5_spill] sm:$0xff] %v4386_v4  ;;  %4895 = vst [vmem:[#allocation4_spill] sm:$0xff] %v4390_v44  ;;  %v4394_v47 = vsel %vm275_vm8, %v2778_v31, %v4386_v4  ;;  %v2792_v62 = vpop.permute.xlu0 %2791 }
 0x2fd   :  { %4896 = vst [vmem:[#allocation6_spill] sm:$0xff] %v4394_v47  ;;  %v2794_v38 = vunpack.i.h.bf16 %v2792_v62  ;;  %v2793_v59 = vunpack.i.l.bf16 %v2792_v62  ;;  %v2787_v27 = vpop.permute.xlu1 %2786 }
 0x2fe   :  { %v4400_v8 = vunpack.i.h.bf16 %v2787_v27  ;;  %v2788_v25 = vunpack.i.l.bf16 %v2787_v27  ;;  %v4457_v27 = vunpack.i.h.bf16 %v4374_v20 }
 0x2ff   :  { %v4404_v45 = vsel %vm221_vm5, %v4303_v6, %v2794_v38  ;;  %v1587_v21 = vsel %vm142_vm7, %v2793_v59, %v2794_v38  ;;  %v4454_v59 = vunpack.i.h.bf16 %v4368_v52 }
 0x300   :  { %v4409_v58 = vsel %vm221_vm5, %v4313_v26, %v1587_v21  ;;  %v2802_v9 = vpop.permute.xlu0 %2801  ;;  %v4417_v36 = vsel %vm142_vm7, %v2788_v25, %v4400_v8  ;;  %v2743_v25 = vunpack.i.l.bf16 %v4374_v20  ;;  %v2774_v21 = vunpack.i.h.bf16 %v4382_v2 }
 0x301   :  { %v2940_v18 = vpack.i.bf16 %v4404_v45, %v4409_v58  ;;  %v4413_v7 = vunpack.i.h.bf16 %v2802_v9  ;;  %v2803_v17 = vunpack.i.l.bf16 %v2802_v9  ;;  %v2797_v11 = vpop.permute.xlu1 %2796  ;;  %v2945_v43 = vpack.i.bf16 %v4400_v8, %v4417_v36 }
 0x302   :  { %v2799_v19 = vunpack.i.h.bf16 %v2797_v11  ;;  %v2798_v12 = vunpack.i.l.bf16 %v2797_v11  ;;  %v4471_v11 = vunpack.i.l.bf16 %v4382_v2  ;;  %v2768_v26 = vunpack.i.l.bf16 %v4378_v32 }
 0x303   :  { %v4421_v6 = vsel %vm142_vm7, %v2803_v17, %v4413_v7  ;;  %2941 = vrot.lane.b32.xlu1 %v2940_v18, %s3063_s14  ;;  %v2738_v17 = vunpack.i.l.bf16 %v4368_v52 }
 0x304   :  { %v2822_v1 = vpop.permute.xlu0 %2821  ;;  %v1635_v29 = vsel %vm1543_vm11, %v2798_v12, %v2799_v19 }
 0x305   :  { %v2824_v39 = vunpack.i.h.bf16 %v2822_v1  ;;  %v2823_v61 = vunpack.i.l.bf16 %v2822_v1  ;;  %v2807_v33 = vpop.permute.xlu1 %2806  ;;  %v4480_v1 = vunpack.i.h.bf16 %v4370_v28 }
 0x306   :  { %v4430_v13 = vunpack.i.h.bf16 %v2807_v33  ;;  %v2808_v60 = vunpack.i.l.bf16 %v2807_v33  ;;  %v2764_v33 = vunpack.i.h.bf16 %v4380_v5 }
 0x307   :  { %v1616_v56 = vsel %vm142_vm7, %v2823_v61, %v2824_v39  ;;  %v4435_v35 = vsel %vm221_vm5, %v2824_v39, %v2799_v19  ;;  %2946 = vrot.lane.b32.xlu1 %v2945_v43, %s3063_s14  ;;  %v4483_v43 = vunpack.i.l.bf16 %v4376_v63  ;;  %v2748_v61 = vunpack.i.l.bf16 %v4370_v28 }
 0x308   :  { %v4439_v51 = vsel %vm221_vm5, %v1616_v56, %v1635_v29  ;;  %v4443_v0 = vsel %vm142_vm7, %v2808_v60, %v4430_v13  ;;  %v2827_v53 = vpop.permute.xlu0 %2826  ;;  %v4495_v56 = vsel %vm310_vm9, %v2743_v25, %v4457_v27  ;;  %v1700_v28 = vsel %vm310_vm9, %v2764_v33, %v4471_v11 }
 0x309   :  { %4897 = vst [vmem:[#allocation3_spill] sm:$0xff] %v4439_v51  ;;  %v2965_v15 = vpack.i.bf16 %v4435_v35, %v4439_v51  ;;  %v2950_v41 = vpack.i.bf16 %v4430_v13, %v4443_v0  ;;  %v4449_v31 = vunpack.i.h.bf16 %v2827_v53  ;;  %v2828_v62 = vunpack.i.l.bf16 %v2827_v53  ;;  %v4451_v38 = vpop.permute.xlu1 %2811  ;;  %4898 = vst [vmem:[#allocation7_spill] sm:$0xff] %v4495_v56 }
 0x30a   :  { %v2814_v39 = vunpack.i.h.bf16 %v4451_v38  ;;  %v1719_v53 = vsel %vm310_vm9, %v2774_v21, %v4483_v43  ;;  %v2754_v19 = vunpack.i.h.bf16 %v4372_v10 }
 0x30b   :  { %v4463_v9 = vsel %vm142_vm7, %v2828_v62, %v4449_v31  ;;  %2951 = vrot.lane.b32.xlu0 %v2950_v41, %s3063_s14  ;;  %2966 = vrot.lane.b32.xlu1 %v2965_v15, %s3063_s14  ;;  %v4522_v41 = vsel %vm275_vm8, %v2738_v17, %v4454_v59  ;;  %v1784_v17 = vsel %vm221_vm5, %v4471_v11, %v4483_v43 }
 0x30c   :  { %v2955_v20 = vpack.i.bf16 %v4449_v31, %v4463_v9  ;;  %v4477_v12 = vpop.permute.xlu0 %2831 }
 0x30d   :  { %v4487_v52 = vunpack.i.l.bf16 %v4477_v12  ;;  %v2817_v2 = vpop.permute.xlu1 %2816 }
 0x30e   :  { %v4491_v60 = vunpack.i.h.bf16 %v2817_v2  ;;  %v2818_v29 = vunpack.i.l.bf16 %v2817_v2 }
 0x30f   :  { %v4501_v15 = vsel %vm310_vm9, %v2814_v39, %v4487_v52  ;;  %2956 = vrot.lane.b32.xlu0 %v2955_v20, %s3063_s14  ;;  %v2960_v39 = vpack.i.bf16 %v4413_v7, %v4421_v6 }
 0x310   :  { %v4510_v62 = vsel %vm1543_vm11, %v2818_v29, %v4491_v60  ;;  %v2842_v25 = vpop.permute.xlu0 %2841  ;;  %v4526_v29 = vsel %vm275_vm8, %v2748_v61, %v4480_v1 }
 0x311   :  { %4899 = vst [vmem:[#allocation8_spill] sm:$0xff] %v4510_v62  ;;  %v4518_v2 = vunpack.i.h.bf16 %v2842_v25  ;;  %v2843_v33 = vunpack.i.l.bf16 %v2842_v25  ;;  %v2837_v37 = vpop.permute.xlu1 %2836  ;;  %4900 = vst [vmem:[#allocation9_spill] sm:$0xff] %v4526_v29  ;;  %v4547_v25 = vsel %vm221_vm5, %v1700_v28, %v1719_v53  ;;  %v2970_v18 = vpack.i.bf16 %v4491_v60, %v4510_v62 }
 0x312   :  { %v4528_v55 = vunpack.i.h.bf16 %v2837_v37  ;;  %v2838_v21 = vunpack.i.l.bf16 %v2837_v37  ;;  %v1658_v53 = vsel %vm275_vm8, %v2768_v26, %v2769_v30 }
 0x313   :  { %v4534_v20 = vsel %vm1543_vm11, %v2843_v33, %v4518_v2  ;;  %2961 = vrot.lane.b32.xlu0 %v2960_v39, %s3063_s14  ;;  %v2753_v39 = vunpack.i.l.bf16 %v4372_v10  ;;  %v2975_v10 = vpack.i.bf16 %v4454_v59, %v4522_v41 }
 0x314   :  { %4901 = vst [vmem:[#allocation10_spill] sm:$0xff] %v4534_v20  ;;  %v2980_v61 = vpack.i.bf16 %v4518_v2, %v4534_v20  ;;  %v4544_v37 = vsel %vm310_vm9, %v2838_v21, %v4528_v55  ;;  %v2847_v32 = vpop.permute.xlu0 %2846  ;;  %v2394_v33 = vpack.c.bf16 %v4528_v55, %v1784_v17  ;;  %v2985_v17 = vpack.i.bf16 %v4480_v1, %v4526_v29 }
 0x315   :  { %v2396_v40 = vpack.c.bf16 %v4544_v37, %v4547_v25  ;;  %v2852_v50 = vpop.permute.xlu1 %2851  ;;  %v2849_v28 = vunpack.i.h.bf16 %v2847_v32  ;;  %v2848_v21 = vunpack.i.l.bf16 %v2847_v32  ;;  %v1677_v51 = vsel %vm275_vm8, %v2753_v39, %v2754_v19 }
 0x316   :  { %2981 = vrot.lane.b32.xlu1 %v2980_v61, %s3063_s14  ;;  %2395 = vmatprep.subr.bf16.mxu0 %v2394_v33  ;;  %v2763_v61 = vunpack.i.l.bf16 %v4380_v5  ;;  %v4568_v32 = vsel %vm221_vm5, %v2769_v30, %v2754_v19  ;;  %v2995_v30 = vpack.i.bf16 %v4386_v4, %v4394_v47  ;;  %v2853_v47 = vunpack.i.l.bf16 %v2852_v50 }
 0x317   :  { %2971 = vrot.lane.b32.xlu0 %v2970_v18, %s3063_s14  ;;  %2397 = vmatpush1.bf16.msra.mxu0 %v2396_v40  ;;  %v4571_v40 = vsel %vm221_vm5, %v1658_v53, %v1677_v51  ;;  %v2813_v18 = vunpack.i.l.bf16 %v4451_v38  ;;  %v4576_v29 = vsel %vm310_vm9, %v2848_v21, %v2849_v28  ;;  %v2759_v21 = vunpack.i.h.bf16 %v4376_v63 }
 0x318   :  { %v2857_v20 = vpop.permute.xlu0 %2856  ;;  %v2990_v19 = vpack.i.bf16 %v4568_v32, %v4571_v40  ;;  %v1796_v39 = vsel %vm310_vm9, %v4457_v27, %v2763_v61  ;;  %v3000_v63 = vpack.i.bf16 %v4384_v49, %v4390_v44 }
 0x319   :  { %v4565_v33 = vunpack.i.h.bf16 %v2857_v20  ;;  %v2858_v26 = vunpack.i.l.bf16 %v2857_v20  ;;  %v2862_v62 = vpop.permute.xlu1 %2861  ;;  %v3005_v4 = vpack.i.bf16 %v1796_v39, %v4495_v56  ;;  %v1798_v61 = vsel %vm310_vm9, %v4471_v11, %v2759_v21 }
 0x31a   :  { %2986 = vrot.lane.b32.xlu1 %v2985_v17, %s3063_s14  ;;  %v2834_v17 = vunpack.i.h.bf16 %v4477_v12  ;;  %v2863_v11 = vunpack.i.l.bf16 %v2862_v62 }
 0x31b   :  { %v4580_v5 = vsel %vm1740_vm12, %v2858_v26, %v4565_v33  ;;  %2976 = vrot.lane.b32.xlu0 %v2975_v10, %s3063_s14  ;;  %v2398_v20 = vpack.c.bf16 %v4565_v33, %v2849_v28  ;;  %v1814_v10 = vsel %vm310_vm9, %v4483_v43, %v2813_v18  ;;  %v2854_v26 = vunpack.i.h.bf16 %v2852_v50 }
 0x31c   :  { %v2400_v51 = vpack.c.bf16 %v4580_v5, %v4576_v29  ;;  %v2867_v38 = vpop.permute.xlu0 %2866  ;;  %v1828_v12 = vsel %vm221_vm5, %v1798_v61, %v1814_v10  ;;  %v1797_v18 = vsel %vm310_vm9, %v4487_v52, %v2834_v17 }
 0x31d   :  { %v1737_v53 = vpop.permute.xlu1 %1736  ;;  %2399 = vmatprep.subr.bf16.mxu0 %v2398_v20  ;;  %v1816_v50 = vsel %vm310_vm9, %v2849_v28, %v2854_v26  ;;  %v3015_v21 = vpack.i.bf16 %v1828_v12, %v4547_v25  ;;  %v3010_v10 = vpack.i.bf16 %v1797_v18, %v4501_v15  ;;  %v2868_v26 = vunpack.i.l.bf16 %v2867_v38 }
 0x31e   :  { %2996 = vrot.lane.b32.xlu1 %v2995_v30, %s3063_s14  ;;  %2401 = vmatpush1.bf16.msra.mxu0 %v2400_v51  ;;  %v1815_v30 = vsel %vm310_vm9, %v4528_v55, %v2853_v47  ;;  %v2864_v51 = vunpack.i.h.bf16 %v2862_v62  ;;  %v3025_v61 = vpack.i.bf16 %v1816_v50, %v4576_v29  ;;  %vm2000_vm9 = vcmask 957440  }
 0x31f   :  { %2991 = vrot.lane.b32.xlu0 %v2990_v19, %s3063_s14  ;;  %v2869_v19 = vunpack.i.h.bf16 %v2867_v38 }
 0x320   :  { %v4601_v20 = vpop.permute.xlu0 %1738  ;;  %v1742_v55 = vsel %vm1740_vm12, %v2863_v11, %v2864_v51 }
 0x321   :  { %v1823_v43 = vpop.permute.xlu1 %1822  ;;  %v1825_v62 = vsel %vm1740_vm12, %v2864_v51, %v2869_v19  ;;  %v1743_v29 = vsel %vm1740_vm12, %v1737_v53, %v4601_v20  ;;  %v34_v19 = vld [vmem:[%s4815_s2 + $0x8] sm:$0xff] }
 0x322   :  { %3006 = vrot.lane.b32.xlu1 %v3005_v4, %s3063_s14  ;;  %v3020_v4 = vpack.i.bf16 %v1815_v30, %v4544_v37  ;;  %2081 = vmatprep.mubr.f32.mxu1 %v34_v19 }
 0x323   :  { %3001 = vrot.lane.b32.xlu0 %v3000_v63, %s3063_s14 }
 0x324   :  { %v2872_v39 = vpop.permute.xlu0 %2871 }
 0x325   :  { %v2874_v17 = vunpack.i.h.bf16 %v2872_v39  ;;  %v2873_v56 = vunpack.i.l.bf16 %v2872_v39  ;;  %v2877_v28 = vpop.permute.xlu1 %2876 }
 0x326   :  { %v2879_v44 = vunpack.i.h.bf16 %v2877_v28  ;;  %v2878_v47 = vunpack.i.l.bf16 %v2877_v28  ;;  %3016 = vrot.lane.b32.xlu1 %v3015_v21, %s3063_s14  ;;  %v3035_v21 = vpack.i.bf16 %v1825_v62, %v1742_v55 }
 0x327   :  { %v2338_v25 = vpack.c.bf16 %v2874_v17, %v4281_v14  ;;  %v1501_v63 = vsel %vm142_vm7, %v2873_v56, %v2874_v17  ;;  %3011 = vrot.lane.b32.xlu0 %v3010_v10, %s3063_s14 }
 0x328   :  { %v2340_v37 = vpack.c.bf16 %v1501_v63, %v4278_v48  ;;  %v1762_v38 = vsel %vm275_vm8, %v2878_v47, %v2879_v44  ;;  %v2882_v12 = vpop.permute.xlu0 %2881  ;;  %v1786_v18 = vsel %vm221_vm5, %v4601_v20, %v2879_v44  ;;  %v1824_v48 = vsel %vm1740_vm12, %v4565_v33, %v2868_v26 }
 0x329   :  { %v2884_v50 = vunpack.i.h.bf16 %v2882_v12  ;;  %v2883_v30 = vunpack.i.l.bf16 %v2882_v12  ;;  %2339 = vmatprep.subr.bf16.mxu1 %v2338_v25  ;;  %v2887_v11 = vpop.permute.xlu1 %2886  ;;  %v2402_v14 = vpack.c.bf16 %v1786_v18, %v2864_v51  ;;  %v1785_v56 = vsel %vm221_vm5, %v1743_v29, %v1762_v38  ;;  %v36_v51 = vld [vmem:[%s4815_s2 + $0x18] sm:$0xff] }
 0x32a   :  { %v2889_v53 = vunpack.i.h.bf16 %v2887_v11  ;;  %v2888_v39 = vunpack.i.l.bf16 %v2887_v11  ;;  %2341 = vmatpush1.bf16.msra.mxu1 %v2340_v37  ;;  %3026 = vrot.lane.b32.xlu1 %v3025_v61, %s3063_s14  ;;  %v2404_v44 = vpack.c.bf16 %v1785_v56, %v1742_v55  ;;  %v3030_v28 = vpack.i.bf16 %v1824_v48, %v4580_v5 }
 0x32b   :  { %2403 = vmatprep.subr.bf16.mxu0 %v2402_v14  ;;  %3021 = vrot.lane.b32.xlu0 %v3020_v4, %s3063_s14  ;;  %v1503_v10 = vsel %vm142_vm7, %v2883_v30, %v2884_v50  ;;  %v1826_v4 = vsel %vm1740_vm12, %v4601_v20, %v1823_v43 }
 0x32c   :  { %v1522_v17 = vsel %vm142_vm7, %v2888_v39, %v2889_v53  ;;  %v2892_v33 = vpop.permute.xlu0 %2891  ;;  %2405 = vmatpush1.bf16.msra.mxu0 %v2404_v44  ;;  %2238 = vmatprep.mubr.msk.f32.mxu0 %vm2000_vm9, %v36_v51  ;;  %v1774_v25 = vsel %vm221_vm5, %v2884_v50, %v2889_v53  ;;  %v1830_v38 = vsel %vm221_vm5, %v1826_v4, 1.0  ;;  %v1829_v50 = vsel %vm221_vm5, %v1743_v29, 1.0 }
 0x32d   :  { %v2894_v61 = vunpack.i.h.bf16 %v2892_v33  ;;  %v2893_v26 = vunpack.i.l.bf16 %v2892_v33  ;;  %v2897_v47 = vpop.permute.xlu1 %2896  ;;  %v1773_v62 = vsel %vm221_vm5, %v1503_v10, %v1522_v17 }
 0x32e   :  { %3036 = vrot.lane.b32.xlu1 %v3035_v21, %s3063_s14  ;;  %v2899_v39 = vunpack.i.h.bf16 %v2897_v47  ;;  %v2898_v44 = vunpack.i.l.bf16 %v2897_v47 }
 0x32f   :  { %v1502_v55 = vsel %vm142_vm7, %v2893_v26, %v2894_v61  ;;  %v2342_v63 = vpack.c.bf16 %v1774_v25, %v2894_v61  ;;  %3031 = vrot.lane.b32.xlu0 %v3030_v28, %s3063_s14 }
 0x330   :  { %v2344_v5 = vpack.c.bf16 %v1773_v62, %v1502_v55  ;;  %v2907_v37 = vpop.permute.xlu0 %2906  ;;  %v1763_v26 = vsel %vm275_vm8, %v2898_v44, %v2899_v39 }
 0x331   :  { %v2909_v12 = vunpack.i.h.bf16 %v2907_v37  ;;  %v2908_v18 = vunpack.i.l.bf16 %v2907_v37  ;;  %v2902_v30 = vpop.permute.xlu1 %2901  ;;  %2343 = vmatprep.subr.bf16.mxu1 %v2342_v63 }
 0x332   :  { %v2904_v20 = vunpack.i.h.bf16 %v2902_v30  ;;  %v2903_v43 = vunpack.i.l.bf16 %v2902_v30  ;;  %2345 = vmatpush1.bf16.msra.mxu1 %v2344_v5  ;;  %1931 = vrot.lane.b32.xlu1 %v1830_v38, %s3063_s14 }
 0x333   :  { %v1524_v11 = vsel %vm142_vm7, %v2908_v18, %v2909_v12  ;;  %1929 = vrot.lane.b32.xlu0 %v1829_v50, %s3063_s14 }
 0x334   :  { %v2346_v14 = vpack.c.bf16 %v2909_v12, %v2904_v20  ;;  %v1523_v56 = vsel %vm142_vm7, %v2903_v43, %v2904_v20  ;;  %v2917_v19 = vpop.permute.xlu0 %2916 }
 0x335   :  { %v2348_v48 = vpack.c.bf16 %v1524_v11, %v1523_v56  ;;  %v2912_v53 = vpop.permute.xlu1 %2911  ;;  %v2919_v51 = vunpack.i.h.bf16 %v2917_v19  ;;  %v2918_v21 = vunpack.i.l.bf16 %v2917_v19 }
 0x336   :  { %2347 = vmatprep.subr.bf16.mxu1 %v2346_v14  ;;  %v2914_v17 = vunpack.i.h.bf16 %v2912_v53  ;;  %v2913_v33 = vunpack.i.l.bf16 %v2912_v53 }
 0x337   :  { %2349 = vmatpush1.bf16.msra.mxu1 %v2348_v48  ;;  %v1934_v63 = vsel %vm275_vm8, %v2918_v21, %v2919_v51  ;;  %v4902_v21 = vpack.c.bf16 %v4235_v46, %v4232_v3  ;;  %v4905_v3 = vpack.c.bf16 %v4463_v9, %v4443_v0  ;;  %v4906_v46 = vpack.c.bf16 %v4413_v7, %v4400_v8 }
 0x338   :  { %v2927_v10 = vpop.permute.xlu0 %2926  ;;  %v2410_v37 = vpack.c.bf16 %v2919_v51, %v2914_v17  ;;  %v1933_v38 = vsel %vm275_vm8, %v2913_v33, %v2914_v17  ;;  %v2382_v7 = vpack.c.bf16 %v4568_v32, %v4480_v1  ;;  %v2390_v0 = vpack.c.bf16 %v4487_v52, %v4457_v27  ;;  %v4919_v1 = vld [vmem:[#allocation7_spill] sm:$0xff]  ;;  %v42_v52 = vld [vmem:[%s4815_s2 + $0x48] sm:$0xff] }
 0x339   :  { %v2929_v29 = vunpack.i.h.bf16 %v2927_v10  ;;  %v2928_v28 = vunpack.i.l.bf16 %v2927_v10  ;;  %v2922_v61 = vpop.permute.xlu1 %2921  ;;  %v2412_v56 = vpack.c.bf16 %v1934_v63, %v1933_v38  ;;  %v2362_v10 = vpack.c.bf16 %v4404_v45, %v4295_v24  ;;  %v37_v27 = vld [vmem:[%s4815_s2 + $0x20] sm:$0xff] }
 0x33a   :  { %v2924_v55 = vunpack.i.h.bf16 %v2922_v61  ;;  %v2923_v62 = vunpack.i.l.bf16 %v2922_v61  ;;  %v2378_v24 = vpack.c.bf16 %v4454_v59, %v4518_v2  ;;  %v4917_v59 = vld [vmem:[#allocation6_spill] sm:$0xff]  ;;  %v46_v2 = vld [vmem:[%s4815_s2 + $0x68] sm:$0xff] }
 0x33b   :  { %v1764_v4 = vsel %vm275_vm8, %v2928_v28, %v2929_v29  ;;  %v2406_v25 = vpack.c.bf16 %v2929_v29, %v2899_v39 }
 0x33c   :  { %v2408_v47 = vpack.c.bf16 %v1764_v4, %v1763_v26  ;;  %v2932_v5 = vpop.permute.xlu0 %2931  ;;  %v1544_v50 = vsel %vm1543_vm11, %v2923_v62, %v2924_v55 }
 0x33d   :  { %v2934_v12 = vunpack.i.h.bf16 %v2932_v5  ;;  %v2933_v18 = vunpack.i.l.bf16 %v2932_v5  ;;  %v2937_v30 = vpop.permute.xlu1 %2936  ;;  %2407 = vmatprep.subr.bf16.mxu0 %v2406_v25 }
 0x33e   :  { %v2939_v20 = vunpack.i.h.bf16 %v2937_v30  ;;  %v2938_v43 = vunpack.i.l.bf16 %v2937_v30  ;;  %2409 = vmatpush1.bf16.msra.mxu0 %v2408_v47 }
 0x33f   :  { %v1545_v11 = vsel %vm1543_vm11, %v2933_v18, %v2934_v12  ;;  %v2350_v14 = vpack.c.bf16 %v2934_v12, %v2924_v55  ;;  %2411 = vmatprep.subr.bf16.mxu0 %v2410_v37 }
 0x340   :  { %v2352_v19 = vpack.c.bf16 %v1545_v11, %v1544_v50  ;;  %v1546_v48 = vsel %vm1543_vm11, %v2938_v43, %v2939_v20  ;;  %v1776_v53 = vsel %vm221_vm5, %v2939_v20, %v4287_v34  ;;  %v4903_v34 = vpack.c.bf16 %v4218_v16, %v4224_v23 }
 0x341   :  { %2351 = vmatprep.subr.bf16.mxu1 %v2350_v14  ;;  %v2354_v39 = vpack.c.bf16 %v4310_v54, %v1776_v53  ;;  %v1775_v44 = vsel %vm221_vm5, %v1546_v48, %v4285_v57  ;;  %v2364_v57 = vpack.c.bf16 %v4409_v58, %v4299_v22  ;;  %v4904_v54 = vpack.c.bf16 %v4449_v31, %v4430_v13  ;;  %v4909_v22 = vld [vmem:[#allocation8_spill] sm:$0xff]  ;;  %v4912_v58 = vld [vmem:[#allocation10_spill] sm:$0xff]  ;;  %v4914_v13 = vld [vmem:[#allocation5_spill] sm:$0xff] }
 0x342   :  { %2353 = vmatpush1.bf16.msra.mxu1 %v2352_v19  ;;  %2413 = vmatpush1.bf16.msra.mxu0 %v2412_v56  ;;  %v2356_v51 = vpack.c.bf16 %v4321_v42, %v1775_v44  ;;  %v4907_v16 = vpack.c.bf16 %v4421_v6, %v4417_v36  ;;  %v4908_v23 = vpack.c.bf16 %v4491_v60, %v4435_v35  ;;  %v4910_v42 = vld [vmem:[#allocation3_spill] sm:$0xff]  ;;  %v4913_v36 = vld [vmem:[#allocation9_spill] sm:$0xff]  ;;  %v4916_v31 = vld [vmem:[#allocation4_spill] sm:$0xff] }
 0x343   :  { %2355 = vmatprep.subr.bf16.mxu1 %v2354_v39  ;;  %v4911_v45 = vpack.c.bf16 %v4909_v22, %v4910_v42  ;;  %v2380_v8 = vpack.c.bf16 %v4522_v41, %v4912_v58  ;;  %v2384_v6 = vpack.c.bf16 %v4571_v40, %v4913_v36  ;;  %v4915_v35 = vpack.c.bf16 %v4384_v49, %v4914_v13  ;;  %v33_v41 = vld [vmem:[%s4815_s2] sm:$0xff]  ;;  %v38_v49 = vld [vmem:[%s4815_s2 + $0x28] sm:$0xff] }
 0x344   :  { %v4918_v9 = vpack.c.bf16 %v4916_v31, %v4917_v59  ;;  %v4920_v60 = vpack.c.bf16 %v4501_v15, %v4919_v1  ;;  %v41_v15 = vld [vmem:[%s4815_s2 + $0x40] sm:$0xff] }
 0x345   :  { %v45_v40 = vld [vmem:[%s4815_s2 + $0x60] sm:$0xff] }
 0x346   :  { %2357 = vmatpush1.bf16.msra.mxu1 %v2356_v51 }
 0x347   :  { %2359 = vmatprep.subr.bf16.mxu1 %v4902_v21 }
 0x34a   :  { %2361 = vmatpush1.bf16.msra.mxu1 %v4903_v34 }
 0x34b   :  { %2363 = vmatprep.subr.bf16.mxu1 %v2362_v10 }
 0x34e   :  { %2365 = vmatpush1.bf16.msra.mxu1 %v2364_v57 }
 0x34f   :  { %2367 = vmatprep.subr.bf16.mxu1 %v4904_v54 }
 0x352   :  { %2369 = vmatpush1.bf16.msra.mxu1 %v4905_v3 }
 0x353   :  { %2371 = vmatprep.subr.bf16.mxu1 %v4906_v46 }
 0x356   :  { %2373 = vmatpush1.bf16.msra.mxu1 %v4907_v16 }
 0x357   :  { %2375 = vmatprep.subr.bf16.mxu1 %v4908_v23 }
 0x35a   :  { %2377 = vmatpush1.bf16.msra.mxu1 %v4911_v45 }
 0x35b   :  { %2379 = vmatprep.subr.bf16.mxu1 %v2378_v24 }
 0x35e   :  { %2381 = vmatpush1.bf16.msra.mxu1 %v2380_v8 }
 0x35f   :  { %2383 = vmatprep.subr.bf16.mxu1 %v2382_v7 }
 0x362   :  { %2385 = vmatpush1.bf16.msra.mxu1 %v2384_v6 }
 0x363   :  { %2387 = vmatprep.subr.bf16.mxu1 %v4915_v35 }
 0x366   :  { %2389 = vmatpush1.bf16.msra.mxu1 %v4918_v9 }
 0x367   :  { %2391 = vmatprep.subr.bf16.mxu1 %v2390_v0 }
 0x36a   :  { %2393 = vmatpush1.bf16.msra.mxu1 %v4920_v60 }
 0x36d   :  { %2082 = vmatmul.mubr.f32.vlgmr.msra.gmra.mrb[12].mxu1 %v33_v41 }
 0x36e   :  { %2087 = vmatprep.mubr.f32.mxu1 %v38_v49 }
 0x371   :  { %2088 = vmatmul.mubr.f32.gmra.mrb[14].mxu1 %v37_v27 }
 0x372   :  { %2093 = vmatprep.mubr.f32.mxu1 %v42_v52 }
 0x375   :  { %v2942_v32 = vpop.permute.xlu1 %2941  ;;  %2094 = vmatmul.mubr.f32.gmra.mrb[16].mxu1 %v41_v15 }
 0x376   :  { %2099 = vmatprep.mubr.f32.mxu1 %v46_v2  ;;  %v2944_v33 = vunpack.i.h.bf16 %v2942_v32  ;;  %v2943_v29 = vunpack.i.l.bf16 %v2942_v32 }
 0x378   :  { %v1935_v55 = vsel %vm275_vm8, %v2943_v29, %v2944_v33 }
 0x379   :  { %2100 = vmatmul.mubr.f32.gmra.mrb[18].mxu1 %v45_v40  ;;  %v2947_v17 = vpop.permute.xlu1 %2946 }
 0x37a   :  { %v2949_v4 = vunpack.i.h.bf16 %v2947_v17  ;;  %v2948_v25 = vunpack.i.l.bf16 %v2947_v17 }
 0x37c   :  { %v1938_v18 = vsel %vm275_vm8, %v2948_v25, %v2949_v4 }
 0x37d   :  { %v2952_v28 = vpop.permute.xlu0 %2951  ;;  %v2967_v5 = vpop.permute.xlu1 %2966 }
 0x37e   :  { %v2954_v61 = vunpack.i.h.bf16 %v2952_v28  ;;  %v2953_v26 = vunpack.i.l.bf16 %v2952_v28  ;;  %v2969_v30 = vunpack.i.h.bf16 %v2967_v5  ;;  %v2968_v20 = vunpack.i.l.bf16 %v2967_v5 }
 0x380   :  { %v2414_v62 = vpack.c.bf16 %v2954_v61, %v2944_v33  ;;  %v1936_v63 = vsel %vm275_vm8, %v2953_v26, %v2954_v61  ;;  %v1940_v48 = vsel %vm275_vm8, %v2968_v20, %v2969_v30 }
 0x381   :  { %v2416_v47 = vpack.c.bf16 %v1936_v63, %v1935_v55  ;;  %v2957_v37 = vpop.permute.xlu0 %2956 }
 0x382   :  { %v2959_v38 = vunpack.i.h.bf16 %v2957_v37  ;;  %v2958_v12 = vunpack.i.l.bf16 %v2957_v37  ;;  %2415 = vmatprep.subr.bf16.mxu0 %v2414_v62 }
 0x383   :  { %2417 = vmatpush1.bf16.msra.mxu0 %v2416_v47 }
 0x384   :  { %v1937_v43 = vsel %vm275_vm8, %v2958_v12, %v2959_v38  ;;  %v2418_v50 = vpack.c.bf16 %v2949_v4, %v2959_v38 }
 0x385   :  { %v2420_v11 = vpack.c.bf16 %v1938_v18, %v1937_v43  ;;  %v2962_v14 = vpop.permute.xlu0 %2961 }
 0x386   :  { %v2964_v56 = vunpack.i.h.bf16 %v2962_v14  ;;  %v2963_v19 = vunpack.i.l.bf16 %v2962_v14  ;;  %2419 = vmatprep.subr.bf16.mxu0 %v2418_v50 }
 0x387   :  { %2421 = vmatpush1.bf16.msra.mxu0 %v2420_v11 }
 0x388   :  { %v1939_v53 = vsel %vm275_vm8, %v2963_v19, %v2964_v56  ;;  %v2422_v39 = vpack.c.bf16 %v2969_v30, %v2964_v56  ;;  %v2982_v44 = vpop.permute.xlu1 %2981 }
 0x389   :  { %v2424_v51 = vpack.c.bf16 %v1940_v48, %v1939_v53  ;;  %v2984_v21 = vunpack.i.h.bf16 %v2982_v44  ;;  %v2983_v10 = vunpack.i.l.bf16 %v2982_v44  ;;  %v2972_v34 = vpop.permute.xlu0 %2971 }
 0x38a   :  { %v2974_v57 = vunpack.i.h.bf16 %v2972_v34  ;;  %v2973_v54 = vunpack.i.l.bf16 %v2972_v34  ;;  %2423 = vmatprep.subr.bf16.mxu0 %v2422_v39 }
 0x38b   :  { %v1942_v3 = vsel %vm275_vm8, %v2983_v10, %v2984_v21  ;;  %2425 = vmatpush1.bf16.msra.mxu0 %v2424_v51 }
 0x38c   :  { %v1941_v46 = vsel %vm275_vm8, %v2973_v54, %v2974_v57  ;;  %v2426_v16 = vpack.c.bf16 %v2984_v21, %v2974_v57  ;;  %v2987_v23 = vpop.permute.xlu1 %2986 }
 0x38d   :  { %v2428_v24 = vpack.c.bf16 %v1942_v3, %v1941_v46  ;;  %v2989_v22 = vunpack.i.h.bf16 %v2987_v23  ;;  %v2988_v42 = vunpack.i.l.bf16 %v2987_v23  ;;  %v2977_v45 = vpop.permute.xlu0 %2976 }
 0x38e   :  { %v2979_v58 = vunpack.i.h.bf16 %v2977_v45  ;;  %v2978_v8 = vunpack.i.l.bf16 %v2977_v45  ;;  %2427 = vmatprep.subr.bf16.mxu0 %v2426_v16  ;;  %v35_v16 = vld [vmem:[%s4815_s2 + $0x10] sm:$0xff] }
 0x38f   :  { %v1944_v7 = vsel %vm275_vm8, %v2988_v42, %v2989_v22  ;;  %2429 = vmatpush1.bf16.msra.mxu0 %v2428_v24  ;;  %v40_v24 = vld [vmem:[%s4815_s2 + $0x38] sm:$0xff]  ;;  %v43_v45 = vld [vmem:[%s4815_s2 + $0x50] sm:$0xff] }
 0x390   :  { %v2430_v36 = vpack.c.bf16 %v2989_v22, %v2979_v58  ;;  %v1943_v6 = vsel %vm275_vm8, %v2978_v8, %v2979_v58  ;;  %v2997_v13 = vpop.permute.xlu1 %2996  ;;  %v39_v22 = vld [vmem:[%s4815_s2 + $0x30] sm:$0xff]  ;;  %v44_v42 = vld [vmem:[%s4815_s2 + $0x58] sm:$0xff] }
 0x391   :  { %v2432_v35 = vpack.c.bf16 %v1944_v7, %v1943_v6  ;;  %v2999_v0 = vunpack.i.h.bf16 %v2997_v13  ;;  %v2998_v31 = vunpack.i.l.bf16 %v2997_v13  ;;  %v2992_v59 = vpop.permute.xlu0 %2991  ;;  %v48_v58 = vld [vmem:[%s4815_s2 + $0x78] sm:$0xff]  ;;  %v47_v8 = vld [vmem:[%s4815_s2 + $0x70] sm:$0xff] }
 0x392   :  { %v2994_v9 = vunpack.i.h.bf16 %v2992_v59  ;;  %v2993_v1 = vunpack.i.l.bf16 %v2992_v59  ;;  %2431 = vmatprep.subr.bf16.mxu0 %v2430_v36 }
 0x393   :  { %v1946_v60 = vsel %vm275_vm8, %v2998_v31, %v2999_v0  ;;  %2433 = vmatpush1.bf16.msra.mxu0 %v2432_v35 }
 0x394   :  { %v2434_v41 = vpack.c.bf16 %v2999_v0, %v2994_v9  ;;  %v1945_v49 = vsel %vm275_vm8, %v2993_v1, %v2994_v9  ;;  %v3007_v27 = vpop.permute.xlu1 %3006 }
 0x395   :  { %v2436_v52 = vpack.c.bf16 %v1946_v60, %v1945_v49  ;;  %v3009_v15 = vunpack.i.h.bf16 %v3007_v27  ;;  %v3008_v2 = vunpack.i.l.bf16 %v3007_v27  ;;  %v3002_v32 = vpop.permute.xlu0 %3001 }
 0x396   :  { %v3004_v40 = vunpack.i.h.bf16 %v3002_v32  ;;  %v3003_v17 = vunpack.i.l.bf16 %v3002_v32  ;;  %2435 = vmatprep.subr.bf16.mxu0 %v2434_v41 }
 0x397   :  { %v1948_v33 = vsel %vm275_vm8, %v3008_v2, %v3009_v15  ;;  %2437 = vmatpush1.bf16.msra.mxu0 %v2436_v52 }
 0x398   :  { %v2438_v29 = vpack.c.bf16 %v3009_v15, %v3004_v40  ;;  %v1947_v28 = vsel %vm275_vm8, %v3003_v17, %v3004_v40  ;;  %v3017_v61 = vpop.permute.xlu1 %3016 }
 0x399   :  { %v2440_v26 = vpack.c.bf16 %v1948_v33, %v1947_v28  ;;  %v3019_v4 = vunpack.i.h.bf16 %v3017_v61  ;;  %v3018_v25 = vunpack.i.l.bf16 %v3017_v61  ;;  %v3012_v55 = vpop.permute.xlu0 %3011 }
 0x39a   :  { %v3014_v62 = vunpack.i.h.bf16 %v3012_v55  ;;  %v3013_v63 = vunpack.i.l.bf16 %v3012_v55  ;;  %2439 = vmatprep.subr.bf16.mxu0 %v2438_v29 }
 0x39b   :  { %v1950_v47 = vsel %vm275_vm8, %v3018_v25, %v3019_v4  ;;  %2441 = vmatpush1.bf16.msra.mxu0 %v2440_v26 }
 0x39c   :  { %v2442_v5 = vpack.c.bf16 %v3019_v4, %v3014_v62  ;;  %v1949_v37 = vsel %vm275_vm8, %v3013_v63, %v3014_v62  ;;  %v3027_v38 = vpop.permute.xlu1 %3026 }
 0x39d   :  { %v2444_v12 = vpack.c.bf16 %v1950_v47, %v1949_v37  ;;  %v3029_v18 = vunpack.i.h.bf16 %v3027_v38  ;;  %v3028_v30 = vunpack.i.l.bf16 %v3027_v38  ;;  %v3022_v20 = vpop.permute.xlu0 %3021 }
 0x39e   :  { %v3024_v43 = vunpack.i.h.bf16 %v3022_v20  ;;  %v3023_v50 = vunpack.i.l.bf16 %v3022_v20  ;;  %2443 = vmatprep.subr.bf16.mxu0 %v2442_v5 }
 0x39f   :  { %v1952_v11 = vsel %vm275_vm8, %v3028_v30, %v3029_v18  ;;  %2445 = vmatpush1.bf16.msra.mxu0 %v2444_v12 }
 0x3a0   :  { %v2446_v14 = vpack.c.bf16 %v3029_v18, %v3024_v43  ;;  %v1951_v56 = vsel %vm275_vm8, %v3023_v50, %v3024_v43  ;;  %v3037_v19 = vpop.permute.xlu1 %3036 }
 0x3a1   :  { %v2448_v48 = vpack.c.bf16 %v1952_v11, %v1951_v56  ;;  %v3039_v53 = vunpack.i.h.bf16 %v3037_v19  ;;  %v3038_v39 = vunpack.i.l.bf16 %v3037_v19  ;;  %v3032_v44 = vpop.permute.xlu0 %3031 }
 0x3a2   :  { %v3034_v51 = vunpack.i.h.bf16 %v3032_v44  ;;  %v3033_v21 = vunpack.i.l.bf16 %v3032_v44  ;;  %2447 = vmatprep.subr.bf16.mxu0 %v2446_v14 }
 0x3a3   :  { %v1954_v10 = vsel %vm275_vm8, %v3038_v39, %v3039_v53  ;;  %2449 = vmatpush1.bf16.msra.mxu0 %v2448_v48 }
 0x3a4   :  { %v2450_v34 = vpack.c.bf16 %v3039_v53, %v3034_v51  ;;  %v1953_v57 = vsel %vm275_vm8, %v3033_v21, %v3034_v51  ;;  %v1932_v3 = vpop.permute.xlu1 %1931 }
 0x3a5   :  { %v2452_v54 = vpack.c.bf16 %v1954_v10, %v1953_v57  ;;  %v1930_v46 = vpop.permute.xlu0 %1929 }
 0x3a6   :  { %2451 = vmatprep.subr.bf16.mxu0 %v2450_v34  ;;  %v1955_v23 = vsel %vm275_vm8, %v1930_v46, %v1932_v3 }
 0x3a7   :  { %2453 = vmatpush1.bf16.msra.mxu0 %v2452_v54 }
 0x3a8   :  { %2236 = vmatprep.subr.msk.mxu0 %vm230_vm4, %v1932_v3 }
 0x3ab   :  { %2237 = vmatpush1.msk.msra.mxu0 %vm230_vm4, %v1955_v23  ;;  %vm2204_vm4 = vcmask 785408  }
 0x3ac   :  { %2171 = vmatmul.mubr.f32.vlgmr.msra.gmra.mrb[12].mxu0 %v35_v16 }
 0x3ad   :  { %2239 = vmatprep.mubr.msk.f32.mxu0 %vm2000_vm9, %v40_v24 }
 0x3b0   :  { %2177 = vmatmul.mubr.f32.gmra.mrb[14].mxu0 %v39_v22 }
 0x3b1   :  { %2240 = vmatprep.mubr.msk.f32.mxu0 %vm2000_vm9, %v44_v42 }
 0x3b4   :  { %2183 = vmatmul.mubr.f32.gmra.mrb[16].mxu0 %v43_v45 }
 0x3b5   :  { %2241 = vmatprep.mubr.msk.f32.mxu0 %vm2000_vm9, %v48_v58 }
 0x3b8   :  { %2189 = vmatmul.mubr.f32.gmra.mrb[18].mxu0 %v47_v8 }
 0x440   :  { %v2083_v7 = vpop.f32.mrb[12].mxu1 }
 0x441   :  { %v2085_v36 = vpop.f32.mrb[13].mxu1 }
 0x444   :  { %v2089_v6 = vpop.f32.mrb[14].mxu1 }
 0x445   :  { %v2091_v13 = vpop.f32.mrb[15].mxu1 }
 0x448   :  { %v2095_v35 = vpop.f32.mrb[16].mxu1 }
 0x449   :  { %v2097_v0 = vpop.f32.mrb[17].mxu1 }
 0x44c   :  { %v2101_v31 = vpop.f32.mrb[18].mxu1 }
 0x44d   :  { %v2103_v59 = vpop.f32.mrb[19].mxu1 }
 0x47f   :  { %v2172_v9 = vpop.f32.mrb[12].mxu0 }
 0x480   :  { %v2173_v1 = vadd.f32 %v2172_v9, %v2083_v7  ;;  %v2174_v60 = vpop.f32.mrb[13].mxu0 }
 0x481   :  { %v2175_v41 = vadd.f32 %v2174_v60, %v2085_v36 }
 0x482   :  { %v2195_v49 = vmax.f32 %v2173_v1, 0.0 }
 0x483   :  { %v2196_v27 = vmax.f32 %v2175_v41, 0.0  ;;  %v2178_v52 = vpop.f32.mrb[14].mxu0 }
 0x484   :  { %2203 = vst [vmem:[%s4816_s3] sm:$0xff] %v2195_v49  ;;  %v2179_v15 = vadd.f32 %v2178_v52, %v2089_v6  ;;  %v2180_v2 = vpop.f32.mrb[15].mxu0 }
 0x485   :  { %2205 = vst.msk [vmem:[%s4816_s3 + $0x8] sm:$0xff] %vm2204_vm4, %v2196_v27  ;;  %v2181_v32 = vadd.f32 %v2180_v2, %v2091_v13 }
 0x486   :  { %v2197_v40 = vmax.f32 %v2179_v15, 0.0 }
 0x487   :  { %v2198_v17 = vmax.f32 %v2181_v32, 0.0  ;;  %v2184_v33 = vpop.f32.mrb[16].mxu0 }
 0x488   :  { %2206 = vst [vmem:[%s4816_s3 + $0x10] sm:$0xff] %v2197_v40  ;;  %v2185_v29 = vadd.f32 %v2184_v33, %v2095_v35  ;;  %v2186_v28 = vpop.f32.mrb[17].mxu0 }
 0x489   :  { %2207 = vst.msk [vmem:[%s4816_s3 + $0x18] sm:$0xff] %vm2204_vm4, %v2198_v17  ;;  %v2187_v61 = vadd.f32 %v2186_v28, %v2097_v0 }
 0x48a   :  { %v2199_v26 = vmax.f32 %v2185_v29, 0.0 }
 0x48b   :  { %v2200_v4 = vmax.f32 %v2187_v61, 0.0  ;;  %v2190_v25 = vpop.f32.mrb[18].mxu0 }
 0x48c   :  { %2208 = vst [vmem:[%s4816_s3 + $0x20] sm:$0xff] %v2199_v26  ;;  %v2191_v55 = vadd.f32 %v2190_v25, %v2101_v31  ;;  %v2192_v62 = vpop.f32.mrb[19].mxu0 }
 0x48d   :  { %2209 = vst.msk [vmem:[%s4816_s3 + $0x28] sm:$0xff] %vm2204_vm4, %v2200_v4  ;;  %v2193_v63 = vadd.f32 %v2192_v62, %v2103_v59 }
 0x48e   :  { %v2201_v47 = vmax.f32 %v2191_v55, 0.0 }
 0x48f   :  { %v2202_v5 = vmax.f32 %v2193_v63, 0.0 }
 0x490   :  { %2210 = vst [vmem:[%s4816_s3 + $0x30] sm:$0xff] %v2201_v47 }
 0x491   :  { %2211 = vst.msk [vmem:[%s4816_s3 + $0x38] sm:$0xff] %vm2204_vm4, %v2202_v5 }

</bundles_post_ra>
